<compile_context>
chip_gen: v6e
topology: v6e:2x2x1
jax: 0.10.0
libtpu: 0.0.40
codegen_flags: <defaults>
</compile_context>

<pallas_src>
import functools

import jax
import jax.numpy as jnp
from jax.experimental import pallas as pl
from jax.experimental.pallas import tpu as pltpu


def _round_up(n, m):
    return ((n + m - 1) // m) * m


def _pick_time_chunk(T, cap=32):
    """Largest divisor of T that is <= cap (bounds xproj scratch in T)."""
    for c in range(min(T, cap), 0, -1):
        if T % c == 0:
            return c
    return T


def _vmem_limit_bytes(T, Bs, I, Hp, t_chunk, mm_bytes=2):
    """Explicit scoped-VMEM limit sized from the real buffer sum (+ headroom)."""
    f32 = 4
    n_buf = 2  # worst-case double buffering on pipelined operands
    inputs = (T * Bs * I * mm_bytes            # x (bf16)
              + I * 4 * Hp * mm_bytes          # W_ih^T (bf16)
              + Hp * 4 * Hp * mm_bytes         # W_hh^T (bf16)
              + 4 * Hp * f32 + Hp * f32 + f32  # bias, fc weight, fc bias
              + Bs * f32)                      # output
    scratch = (t_chunk * Bs * 4 * Hp + 2 * Bs * Hp) * f32   # xproj chunk + h + c
    total = n_buf * inputs + scratch
    return int(min(max(2 * total + (8 << 20), 32 << 20), 100 << 20))


def lstm_kernel(x_ref, wih_ref, whh_ref, b_ref, wfc_ref, bfc_ref,
                out_ref, xproj_ref, h_ref, c_ref, *, t_chunk, unroll):
    """One batch-shard LSTM forward (whole recurrence in one invocation).

    x_ref     : (T*Bs, I)        time-major, batch-padded, flattened, bf16
    wih_ref   : (I, 4*Hp)        W_ih^T, gate blocks zero-padded H -> Hp, bf16
    whh_ref   : (Hp, 4*Hp)       W_hh^T, zero-padded, bf16
    b_ref     : (1, 4*Hp)        b_ih + b_hh, zero-padded, f32
    wfc_ref   : (1, Hp)          fc weight, zero-padded, f32
    bfc_ref   : (1, 1)           fc bias, f32
    out_ref   : (Bs, 1)          f32
    xproj_ref : VMEM (t_chunk*Bs, 4*Hp) f32 scratch (per-chunk input projection)
    h_ref/c_ref : VMEM (Bs, Hp) f32 scratch (recurrent state)
    """
    Bs, Hp = h_ref.shape
    T = x_ref.shape[0] // Bs
    n_chunks = T // t_chunk
    rows_per_chunk = t_chunk * Bs

    h_ref[...] = jnp.zeros_like(h_ref)
    c_ref[...] = jnp.zeros_like(c_ref)

    def chunk_body(ci, carry):
        # ---- Phase 1 (per chunk): time-parallel input projection, bf16 MXU,
        # f32 accumulate, bias folded in once.
        c0 = pl.multiple_of(ci * rows_per_chunk, rows_per_chunk)
        xproj_ref[...] = (
            jnp.dot(x_ref[pl.ds(c0, rows_per_chunk), :], wih_ref[...],
                    preferred_element_type=jnp.float32)
            + b_ref[...])

        # ---- Phase 2: serial recurrence; gate math / state stay f32.
        def step(t, carry2):
            row = pl.multiple_of(t * Bs, Bs)
            gates = xproj_ref[pl.ds(row, Bs), :] + jnp.dot(
                h_ref[...].astype(whh_ref.dtype), whh_ref[...],
                preferred_element_type=jnp.float32)
            # Hp is a multiple of 128 -> every gate slice is lane-aligned.
            # PyTorch gate order: input, forget, cell(g), output.
            i_g = jax.nn.sigmoid(gates[:, 0 * Hp:1 * Hp])
            f_g = jax.nn.sigmoid(gates[:, 1 * Hp:2 * Hp])
            g_g = jnp.tanh(gates[:, 2 * Hp:3 * Hp])
            o_g = jax.nn.sigmoid(gates[:, 3 * Hp:4 * Hp])
            c_new = f_g * c_ref[...] + i_g * g_g
            h_ref[...] = o_g * jnp.tanh(c_new)
            c_ref[...] = c_new
            return carry2

        jax.lax.fori_loop(0, t_chunk, step, 0, unroll=unroll)
        return carry

    jax.lax.fori_loop(0, n_chunks, chunk_body, 0, unroll=False)

    # ---- Phase 3: final FC as VPU multiply + cross-lane (XLU) reduce.
    y = jnp.sum(h_ref[...] * wfc_ref[...], axis=-1, keepdims=True) + bfc_ref[...]
    out_ref[...] = y.astype(out_ref.dtype)


def _pad_gate_blocks(w, H, Hp):
    """w: (4H, ...) stacked in PyTorch gate order (i,f,g,o). Zero-pad each gate
    block from H to Hp rows along axis 0 -> (4Hp, ...)."""
    parts = jnp.split(w, 4, axis=0)
    pad = [(0, Hp - H)] + [(0, 0)] * (w.ndim - 1)
    return jnp.concatenate([jnp.pad(p, pad) for p in parts], axis=0)


def prepare_params(params, mm_dtype=jnp.bfloat16):
    """One-time weight re-layout (hoisted out of the per-call forward).

    Pads gate blocks H->Hp (lane alignment), builds right-multiply transposes,
    folds the two biases, pads fc weight, and casts the MXU operands to bf16.
    """
    w_ih, w_hh = params["w_ih"], params["w_hh"]
    H = w_hh.shape[1]
    Hp = _round_up(H, 128)

    wih_t = _pad_gate_blocks(w_ih, H, Hp).T.astype(mm_dtype)               # (I, 4Hp)
    whh_p = _pad_gate_blocks(w_hh, H, Hp)                                  # (4Hp, H)
    whh_t = jnp.pad(whh_p, ((0, 0), (0, Hp - H))).T.astype(mm_dtype)       # (Hp, 4Hp)
    bias = _pad_gate_blocks((params["b_ih"] + params["b_hh"])[:, None],
                            H, Hp).reshape(1, 4 * Hp).astype(jnp.float32)  # (1, 4Hp)
    wfc = jnp.pad(params["fc_w"], ((0, 0), (0, Hp - H))).astype(jnp.float32)  # (1, Hp)
    bfc = params["fc_b"].reshape(1, 1).astype(jnp.float32)                 # (1, 1)

    return {"wih_t": wih_t, "whh_t": whh_t, "bias": bias, "wfc": wfc,
            "bfc": bfc, "H": int(H), "Hp": int(Hp), "mm_dtype": mm_dtype}


def lstm_model_forward(x, prep, *, batch_shards=1, t_chunk=None):
    """x: (B, T, I) float32, batch_first like the PyTorch module. Returns (B, 1).

    batch_shards: set to 2 on v7x to run one batch half per TensorCore
    ("parallel" grid axis); keep 1 on single-TC chips (v5e/v6e).
    """
    B, T, I = x.shape
    Hp = prep["Hp"]
    Bp = _round_up(max(B, 8 * batch_shards), 8 * batch_shards)
    Bs = Bp // batch_shards
    if t_chunk is None:
        t_chunk = _pick_time_chunk(T)
    unroll = min(t_chunk, 8)   # capped unroll: LLO visibility w/o vreg-pressure cliff

    # Per-call layout plumbing (only x): time-major, batch-pad, shard-major
    # flatten, bf16 cast for the MXU.
    x_tm = jnp.transpose(x, (1, 0, 2))                        # (T, B, I)
    x_tm = jnp.pad(x_tm, ((0, 0), (0, Bp - B), (0, 0)))       # (T, Bp, I)
    x_sh = x_tm.reshape(T, batch_shards, Bs, I)
    x_sh = jnp.transpose(x_sh, (1, 0, 2, 3))                  # (S, T, Bs, I)
    x2d = x_sh.reshape(batch_shards * T * Bs, I).astype(prep["mm_dtype"])

    kernel = functools.partial(lstm_kernel, t_chunk=t_chunk, unroll=unroll)
    vmem_limit = _vmem_limit_bytes(T, Bs, I, Hp, t_chunk)

    def build(single_buffer_weights):
        # Loop-invariant operands don't need a second pipeline buffer.
        wmode = ({"pipeline_mode": pl.Buffered(1)}
                 if single_buffer_weights else {})
        return pl.pallas_call(
            kernel,
            out_shape=jax.ShapeDtypeStruct((Bp, 1), jnp.float32),
            grid_spec=pltpu.PrefetchScalarGridSpec(
                num_scalar_prefetch=0,
                grid=(batch_shards,),                          # 1 shard = whole recurrence
                in_specs=[
                    pl.BlockSpec((T * Bs, I), lambda s: (s, 0)),          # x (shard-major)
                    pl.BlockSpec((I, 4 * Hp), lambda s: (0, 0), **wmode),  # W_ih^T
                    pl.BlockSpec((Hp, 4 * Hp), lambda s: (0, 0), **wmode), # W_hh^T
                    pl.BlockSpec((1, 4 * Hp), lambda s: (0, 0), **wmode),  # b_ih + b_hh
                    pl.BlockSpec((1, Hp), lambda s: (0, 0), **wmode),      # fc weight
                    pl.BlockSpec((1, 1), lambda s: (0, 0), **wmode),       # fc bias
                ],
                out_specs=pl.BlockSpec((Bs, 1), lambda s: (s, 0)),
                scratch_shapes=[
                    pltpu.VMEM((t_chunk * Bs, 4 * Hp), jnp.float32),   # xproj chunk
                    pltpu.VMEM((Bs, Hp), jnp.float32),                 # h state
                    pltpu.VMEM((Bs, Hp), jnp.float32),                 # c state
                ],
            ),
            compiler_params=pltpu.CompilerParams(
                dimension_semantics=(("parallel",) if batch_shards > 1
                                     else ("arbitrary",)),
                vmem_limit_bytes=vmem_limit,
            ),
        )

    args = (x2d, prep["wih_t"], prep["whh_t"], prep["bias"],
            prep["wfc"], prep["bfc"])
    try:
        out = jax.block_until_ready(build(True)(*args))
    except Exception:
        # Fallback if this Pallas build rejects buffer_count=1 on pallas_call
        # BlockSpecs — only costs the (small) extra weight buffer.
        out = jax.block_until_ready(build(False)(*args))

    return out[:B]   # drop padded batch rows


def lstm_model_reference(x, params):
    """Pure-JAX f32 reference mirroring PyTorch nn.LSTM + nn.Linear."""
    w_ih, w_hh, b_ih, b_hh, fc_w, fc_b = (
        params["w_ih"], params["w_hh"], params["b_ih"], params["b_hh"],
        params["fc_w"], params["fc_b"])
    B, T, I = x.shape
    H = w_hh.shape[1]
    h0 = jnp.zeros((B, H), jnp.float32)
    c0 = jnp.zeros((B, H), jnp.float32)

    def step(carry, x_t):
        h, c = carry
        gates = x_t @ w_ih.T + b_ih + h @ w_hh.T + b_hh
        i, f, g, o = jnp.split(gates, 4, axis=1)
        i = jax.nn.sigmoid(i)
        f = jax.nn.sigmoid(f)
        g = jnp.tanh(g)
        o = jax.nn.sigmoid(o)
        c = f * c + i * g
        h = o * jnp.tanh(c)
        return (h, c), None

    (h, _), _ = jax.lax.scan(step, (h0, c0), jnp.transpose(x, (1, 0, 2)))
    return h @ fc_w.T + fc_b


def init_params(key, input_size, hidden_size):
    """Deterministic init matching PyTorch's uniform(-1/sqrt(H), 1/sqrt(H))."""
    H, I = hidden_size, input_size
    k = 1.0 / jnp.sqrt(jnp.float32(H))
    keys = jax.random.split(key, 6)
    u = lambda kk, shape, s: jax.random.uniform(kk, shape, jnp.float32, -s, s)
    return {
        "w_ih": u(keys[0], (4 * H, I), k),
        "w_hh": u(keys[1], (4 * H, H), k),
        "b_ih": u(keys[2], (4 * H,), k),
        "b_hh": u(keys[3], (4 * H,), k),
        "fc_w": u(keys[4], (1, H), 1.0 / jnp.sqrt(jnp.float32(H))),
        "fc_b": u(keys[5], (1,), 1.0 / jnp.sqrt(jnp.float32(H))),
    }


if __name__ == "__main__":
    B, T, I, H = 4, 8, 16, 32
    key = jax.random.PRNGKey(0)
    kx, kp = jax.random.split(key)
    x = jax.random.normal(kx, (B, T, I), jnp.float32)
    params = init_params(kp, I, H)

    prep = prepare_params(params)   # one-time weight re-layout (hoisted per review)

    y = jax.block_until_ready(lstm_model_forward(x, prep))
    y_ref = jax.block_until_ready(lstm_model_reference(x, params))

    assert y.shape == (B, 1), y.shape
    # MXU operands are bf16 (f32 accumulate, f32 gate math) -> loosened tolerance
    # vs. the pure-f32 reference.
    assert jnp.allclose(y, y_ref, atol=5e-2, rtol=5e-2), (y, y_ref)
    print("KERNEL_OK")
</pallas_src>

<mosaic_0001>
module attributes {stable_mosaic.version = 11 : i64} {
  func.func @lstm_kernel(%arg0: i32, %arg1: memref<64x16xbf16, #tpu.memory_space<vmem>>, %arg2: memref<16x512xbf16, #tpu.memory_space<vmem>>, %arg3: memref<128x512xbf16, #tpu.memory_space<vmem>>, %arg4: memref<1x512xf32, #tpu.memory_space<vmem>>, %arg5: memref<1x128xf32, #tpu.memory_space<vmem>>, %arg6: memref<1x1xf32, #tpu.memory_space<vmem>>, %arg7: memref<8x1xf32, #tpu.memory_space<vmem>>, %arg8: memref<64x512xf32, #tpu.memory_space<vmem>>, %arg9: memref<8x128xf32, #tpu.memory_space<vmem>>, %arg10: memref<8x128xf32, #tpu.memory_space<vmem>>) attributes {dimension_semantics = [#tpu.dimension_semantics<arbitrary>], iteration_bounds = array<i64: 1>, scalar_prefetch = 0 : i64, scratch_operands = 3 : i64, tpu.core_type = #tpu.core_type<tc>, window_params = [{transform_indices = @transform_0, window_bounds = array<i64: 64, 16>}, {pipeline_mode = #tpu.pipeline_mode<synchronous>, transform_indices = @transform_1, window_bounds = array<i64: 16, 512>}, {pipeline_mode = #tpu.pipeline_mode<synchronous>, transform_indices = @transform_2, window_bounds = array<i64: 128, 512>}, {pipeline_mode = #tpu.pipeline_mode<synchronous>, transform_indices = @transform_3, window_bounds = array<i64: 1, 512>}, {pipeline_mode = #tpu.pipeline_mode<synchronous>, transform_indices = @transform_4, window_bounds = array<i64: 1, 128>}, {pipeline_mode = #tpu.pipeline_mode<synchronous>, transform_indices = @transform_5, window_bounds = array<i64: 1, 1>}, {transform_indices = @transform_6, window_bounds = array<i64: 8, 1>}]} {
    %cst = arith.constant 0.000000e+00 : f32
    %0 = vector.broadcast %cst : f32 to vector<8x128xf32>
    %c0 = arith.constant 0 : index
    %c0_0 = arith.constant 0 : index
    %1 = vector.load %arg9[%c0, %c0_0] : memref<8x128xf32, #tpu.memory_space<vmem>>, vector<8x128xf32>
    tpu.vector_store %arg9[%c0, %c0_0], %0 {strides = array<i32>} : memref<8x128xf32, #tpu.memory_space<vmem>>, vector<8x128xf32>,
    %cst_1 = arith.constant 0.000000e+00 : f32
    %2 = vector.broadcast %cst_1 : f32 to vector<8x128xf32>
    %c0_2 = arith.constant 0 : index
    %c0_3 = arith.constant 0 : index
    %3 = vector.load %arg10[%c0_2, %c0_3] : memref<8x128xf32, #tpu.memory_space<vmem>>, vector<8x128xf32>
    tpu.vector_store %arg10[%c0_2, %c0_3], %2 {strides = array<i32>} : memref<8x128xf32, #tpu.memory_space<vmem>>, vector<8x128xf32>,
    %c0_i32 = arith.constant 0 : i32
    %c64_i32 = arith.constant 64 : i32
    %4 = arith.muli %c0_i32, %c64_i32 : i32
    %5 = tpu.assume_multiple %4, 64 : i32
    %6 = arith.index_cast %5 : i32 to index
    %c0_4 = arith.constant 0 : index
    %7 = vector.load %arg1[%6, %c0_4] : memref<64x16xbf16, #tpu.memory_space<vmem>>, vector<64x16xbf16>
    %c0_5 = arith.constant 0 : index
    %c0_6 = arith.constant 0 : index
    %8 = vector.load %arg2[%c0_5, %c0_6] : memref<16x512xbf16, #tpu.memory_space<vmem>>, vector<16x512xbf16>
    %cst_7 = arith.constant dense<0.000000e+00> : vector<64x512xf32>
    %9 = tpu.matmul %7, %8, %cst_7 {dimension_numbers = #tpu.dot_dimension_numbers<[1], [0], [0], [1], [0, 0, 1, 1], [], []>} : vector<64x16xbf16>, vector<16x512xbf16>, vector<64x512xf32> -> vector<64x512xf32>
    %c0_8 = arith.constant 0 : index
    %c0_9 = arith.constant 0 : index
    %10 = vector.load %arg4[%c0_8, %c0_9] : memref<1x512xf32, #tpu.memory_space<vmem>>, vector<1x512xf32>
    %11 = vector.broadcast %10 : vector<1x512xf32> to vector<64x512xf32>
    %12 = arith.addf %9, %11 : vector<64x512xf32>
    %c0_10 = arith.constant 0 : index
    %c0_11 = arith.constant 0 : index
    %13 = vector.load %arg8[%c0_10, %c0_11] : memref<64x512xf32, #tpu.memory_space<vmem>>, vector<64x512xf32>
    tpu.vector_store %arg8[%c0_10, %c0_11], %12 {strides = array<i32>} : memref<64x512xf32, #tpu.memory_space<vmem>>, vector<64x512xf32>,
    %c0_i32_12 = arith.constant 0 : i32
    %c8_i32 = arith.constant 8 : i32
    %14 = arith.muli %c0_i32_12, %c8_i32 : i32
    %15 = tpu.assume_multiple %14, 8 : i32
    %16 = arith.index_cast %15 : i32 to index
    %c0_13 = arith.constant 0 : index
    %17 = vector.load %arg8[%16, %c0_13] : memref<64x512xf32, #tpu.memory_space<vmem>>, vector<8x512xf32>
    %c0_14 = arith.constant 0 : index
    %c0_15 = arith.constant 0 : index
    %18 = vector.load %arg9[%c0_14, %c0_15] : memref<8x128xf32, #tpu.memory_space<vmem>>, vector<8x128xf32>
    %19 = arith.truncf %18 : vector<8x128xf32> to vector<8x128xbf16>
    %c0_16 = arith.constant 0 : index
    %c0_17 = arith.constant 0 : index
    %20 = vector.load %arg3[%c0_16, %c0_17] : memref<128x512xbf16, #tpu.memory_space<vmem>>, vector<128x512xbf16>
    %cst_18 = arith.constant dense<0.000000e+00> : vector<8x512xf32>
    %21 = tpu.matmul %19, %20, %cst_18 {dimension_numbers = #tpu.dot_dimension_numbers<[1], [0], [0], [1], [0, 0, 1, 1], [], []>} : vector<8x128xbf16>, vector<128x512xbf16>, vector<8x512xf32> -> vector<8x512xf32>
    %22 = arith.addf %17, %21 : vector<8x512xf32>
    %23 = vector.extract_strided_slice %22 {offsets = [0, 0], sizes = [8, 128], strides = [1, 1]} : vector<8x512xf32> to vector<8x128xf32>
    %24 = arith.negf %23 : vector<8x128xf32>
    %25 = math.exp %24 : vector<8x128xf32>
    %cst_19 = arith.constant 1.000000e+00 : f32
    %26 = vector.broadcast %cst_19 : f32 to vector<8x128xf32>
    %27 = arith.addf %26, %25 : vector<8x128xf32>
    %28 = arith.divf %26, %27 : vector<8x128xf32>
    %29 = vector.extract_strided_slice %22 {offsets = [0, 128], sizes = [8, 128], strides = [1, 1]} : vector<8x512xf32> to vector<8x128xf32>
    %30 = arith.negf %29 : vector<8x128xf32>
    %31 = math.exp %30 : vector<8x128xf32>
    %cst_20 = arith.constant 1.000000e+00 : f32
    %32 = vector.broadcast %cst_20 : f32 to vector<8x128xf32>
    %33 = arith.addf %32, %31 : vector<8x128xf32>
    %34 = arith.divf %32, %33 : vector<8x128xf32>
    %35 = vector.extract_strided_slice %22 {offsets = [0, 256], sizes = [8, 128], strides = [1, 1]} : vector<8x512xf32> to vector<8x128xf32>
    %36 = math.tanh %35 : vector<8x128xf32>
    %37 = vector.extract_strided_slice %22 {offsets = [0, 384], sizes = [8, 128], strides = [1, 1]} : vector<8x512xf32> to vector<8x128xf32>
    %38 = arith.negf %37 : vector<8x128xf32>
    %39 = math.exp %38 : vector<8x128xf32>
    %cst_21 = arith.constant 1.000000e+00 : f32
    %40 = vector.broadcast %cst_21 : f32 to vector<8x128xf32>
    %41 = arith.addf %40, %39 : vector<8x128xf32>
    %42 = arith.divf %40, %41 : vector<8x128xf32>
    %c0_22 = arith.constant 0 : index
    %c0_23 = arith.constant 0 : index
    %43 = vector.load %arg10[%c0_22, %c0_23] : memref<8x128xf32, #tpu.memory_space<vmem>>, vector<8x128xf32>
    %44 = arith.mulf %34, %43 : vector<8x128xf32>
    %45 = arith.mulf %28, %36 : vector<8x128xf32>
    %46 = arith.addf %44, %45 : vector<8x128xf32>
    %47 = math.tanh %46 : vector<8x128xf32>
    %48 = arith.mulf %42, %47 : vector<8x128xf32>
    %c0_24 = arith.constant 0 : index
    %c0_25 = arith.constant 0 : index
    %49 = vector.load %arg9[%c0_24, %c0_25] : memref<8x128xf32, #tpu.memory_space<vmem>>, vector<8x128xf32>
    tpu.vector_store %arg9[%c0_24, %c0_25], %48 {strides = array<i32>} : memref<8x128xf32, #tpu.memory_space<vmem>>, vector<8x128xf32>,
    %c0_26 = arith.constant 0 : index
    %c0_27 = arith.constant 0 : index
    %50 = vector.load %arg10[%c0_26, %c0_27] : memref<8x128xf32, #tpu.memory_space<vmem>>, vector<8x128xf32>
    tpu.vector_store %arg10[%c0_26, %c0_27], %46 {strides = array<i32>} : memref<8x128xf32, #tpu.memory_space<vmem>>, vector<8x128xf32>,
    %c1_i32 = arith.constant 1 : i32
    %c8_i32_28 = arith.constant 8 : i32
    %51 = arith.muli %c1_i32, %c8_i32_28 : i32
    %52 = tpu.assume_multiple %51, 8 : i32
    %53 = arith.index_cast %52 : i32 to index
    %c0_29 = arith.constant 0 : index
    %54 = vector.load %arg8[%53, %c0_29] : memref<64x512xf32, #tpu.memory_space<vmem>>, vector<8x512xf32>
    %c0_30 = arith.constant 0 : index
    %c0_31 = arith.constant 0 : index
    %55 = vector.load %arg9[%c0_30, %c0_31] : memref<8x128xf32, #tpu.memory_space<vmem>>, vector<8x128xf32>
    %56 = arith.truncf %55 : vector<8x128xf32> to vector<8x128xbf16>
    %c0_32 = arith.constant 0 : index
    %c0_33 = arith.constant 0 : index
    %57 = vector.load %arg3[%c0_32, %c0_33] : memref<128x512xbf16, #tpu.memory_space<vmem>>, vector<128x512xbf16>
    %cst_34 = arith.constant dense<0.000000e+00> : vector<8x512xf32>
    %58 = tpu.matmul %56, %57, %cst_34 {dimension_numbers = #tpu.dot_dimension_numbers<[1], [0], [0], [1], [0, 0, 1, 1], [], []>} : vector<8x128xbf16>, vector<128x512xbf16>, vector<8x512xf32> -> vector<8x512xf32>
    %59 = arith.addf %54, %58 : vector<8x512xf32>
    %60 = vector.extract_strided_slice %59 {offsets = [0, 0], sizes = [8, 128], strides = [1, 1]} : vector<8x512xf32> to vector<8x128xf32>
    %61 = arith.negf %60 : vector<8x128xf32>
    %62 = math.exp %61 : vector<8x128xf32>
    %cst_35 = arith.constant 1.000000e+00 : f32
    %63 = vector.broadcast %cst_35 : f32 to vector<8x128xf32>
    %64 = arith.addf %63, %62 : vector<8x128xf32>
    %65 = arith.divf %63, %64 : vector<8x128xf32>
    %66 = vector.extract_strided_slice %59 {offsets = [0, 128], sizes = [8, 128], strides = [1, 1]} : vector<8x512xf32> to vector<8x128xf32>
    %67 = arith.negf %66 : vector<8x128xf32>
    %68 = math.exp %67 : vector<8x128xf32>
    %cst_36 = arith.constant 1.000000e+00 : f32
    %69 = vector.broadcast %cst_36 : f32 to vector<8x128xf32>
    %70 = arith.addf %69, %68 : vector<8x128xf32>
    %71 = arith.divf %69, %70 : vector<8x128xf32>
    %72 = vector.extract_strided_slice %59 {offsets = [0, 256], sizes = [8, 128], strides = [1, 1]} : vector<8x512xf32> to vector<8x128xf32>
    %73 = math.tanh %72 : vector<8x128xf32>
    %74 = vector.extract_strided_slice %59 {offsets = [0, 384], sizes = [8, 128], strides = [1, 1]} : vector<8x512xf32> to vector<8x128xf32>
    %75 = arith.negf %74 : vector<8x128xf32>
    %76 = math.exp %75 : vector<8x128xf32>
    %cst_37 = arith.constant 1.000000e+00 : f32
    %77 = vector.broadcast %cst_37 : f32 to vector<8x128xf32>
    %78 = arith.addf %77, %76 : vector<8x128xf32>
    %79 = arith.divf %77, %78 : vector<8x128xf32>
    %c0_38 = arith.constant 0 : index
    %c0_39 = arith.constant 0 : index
    %80 = vector.load %arg10[%c0_38, %c0_39] : memref<8x128xf32, #tpu.memory_space<vmem>>, vector<8x128xf32>
    %81 = arith.mulf %71, %80 : vector<8x128xf32>
    %82 = arith.mulf %65, %73 : vector<8x128xf32>
    %83 = arith.addf %81, %82 : vector<8x128xf32>
    %84 = math.tanh %83 : vector<8x128xf32>
    %85 = arith.mulf %79, %84 : vector<8x128xf32>
    %c0_40 = arith.constant 0 : index
    %c0_41 = arith.constant 0 : index
    %86 = vector.load %arg9[%c0_40, %c0_41] : memref<8x128xf32, #tpu.memory_space<vmem>>, vector<8x128xf32>
    tpu.vector_store %arg9[%c0_40, %c0_41], %85 {strides = array<i32>} : memref<8x128xf32, #tpu.memory_space<vmem>>, vector<8x128xf32>,
    %c0_42 = arith.constant 0 : index
    %c0_43 = arith.constant 0 : index
    %87 = vector.load %arg10[%c0_42, %c0_43] : memref<8x128xf32, #tpu.memory_space<vmem>>, vector<8x128xf32>
    tpu.vector_store %arg10[%c0_42, %c0_43], %83 {strides = array<i32>} : memref<8x128xf32, #tpu.memory_space<vmem>>, vector<8x128xf32>,
    %c2_i32 = arith.constant 2 : i32
    %c8_i32_44 = arith.constant 8 : i32
    %88 = arith.muli %c2_i32, %c8_i32_44 : i32
    %89 = tpu.assume_multiple %88, 8 : i32
    %90 = arith.index_cast %89 : i32 to index
    %c0_45 = arith.constant 0 : index
    %91 = vector.load %arg8[%90, %c0_45] : memref<64x512xf32, #tpu.memory_space<vmem>>, vector<8x512xf32>
    %c0_46 = arith.constant 0 : index
    %c0_47 = arith.constant 0 : index
    %92 = vector.load %arg9[%c0_46, %c0_47] : memref<8x128xf32, #tpu.memory_space<vmem>>, vector<8x128xf32>
    %93 = arith.truncf %92 : vector<8x128xf32> to vector<8x128xbf16>
    %c0_48 = arith.constant 0 : index
    %c0_49 = arith.constant 0 : index
    %94 = vector.load %arg3[%c0_48, %c0_49] : memref<128x512xbf16, #tpu.memory_space<vmem>>, vector<128x512xbf16>
    %cst_50 = arith.constant dense<0.000000e+00> : vector<8x512xf32>
    %95 = tpu.matmul %93, %94, %cst_50 {dimension_numbers = #tpu.dot_dimension_numbers<[1], [0], [0], [1], [0, 0, 1, 1], [], []>} : vector<8x128xbf16>, vector<128x512xbf16>, vector<8x512xf32> -> vector<8x512xf32>
    %96 = arith.addf %91, %95 : vector<8x512xf32>
    %97 = vector.extract_strided_slice %96 {offsets = [0, 0], sizes = [8, 128], strides = [1, 1]} : vector<8x512xf32> to vector<8x128xf32>
    %98 = arith.negf %97 : vector<8x128xf32>
    %99 = math.exp %98 : vector<8x128xf32>
    %cst_51 = arith.constant 1.000000e+00 : f32
    %100 = vector.broadcast %cst_51 : f32 to vector<8x128xf32>
    %101 = arith.addf %100, %99 : vector<8x128xf32>
    %102 = arith.divf %100, %101 : vector<8x128xf32>
    %103 = vector.extract_strided_slice %96 {offsets = [0, 128], sizes = [8, 128], strides = [1, 1]} : vector<8x512xf32> to vector<8x128xf32>
    %104 = arith.negf %103 : vector<8x128xf32>
    %105 = math.exp %104 : vector<8x128xf32>
    %cst_52 = arith.constant 1.000000e+00 : f32
    %106 = vector.broadcast %cst_52 : f32 to vector<8x128xf32>
    %107 = arith.addf %106, %105 : vector<8x128xf32>
    %108 = arith.divf %106, %107 : vector<8x128xf32>
    %109 = vector.extract_strided_slice %96 {offsets = [0, 256], sizes = [8, 128], strides = [1, 1]} : vector<8x512xf32> to vector<8x128xf32>
    %110 = math.tanh %109 : vector<8x128xf32>
    %111 = vector.extract_strided_slice %96 {offsets = [0, 384], sizes = [8, 128], strides = [1, 1]} : vector<8x512xf32> to vector<8x128xf32>
    %112 = arith.negf %111 : vector<8x128xf32>
    %113 = math.exp %112 : vector<8x128xf32>
    %cst_53 = arith.constant 1.000000e+00 : f32
    %114 = vector.broadcast %cst_53 : f32 to vector<8x128xf32>
    %115 = arith.addf %114, %113 : vector<8x128xf32>
    %116 = arith.divf %114, %115 : vector<8x128xf32>
    %c0_54 = arith.constant 0 : index
    %c0_55 = arith.constant 0 : index
    %117 = vector.load %arg10[%c0_54, %c0_55] : memref<8x128xf32, #tpu.memory_space<vmem>>, vector<8x128xf32>
    %118 = arith.mulf %108, %117 : vector<8x128xf32>
    %119 = arith.mulf %102, %110 : vector<8x128xf32>
    %120 = arith.addf %118, %119 : vector<8x128xf32>
    %121 = math.tanh %120 : vector<8x128xf32>
    %122 = arith.mulf %116, %121 : vector<8x128xf32>
    %c0_56 = arith.constant 0 : index
    %c0_57 = arith.constant 0 : index
    %123 = vector.load %arg9[%c0_56, %c0_57] : memref<8x128xf32, #tpu.memory_space<vmem>>, vector<8x128xf32>
    tpu.vector_store %arg9[%c0_56, %c0_57], %122 {strides = array<i32>} : memref<8x128xf32, #tpu.memory_space<vmem>>, vector<8x128xf32>,
    %c0_58 = arith.constant 0 : index
    %c0_59 = arith.constant 0 : index
    %124 = vector.load %arg10[%c0_58, %c0_59] : memref<8x128xf32, #tpu.memory_space<vmem>>, vector<8x128xf32>
    tpu.vector_store %arg10[%c0_58, %c0_59], %120 {strides = array<i32>} : memref<8x128xf32, #tpu.memory_space<vmem>>, vector<8x128xf32>,
    %c3_i32 = arith.constant 3 : i32
    %c8_i32_60 = arith.constant 8 : i32
    %125 = arith.muli %c3_i32, %c8_i32_60 : i32
    %126 = tpu.assume_multiple %125, 8 : i32
    %127 = arith.index_cast %126 : i32 to index
    %c0_61 = arith.constant 0 : index
    %128 = vector.load %arg8[%127, %c0_61] : memref<64x512xf32, #tpu.memory_space<vmem>>, vector<8x512xf32>
    %c0_62 = arith.constant 0 : index
    %c0_63 = arith.constant 0 : index
    %129 = vector.load %arg9[%c0_62, %c0_63] : memref<8x128xf32, #tpu.memory_space<vmem>>, vector<8x128xf32>
    %130 = arith.truncf %129 : vector<8x128xf32> to vector<8x128xbf16>
    %c0_64 = arith.constant 0 : index
    %c0_65 = arith.constant 0 : index
    %131 = vector.load %arg3[%c0_64, %c0_65] : memref<128x512xbf16, #tpu.memory_space<vmem>>, vector<128x512xbf16>
    %cst_66 = arith.constant dense<0.000000e+00> : vector<8x512xf32>
    %132 = tpu.matmul %130, %131, %cst_66 {dimension_numbers = #tpu.dot_dimension_numbers<[1], [0], [0], [1], [0, 0, 1, 1], [], []>} : vector<8x128xbf16>, vector<128x512xbf16>, vector<8x512xf32> -> vector<8x512xf32>
    %133 = arith.addf %128, %132 : vector<8x512xf32>
    %134 = vector.extract_strided_slice %133 {offsets = [0, 0], sizes = [8, 128], strides = [1, 1]} : vector<8x512xf32> to vector<8x128xf32>
    %135 = arith.negf %134 : vector<8x128xf32>
    %136 = math.exp %135 : vector<8x128xf32>
    %cst_67 = arith.constant 1.000000e+00 : f32
    %137 = vector.broadcast %cst_67 : f32 to vector<8x128xf32>
    %138 = arith.addf %137, %136 : vector<8x128xf32>
    %139 = arith.divf %137, %138 : vector<8x128xf32>
    %140 = vector.extract_strided_slice %133 {offsets = [0, 128], sizes = [8, 128], strides = [1, 1]} : vector<8x512xf32> to vector<8x128xf32>
    %141 = arith.negf %140 : vector<8x128xf32>
    %142 = math.exp %141 : vector<8x128xf32>
    %cst_68 = arith.constant 1.000000e+00 : f32
    %143 = vector.broadcast %cst_68 : f32 to vector<8x128xf32>
    %144 = arith.addf %143, %142 : vector<8x128xf32>
    %145 = arith.divf %143, %144 : vector<8x128xf32>
    %146 = vector.extract_strided_slice %133 {offsets = [0, 256], sizes = [8, 128], strides = [1, 1]} : vector<8x512xf32> to vector<8x128xf32>
    %147 = math.tanh %146 : vector<8x128xf32>
    %148 = vector.extract_strided_slice %133 {offsets = [0, 384], sizes = [8, 128], strides = [1, 1]} : vector<8x512xf32> to vector<8x128xf32>
    %149 = arith.negf %148 : vector<8x128xf32>
    %150 = math.exp %149 : vector<8x128xf32>
    %cst_69 = arith.constant 1.000000e+00 : f32
    %151 = vector.broadcast %cst_69 : f32 to vector<8x128xf32>
    %152 = arith.addf %151, %150 : vector<8x128xf32>
    %153 = arith.divf %151, %152 : vector<8x128xf32>
    %c0_70 = arith.constant 0 : index
    %c0_71 = arith.constant 0 : index
    %154 = vector.load %arg10[%c0_70, %c0_71] : memref<8x128xf32, #tpu.memory_space<vmem>>, vector<8x128xf32>
    %155 = arith.mulf %145, %154 : vector<8x128xf32>
    %156 = arith.mulf %139, %147 : vector<8x128xf32>
    %157 = arith.addf %155, %156 : vector<8x128xf32>
    %158 = math.tanh %157 : vector<8x128xf32>
    %159 = arith.mulf %153, %158 : vector<8x128xf32>
    %c0_72 = arith.constant 0 : index
    %c0_73 = arith.constant 0 : index
    %160 = vector.load %arg9[%c0_72, %c0_73] : memref<8x128xf32, #tpu.memory_space<vmem>>, vector<8x128xf32>
    tpu.vector_store %arg9[%c0_72, %c0_73], %159 {strides = array<i32>} : memref<8x128xf32, #tpu.memory_space<vmem>>, vector<8x128xf32>,
    %c0_74 = arith.constant 0 : index
    %c0_75 = arith.constant 0 : index
    %161 = vector.load %arg10[%c0_74, %c0_75] : memref<8x128xf32, #tpu.memory_space<vmem>>, vector<8x128xf32>
    tpu.vector_store %arg10[%c0_74, %c0_75], %157 {strides = array<i32>} : memref<8x128xf32, #tpu.memory_space<vmem>>, vector<8x128xf32>,
    %c4_i32 = arith.constant 4 : i32
    %c8_i32_76 = arith.constant 8 : i32
    %162 = arith.muli %c4_i32, %c8_i32_76 : i32
    %163 = tpu.assume_multiple %162, 8 : i32
    %164 = arith.index_cast %163 : i32 to index
    %c0_77 = arith.constant 0 : index
    %165 = vector.load %arg8[%164, %c0_77] : memref<64x512xf32, #tpu.memory_space<vmem>>, vector<8x512xf32>
    %c0_78 = arith.constant 0 : index
    %c0_79 = arith.constant 0 : index
    %166 = vector.load %arg9[%c0_78, %c0_79] : memref<8x128xf32, #tpu.memory_space<vmem>>, vector<8x128xf32>
    %167 = arith.truncf %166 : vector<8x128xf32> to vector<8x128xbf16>
    %c0_80 = arith.constant 0 : index
    %c0_81 = arith.constant 0 : index
    %168 = vector.load %arg3[%c0_80, %c0_81] : memref<128x512xbf16, #tpu.memory_space<vmem>>, vector<128x512xbf16>
    %cst_82 = arith.constant dense<0.000000e+00> : vector<8x512xf32>
    %169 = tpu.matmul %167, %168, %cst_82 {dimension_numbers = #tpu.dot_dimension_numbers<[1], [0], [0], [1], [0, 0, 1, 1], [], []>} : vector<8x128xbf16>, vector<128x512xbf16>, vector<8x512xf32> -> vector<8x512xf32>
    %170 = arith.addf %165, %169 : vector<8x512xf32>
    %171 = vector.extract_strided_slice %170 {offsets = [0, 0], sizes = [8, 128], strides = [1, 1]} : vector<8x512xf32> to vector<8x128xf32>
    %172 = arith.negf %171 : vector<8x128xf32>
    %173 = math.exp %172 : vector<8x128xf32>
    %cst_83 = arith.constant 1.000000e+00 : f32
    %174 = vector.broadcast %cst_83 : f32 to vector<8x128xf32>
    %175 = arith.addf %174, %173 : vector<8x128xf32>
    %176 = arith.divf %174, %175 : vector<8x128xf32>
    %177 = vector.extract_strided_slice %170 {offsets = [0, 128], sizes = [8, 128], strides = [1, 1]} : vector<8x512xf32> to vector<8x128xf32>
    %178 = arith.negf %177 : vector<8x128xf32>
    %179 = math.exp %178 : vector<8x128xf32>
    %cst_84 = arith.constant 1.000000e+00 : f32
    %180 = vector.broadcast %cst_84 : f32 to vector<8x128xf32>
    %181 = arith.addf %180, %179 : vector<8x128xf32>
    %182 = arith.divf %180, %181 : vector<8x128xf32>
    %183 = vector.extract_strided_slice %170 {offsets = [0, 256], sizes = [8, 128], strides = [1, 1]} : vector<8x512xf32> to vector<8x128xf32>
    %184 = math.tanh %183 : vector<8x128xf32>
    %185 = vector.extract_strided_slice %170 {offsets = [0, 384], sizes = [8, 128], strides = [1, 1]} : vector<8x512xf32> to vector<8x128xf32>
    %186 = arith.negf %185 : vector<8x128xf32>
    %187 = math.exp %186 : vector<8x128xf32>
    %cst_85 = arith.constant 1.000000e+00 : f32
    %188 = vector.broadcast %cst_85 : f32 to vector<8x128xf32>
    %189 = arith.addf %188, %187 : vector<8x128xf32>
    %190 = arith.divf %188, %189 : vector<8x128xf32>
    %c0_86 = arith.constant 0 : index
    %c0_87 = arith.constant 0 : index
    %191 = vector.load %arg10[%c0_86, %c0_87] : memref<8x128xf32, #tpu.memory_space<vmem>>, vector<8x128xf32>
    %192 = arith.mulf %182, %191 : vector<8x128xf32>
    %193 = arith.mulf %176, %184 : vector<8x128xf32>
    %194 = arith.addf %192, %193 : vector<8x128xf32>
    %195 = math.tanh %194 : vector<8x128xf32>
    %196 = arith.mulf %190, %195 : vector<8x128xf32>
    %c0_88 = arith.constant 0 : index
    %c0_89 = arith.constant 0 : index
    %197 = vector.load %arg9[%c0_88, %c0_89] : memref<8x128xf32, #tpu.memory_space<vmem>>, vector<8x128xf32>
    tpu.vector_store %arg9[%c0_88, %c0_89], %196 {strides = array<i32>} : memref<8x128xf32, #tpu.memory_space<vmem>>, vector<8x128xf32>,
    %c0_90 = arith.constant 0 : index
    %c0_91 = arith.constant 0 : index
    %198 = vector.load %arg10[%c0_90, %c0_91] : memref<8x128xf32, #tpu.memory_space<vmem>>, vector<8x128xf32>
    tpu.vector_store %arg10[%c0_90, %c0_91], %194 {strides = array<i32>} : memref<8x128xf32, #tpu.memory_space<vmem>>, vector<8x128xf32>,
    %c5_i32 = arith.constant 5 : i32
    %c8_i32_92 = arith.constant 8 : i32
    %199 = arith.muli %c5_i32, %c8_i32_92 : i32
    %200 = tpu.assume_multiple %199, 8 : i32
    %201 = arith.index_cast %200 : i32 to index
    %c0_93 = arith.constant 0 : index
    %202 = vector.load %arg8[%201, %c0_93] : memref<64x512xf32, #tpu.memory_space<vmem>>, vector<8x512xf32>
    %c0_94 = arith.constant 0 : index
    %c0_95 = arith.constant 0 : index
    %203 = vector.load %arg9[%c0_94, %c0_95] : memref<8x128xf32, #tpu.memory_space<vmem>>, vector<8x128xf32>
    %204 = arith.truncf %203 : vector<8x128xf32> to vector<8x128xbf16>
    %c0_96 = arith.constant 0 : index
    %c0_97 = arith.constant 0 : index
    %205 = vector.load %arg3[%c0_96, %c0_97] : memref<128x512xbf16, #tpu.memory_space<vmem>>, vector<128x512xbf16>
    %cst_98 = arith.constant dense<0.000000e+00> : vector<8x512xf32>
    %206 = tpu.matmul %204, %205, %cst_98 {dimension_numbers = #tpu.dot_dimension_numbers<[1], [0], [0], [1], [0, 0, 1, 1], [], []>} : vector<8x128xbf16>, vector<128x512xbf16>, vector<8x512xf32> -> vector<8x512xf32>
    %207 = arith.addf %202, %206 : vector<8x512xf32>
    %208 = vector.extract_strided_slice %207 {offsets = [0, 0], sizes = [8, 128], strides = [1, 1]} : vector<8x512xf32> to vector<8x128xf32>
    %209 = arith.negf %208 : vector<8x128xf32>
    %210 = math.exp %209 : vector<8x128xf32>
    %cst_99 = arith.constant 1.000000e+00 : f32
    %211 = vector.broadcast %cst_99 : f32 to vector<8x128xf32>
    %212 = arith.addf %211, %210 : vector<8x128xf32>
    %213 = arith.divf %211, %212 : vector<8x128xf32>
    %214 = vector.extract_strided_slice %207 {offsets = [0, 128], sizes = [8, 128], strides = [1, 1]} : vector<8x512xf32> to vector<8x128xf32>
    %215 = arith.negf %214 : vector<8x128xf32>
    %216 = math.exp %215 : vector<8x128xf32>
    %cst_100 = arith.constant 1.000000e+00 : f32
    %217 = vector.broadcast %cst_100 : f32 to vector<8x128xf32>
    %218 = arith.addf %217, %216 : vector<8x128xf32>
    %219 = arith.divf %217, %218 : vector<8x128xf32>
    %220 = vector.extract_strided_slice %207 {offsets = [0, 256], sizes = [8, 128], strides = [1, 1]} : vector<8x512xf32> to vector<8x128xf32>
    %221 = math.tanh %220 : vector<8x128xf32>
    %222 = vector.extract_strided_slice %207 {offsets = [0, 384], sizes = [8, 128], strides = [1, 1]} : vector<8x512xf32> to vector<8x128xf32>
    %223 = arith.negf %222 : vector<8x128xf32>
    %224 = math.exp %223 : vector<8x128xf32>
    %cst_101 = arith.constant 1.000000e+00 : f32
    %225 = vector.broadcast %cst_101 : f32 to vector<8x128xf32>
    %226 = arith.addf %225, %224 : vector<8x128xf32>
    %227 = arith.divf %225, %226 : vector<8x128xf32>
    %c0_102 = arith.constant 0 : index
    %c0_103 = arith.constant 0 : index
    %228 = vector.load %arg10[%c0_102, %c0_103] : memref<8x128xf32, #tpu.memory_space<vmem>>, vector<8x128xf32>
    %229 = arith.mulf %219, %228 : vector<8x128xf32>
    %230 = arith.mulf %213, %221 : vector<8x128xf32>
    %231 = arith.addf %229, %230 : vector<8x128xf32>
    %232 = math.tanh %231 : vector<8x128xf32>
    %233 = arith.mulf %227, %232 : vector<8x128xf32>
    %c0_104 = arith.constant 0 : index
    %c0_105 = arith.constant 0 : index
    %234 = vector.load %arg9[%c0_104, %c0_105] : memref<8x128xf32, #tpu.memory_space<vmem>>, vector<8x128xf32>
    tpu.vector_store %arg9[%c0_104, %c0_105], %233 {strides = array<i32>} : memref<8x128xf32, #tpu.memory_space<vmem>>, vector<8x128xf32>,
    %c0_106 = arith.constant 0 : index
    %c0_107 = arith.constant 0 : index
    %235 = vector.load %arg10[%c0_106, %c0_107] : memref<8x128xf32, #tpu.memory_space<vmem>>, vector<8x128xf32>
    tpu.vector_store %arg10[%c0_106, %c0_107], %231 {strides = array<i32>} : memref<8x128xf32, #tpu.memory_space<vmem>>, vector<8x128xf32>,
    %c6_i32 = arith.constant 6 : i32
    %c8_i32_108 = arith.constant 8 : i32
    %236 = arith.muli %c6_i32, %c8_i32_108 : i32
    %237 = tpu.assume_multiple %236, 8 : i32
    %238 = arith.index_cast %237 : i32 to index
    %c0_109 = arith.constant 0 : index
    %239 = vector.load %arg8[%238, %c0_109] : memref<64x512xf32, #tpu.memory_space<vmem>>, vector<8x512xf32>
    %c0_110 = arith.constant 0 : index
    %c0_111 = arith.constant 0 : index
    %240 = vector.load %arg9[%c0_110, %c0_111] : memref<8x128xf32, #tpu.memory_space<vmem>>, vector<8x128xf32>
    %241 = arith.truncf %240 : vector<8x128xf32> to vector<8x128xbf16>
    %c0_112 = arith.constant 0 : index
    %c0_113 = arith.constant 0 : index
    %242 = vector.load %arg3[%c0_112, %c0_113] : memref<128x512xbf16, #tpu.memory_space<vmem>>, vector<128x512xbf16>
    %cst_114 = arith.constant dense<0.000000e+00> : vector<8x512xf32>
    %243 = tpu.matmul %241, %242, %cst_114 {dimension_numbers = #tpu.dot_dimension_numbers<[1], [0], [0], [1], [0, 0, 1, 1], [], []>} : vector<8x128xbf16>, vector<128x512xbf16>, vector<8x512xf32> -> vector<8x512xf32>
    %244 = arith.addf %239, %243 : vector<8x512xf32>
    %245 = vector.extract_strided_slice %244 {offsets = [0, 0], sizes = [8, 128], strides = [1, 1]} : vector<8x512xf32> to vector<8x128xf32>
    %246 = arith.negf %245 : vector<8x128xf32>
    %247 = math.exp %246 : vector<8x128xf32>
    %cst_115 = arith.constant 1.000000e+00 : f32
    %248 = vector.broadcast %cst_115 : f32 to vector<8x128xf32>
    %249 = arith.addf %248, %247 : vector<8x128xf32>
    %250 = arith.divf %248, %249 : vector<8x128xf32>
    %251 = vector.extract_strided_slice %244 {offsets = [0, 128], sizes = [8, 128], strides = [1, 1]} : vector<8x512xf32> to vector<8x128xf32>
    %252 = arith.negf %251 : vector<8x128xf32>
    %253 = math.exp %252 : vector<8x128xf32>
    %cst_116 = arith.constant 1.000000e+00 : f32
    %254 = vector.broadcast %cst_116 : f32 to vector<8x128xf32>
    %255 = arith.addf %254, %253 : vector<8x128xf32>
    %256 = arith.divf %254, %255 : vector<8x128xf32>
    %257 = vector.extract_strided_slice %244 {offsets = [0, 256], sizes = [8, 128], strides = [1, 1]} : vector<8x512xf32> to vector<8x128xf32>
    %258 = math.tanh %257 : vector<8x128xf32>
    %259 = vector.extract_strided_slice %244 {offsets = [0, 384], sizes = [8, 128], strides = [1, 1]} : vector<8x512xf32> to vector<8x128xf32>
    %260 = arith.negf %259 : vector<8x128xf32>
    %261 = math.exp %260 : vector<8x128xf32>
    %cst_117 = arith.constant 1.000000e+00 : f32
    %262 = vector.broadcast %cst_117 : f32 to vector<8x128xf32>
    %263 = arith.addf %262, %261 : vector<8x128xf32>
    %264 = arith.divf %262, %263 : vector<8x128xf32>
    %c0_118 = arith.constant 0 : index
    %c0_119 = arith.constant 0 : index
    %265 = vector.load %arg10[%c0_118, %c0_119] : memref<8x128xf32, #tpu.memory_space<vmem>>, vector<8x128xf32>
    %266 = arith.mulf %256, %265 : vector<8x128xf32>
    %267 = arith.mulf %250, %258 : vector<8x128xf32>
    %268 = arith.addf %266, %267 : vector<8x128xf32>
    %269 = math.tanh %268 : vector<8x128xf32>
    %270 = arith.mulf %264, %269 : vector<8x128xf32>
    %c0_120 = arith.constant 0 : index
    %c0_121 = arith.constant 0 : index
    %271 = vector.load %arg9[%c0_120, %c0_121] : memref<8x128xf32, #tpu.memory_space<vmem>>, vector<8x128xf32>
    tpu.vector_store %arg9[%c0_120, %c0_121], %270 {strides = array<i32>} : memref<8x128xf32, #tpu.memory_space<vmem>>, vector<8x128xf32>,
    %c0_122 = arith.constant 0 : index
    %c0_123 = arith.constant 0 : index
    %272 = vector.load %arg10[%c0_122, %c0_123] : memref<8x128xf32, #tpu.memory_space<vmem>>, vector<8x128xf32>
    tpu.vector_store %arg10[%c0_122, %c0_123], %268 {strides = array<i32>} : memref<8x128xf32, #tpu.memory_space<vmem>>, vector<8x128xf32>,
    %c7_i32 = arith.constant 7 : i32
    %c8_i32_124 = arith.constant 8 : i32
    %273 = arith.muli %c7_i32, %c8_i32_124 : i32
    %274 = tpu.assume_multiple %273, 8 : i32
    %275 = arith.index_cast %274 : i32 to index
    %c0_125 = arith.constant 0 : index
    %276 = vector.load %arg8[%275, %c0_125] : memref<64x512xf32, #tpu.memory_space<vmem>>, vector<8x512xf32>
    %c0_126 = arith.constant 0 : index
    %c0_127 = arith.constant 0 : index
    %277 = vector.load %arg9[%c0_126, %c0_127] : memref<8x128xf32, #tpu.memory_space<vmem>>, vector<8x128xf32>
    %278 = arith.truncf %277 : vector<8x128xf32> to vector<8x128xbf16>
    %c0_128 = arith.constant 0 : index
    %c0_129 = arith.constant 0 : index
    %279 = vector.load %arg3[%c0_128, %c0_129] : memref<128x512xbf16, #tpu.memory_space<vmem>>, vector<128x512xbf16>
    %cst_130 = arith.constant dense<0.000000e+00> : vector<8x512xf32>
    %280 = tpu.matmul %278, %279, %cst_130 {dimension_numbers = #tpu.dot_dimension_numbers<[1], [0], [0], [1], [0, 0, 1, 1], [], []>} : vector<8x128xbf16>, vector<128x512xbf16>, vector<8x512xf32> -> vector<8x512xf32>
    %281 = arith.addf %276, %280 : vector<8x512xf32>
    %282 = vector.extract_strided_slice %281 {offsets = [0, 0], sizes = [8, 128], strides = [1, 1]} : vector<8x512xf32> to vector<8x128xf32>
    %283 = arith.negf %282 : vector<8x128xf32>
    %284 = math.exp %283 : vector<8x128xf32>
    %cst_131 = arith.constant 1.000000e+00 : f32
    %285 = vector.broadcast %cst_131 : f32 to vector<8x128xf32>
    %286 = arith.addf %285, %284 : vector<8x128xf32>
    %287 = arith.divf %285, %286 : vector<8x128xf32>
    %288 = vector.extract_strided_slice %281 {offsets = [0, 128], sizes = [8, 128], strides = [1, 1]} : vector<8x512xf32> to vector<8x128xf32>
    %289 = arith.negf %288 : vector<8x128xf32>
    %290 = math.exp %289 : vector<8x128xf32>
    %cst_132 = arith.constant 1.000000e+00 : f32
    %291 = vector.broadcast %cst_132 : f32 to vector<8x128xf32>
    %292 = arith.addf %291, %290 : vector<8x128xf32>
    %293 = arith.divf %291, %292 : vector<8x128xf32>
    %294 = vector.extract_strided_slice %281 {offsets = [0, 256], sizes = [8, 128], strides = [1, 1]} : vector<8x512xf32> to vector<8x128xf32>
    %295 = math.tanh %294 : vector<8x128xf32>
    %296 = vector.extract_strided_slice %281 {offsets = [0, 384], sizes = [8, 128], strides = [1, 1]} : vector<8x512xf32> to vector<8x128xf32>
    %297 = arith.negf %296 : vector<8x128xf32>
    %298 = math.exp %297 : vector<8x128xf32>
    %cst_133 = arith.constant 1.000000e+00 : f32
    %299 = vector.broadcast %cst_133 : f32 to vector<8x128xf32>
    %300 = arith.addf %299, %298 : vector<8x128xf32>
    %301 = arith.divf %299, %300 : vector<8x128xf32>
    %c0_134 = arith.constant 0 : index
    %c0_135 = arith.constant 0 : index
    %302 = vector.load %arg10[%c0_134, %c0_135] : memref<8x128xf32, #tpu.memory_space<vmem>>, vector<8x128xf32>
    %303 = arith.mulf %293, %302 : vector<8x128xf32>
    %304 = arith.mulf %287, %295 : vector<8x128xf32>
    %305 = arith.addf %303, %304 : vector<8x128xf32>
    %306 = math.tanh %305 : vector<8x128xf32>
    %307 = arith.mulf %301, %306 : vector<8x128xf32>
    %c0_136 = arith.constant 0 : index
    %c0_137 = arith.constant 0 : index
    %308 = vector.load %arg9[%c0_136, %c0_137] : memref<8x128xf32, #tpu.memory_space<vmem>>, vector<8x128xf32>
    tpu.vector_store %arg9[%c0_136, %c0_137], %307 {strides = array<i32>} : memref<8x128xf32, #tpu.memory_space<vmem>>, vector<8x128xf32>,
    %c0_138 = arith.constant 0 : index
    %c0_139 = arith.constant 0 : index
    %309 = vector.load %arg10[%c0_138, %c0_139] : memref<8x128xf32, #tpu.memory_space<vmem>>, vector<8x128xf32>
    tpu.vector_store %arg10[%c0_138, %c0_139], %305 {strides = array<i32>} : memref<8x128xf32, #tpu.memory_space<vmem>>, vector<8x128xf32>,
    %c8_i32_140 = arith.constant 8 : i32
    %c1_i32_141 = arith.constant 1 : i32
    %c0_142 = arith.constant 0 : index
    %c0_143 = arith.constant 0 : index
    %310 = vector.load %arg9[%c0_142, %c0_143] : memref<8x128xf32, #tpu.memory_space<vmem>>, vector<8x128xf32>
    %c0_144 = arith.constant 0 : index
    %c0_145 = arith.constant 0 : index
    %311 = vector.load %arg5[%c0_144, %c0_145] : memref<1x128xf32, #tpu.memory_space<vmem>>, vector<1x128xf32>
    %312 = vector.broadcast %311 : vector<1x128xf32> to vector<8x128xf32>
    %313 = arith.mulf %310, %312 : vector<8x128xf32>
    %cst_146 = arith.constant dense<0.000000e+00> : vector<8xf32>
    %314 = vector.multi_reduction <add>, %313, %cst_146 [1] : vector<8x128xf32> to vector<8xf32>
    %315 = vector.shape_cast %314 : vector<8xf32> to vector<8x1xf32>
    %c0_147 = arith.constant 0 : index
    %c0_148 = arith.constant 0 : index
    %316 = vector.load %arg6[%c0_147, %c0_148] : memref<1x1xf32, #tpu.memory_space<vmem>>, vector<1x1xf32>
    %317 = vector.broadcast %316 : vector<1x1xf32> to vector<8x1xf32>
    %318 = arith.addf %315, %317 : vector<8x1xf32>
    %c0_149 = arith.constant 0 : index
    %c0_150 = arith.constant 0 : index
    %319 = vector.load %arg7[%c0_149, %c0_150] : memref<8x1xf32, #tpu.memory_space<vmem>>, vector<8x1xf32>
    tpu.vector_store %arg7[%c0_149, %c0_150], %318 {strides = array<i32>} : memref<8x1xf32, #tpu.memory_space<vmem>>, vector<8x1xf32>,
    return
  }
  func.func @transform_0(%arg0: i32) -> (i32, i32) {
    %c0_i32 = arith.constant 0 : i32
    %c0_i32_0 = arith.constant 0 : i32
    return %arg0, %c0_i32 : i32, i32
  }
  func.func @transform_1(%arg0: i32) -> (i32, i32) {
    %c0_i32 = arith.constant 0 : i32
    %c0_i32_0 = arith.constant 0 : i32
    %c0_i32_1 = arith.constant 0 : i32
    return %c0_i32, %c0_i32_0 : i32, i32
  }
  func.func @transform_2(%arg0: i32) -> (i32, i32) {
    %c0_i32 = arith.constant 0 : i32
    %c0_i32_0 = arith.constant 0 : i32
    %c0_i32_1 = arith.constant 0 : i32
    return %c0_i32, %c0_i32_0 : i32, i32
  }
  func.func @transform_3(%arg0: i32) -> (i32, i32) {
    %c0_i32 = arith.constant 0 : i32
    %c0_i32_0 = arith.constant 0 : i32
    %c0_i32_1 = arith.constant 0 : i32
    return %c0_i32, %c0_i32_0 : i32, i32
  }
  func.func @transform_4(%arg0: i32) -> (i32, i32) {
    %c0_i32 = arith.constant 0 : i32
    %c0_i32_0 = arith.constant 0 : i32
    %c0_i32_1 = arith.constant 0 : i32
    return %c0_i32, %c0_i32_0 : i32, i32
  }
  func.func @transform_5(%arg0: i32) -> (i32, i32) {
    %c0_i32 = arith.constant 0 : i32
    %c0_i32_0 = arith.constant 0 : i32
    %c0_i32_1 = arith.constant 0 : i32
    return %c0_i32, %c0_i32_0 : i32, i32
  }
  func.func @transform_6(%arg0: i32) -> (i32, i32) {
    %c0_i32 = arith.constant 0 : i32
    %c0_i32_0 = arith.constant 0 : i32
    return %arg0, %c0_i32 : i32, i32
  }
}

module attributes {stable_mosaic.version = 11 : i64} {
  func.func @lstm_kernel(%arg0: i32, %arg1: memref<64x16xbf16, #tpu.memory_space<vmem>>, %arg2: memref<16x512xbf16, #tpu.memory_space<vmem>>, %arg3: memref<128x512xbf16, #tpu.memory_space<vmem>>, %arg4: memref<1x512xf32, #tpu.memory_space<vmem>>, %arg5: memref<1x128xf32, #tpu.memory_space<vmem>>, %arg6: memref<1x1xf32, #tpu.memory_space<vmem>>, %arg7: memref<8x1xf32, #tpu.memory_space<vmem>>, %arg8: memref<64x512xf32, #tpu.memory_space<vmem>>, %arg9: memref<8x128xf32, #tpu.memory_space<vmem>>, %arg10: memref<8x128xf32, #tpu.memory_space<vmem>>) attributes {dimension_semantics = [#tpu.dimension_semantics<arbitrary>], iteration_bounds = array<i64: 1>, scalar_prefetch = 0 : i64, scratch_operands = 3 : i64, tpu.core_type = #tpu.core_type<tc>, window_params = [{transform_indices = @transform_0, window_bounds = array<i64: 64, 16>}, {pipeline_mode = #tpu.pipeline_mode<synchronous>, transform_indices = @transform_1, window_bounds = array<i64: 16, 512>}, {pipeline_mode = #tpu.pipeline_mode<synchronous>, transform_indices = @transform_2, window_bounds = array<i64: 128, 512>}, {pipeline_mode = #tpu.pipeline_mode<synchronous>, transform_indices = @transform_3, window_bounds = array<i64: 1, 512>}, {pipeline_mode = #tpu.pipeline_mode<synchronous>, transform_indices = @transform_4, window_bounds = array<i64: 1, 128>}, {pipeline_mode = #tpu.pipeline_mode<synchronous>, transform_indices = @transform_5, window_bounds = array<i64: 1, 1>}, {transform_indices = @transform_6, window_bounds = array<i64: 8, 1>}]} {
    %cst = arith.constant 0.000000e+00 : f32
    %0 = vector.broadcast %cst : f32 to vector<8x128xf32>
    %c0 = arith.constant 0 : index
    %c0_0 = arith.constant 0 : index
    %1 = vector.load %arg9[%c0, %c0_0] : memref<8x128xf32, #tpu.memory_space<vmem>>, vector<8x128xf32>
    tpu.vector_store %arg9[%c0, %c0_0], %0 {strides = array<i32>} : memref<8x128xf32, #tpu.memory_space<vmem>>, vector<8x128xf32>,
    %cst_1 = arith.constant 0.000000e+00 : f32
    %2 = vector.broadcast %cst_1 : f32 to vector<8x128xf32>
    %c0_2 = arith.constant 0 : index
    %c0_3 = arith.constant 0 : index
    %3 = vector.load %arg10[%c0_2, %c0_3] : memref<8x128xf32, #tpu.memory_space<vmem>>, vector<8x128xf32>
    tpu.vector_store %arg10[%c0_2, %c0_3], %2 {strides = array<i32>} : memref<8x128xf32, #tpu.memory_space<vmem>>, vector<8x128xf32>,
    %c0_i32 = arith.constant 0 : i32
    %c64_i32 = arith.constant 64 : i32
    %4 = arith.muli %c0_i32, %c64_i32 : i32
    %5 = tpu.assume_multiple %4, 64 : i32
    %6 = arith.index_cast %5 : i32 to index
    %c0_4 = arith.constant 0 : index
    %7 = vector.load %arg1[%6, %c0_4] : memref<64x16xbf16, #tpu.memory_space<vmem>>, vector<64x16xbf16>
    %c0_5 = arith.constant 0 : index
    %c0_6 = arith.constant 0 : index
    %8 = vector.load %arg2[%c0_5, %c0_6] : memref<16x512xbf16, #tpu.memory_space<vmem>>, vector<16x512xbf16>
    %cst_7 = arith.constant dense<0.000000e+00> : vector<64x512xf32>
    %9 = tpu.matmul %7, %8, %cst_7 {dimension_numbers = #tpu.dot_dimension_numbers<[1], [0], [0], [1], [0, 0, 1, 1], [], []>} : vector<64x16xbf16>, vector<16x512xbf16>, vector<64x512xf32> -> vector<64x512xf32>
    %c0_8 = arith.constant 0 : index
    %c0_9 = arith.constant 0 : index
    %10 = vector.load %arg4[%c0_8, %c0_9] : memref<1x512xf32, #tpu.memory_space<vmem>>, vector<1x512xf32>
    %11 = vector.broadcast %10 : vector<1x512xf32> to vector<64x512xf32>
    %12 = arith.addf %9, %11 : vector<64x512xf32>
    %c0_10 = arith.constant 0 : index
    %c0_11 = arith.constant 0 : index
    %13 = vector.load %arg8[%c0_10, %c0_11] : memref<64x512xf32, #tpu.memory_space<vmem>>, vector<64x512xf32>
    tpu.vector_store %arg8[%c0_10, %c0_11], %12 {strides = array<i32>} : memref<64x512xf32, #tpu.memory_space<vmem>>, vector<64x512xf32>,
    %c0_i32_12 = arith.constant 0 : i32
    %c8_i32 = arith.constant 8 : i32
    %14 = arith.muli %c0_i32_12, %c8_i32 : i32
    %15 = tpu.assume_multiple %14, 8 : i32
    %16 = arith.index_cast %15 : i32 to index
    %c0_13 = arith.constant 0 : index
    %17 = vector.load %arg8[%16, %c0_13] : memref<64x512xf32, #tpu.memory_space<vmem>>, vector<8x512xf32>
    %c0_14 = arith.constant 0 : index
    %c0_15 = arith.constant 0 : index
    %18 = vector.load %arg9[%c0_14, %c0_15] : memref<8x128xf32, #tpu.memory_space<vmem>>, vector<8x128xf32>
    %19 = arith.truncf %18 : vector<8x128xf32> to vector<8x128xbf16>
    %c0_16 = arith.constant 0 : index
    %c0_17 = arith.constant 0 : index
    %20 = vector.load %arg3[%c0_16, %c0_17] : memref<128x512xbf16, #tpu.memory_space<vmem>>, vector<128x512xbf16>
    %cst_18 = arith.constant dense<0.000000e+00> : vector<8x512xf32>
    %21 = tpu.matmul %19, %20, %cst_18 {dimension_numbers = #tpu.dot_dimension_numbers<[1], [0], [0], [1], [0, 0, 1, 1], [], []>} : vector<8x128xbf16>, vector<128x512xbf16>, vector<8x512xf32> -> vector<8x512xf32>
    %22 = arith.addf %17, %21 : vector<8x512xf32>
    %23 = vector.extract_strided_slice %22 {offsets = [0, 0], sizes = [8, 128], strides = [1, 1]} : vector<8x512xf32> to vector<8x128xf32>
    %24 = arith.negf %23 : vector<8x128xf32>
    %25 = math.exp %24 : vector<8x128xf32>
    %cst_19 = arith.constant 1.000000e+00 : f32
    %26 = vector.broadcast %cst_19 : f32 to vector<8x128xf32>
    %27 = arith.addf %26, %25 : vector<8x128xf32>
    %28 = arith.divf %26, %27 : vector<8x128xf32>
    %29 = vector.extract_strided_slice %22 {offsets = [0, 128], sizes = [8, 128], strides = [1, 1]} : vector<8x512xf32> to vector<8x128xf32>
    %30 = arith.negf %29 : vector<8x128xf32>
    %31 = math.exp %30 : vector<8x128xf32>
    %cst_20 = arith.constant 1.000000e+00 : f32
    %32 = vector.broadcast %cst_20 : f32 to vector<8x128xf32>
    %33 = arith.addf %32, %31 : vector<8x128xf32>
    %34 = arith.divf %32, %33 : vector<8x128xf32>
    %35 = vector.extract_strided_slice %22 {offsets = [0, 256], sizes = [8, 128], strides = [1, 1]} : vector<8x512xf32> to vector<8x128xf32>
    %36 = math.tanh %35 : vector<8x128xf32>
    %37 = vector.extract_strided_slice %22 {offsets = [0, 384], sizes = [8, 128], strides = [1, 1]} : vector<8x512xf32> to vector<8x128xf32>
    %38 = arith.negf %37 : vector<8x128xf32>
    %39 = math.exp %38 : vector<8x128xf32>
    %cst_21 = arith.constant 1.000000e+00 : f32
    %40 = vector.broadcast %cst_21 : f32 to vector<8x128xf32>
    %41 = arith.addf %40, %39 : vector<8x128xf32>
    %42 = arith.divf %40, %41 : vector<8x128xf32>
    %c0_22 = arith.constant 0 : index
    %c0_23 = arith.constant 0 : index
    %43 = vector.load %arg10[%c0_22, %c0_23] : memref<8x128xf32, #tpu.memory_space<vmem>>, vector<8x128xf32>
    %44 = arith.mulf %34, %43 : vector<8x128xf32>
    %45 = arith.mulf %28, %36 : vector<8x128xf32>
    %46 = arith.addf %44, %45 : vector<8x128xf32>
    %47 = math.tanh %46 : vector<8x128xf32>
    %48 = arith.mulf %42, %47 : vector<8x128xf32>
    %c0_24 = arith.constant 0 : index
    %c0_25 = arith.constant 0 : index
    %49 = vector.load %arg9[%c0_24, %c0_25] : memref<8x128xf32, #tpu.memory_space<vmem>>, vector<8x128xf32>
    tpu.vector_store %arg9[%c0_24, %c0_25], %48 {strides = array<i32>} : memref<8x128xf32, #tpu.memory_space<vmem>>, vector<8x128xf32>,
    %c0_26 = arith.constant 0 : index
    %c0_27 = arith.constant 0 : index
    %50 = vector.load %arg10[%c0_26, %c0_27] : memref<8x128xf32, #tpu.memory_space<vmem>>, vector<8x128xf32>
    tpu.vector_store %arg10[%c0_26, %c0_27], %46 {strides = array<i32>} : memref<8x128xf32, #tpu.memory_space<vmem>>, vector<8x128xf32>,
    %c1_i32 = arith.constant 1 : i32
    %c8_i32_28 = arith.constant 8 : i32
    %51 = arith.muli %c1_i32, %c8_i32_28 : i32
    %52 = tpu.assume_multiple %51, 8 : i32
    %53 = arith.index_cast %52 : i32 to index
    %c0_29 = arith.constant 0 : index
    %54 = vector.load %arg8[%53, %c0_29] : memref<64x512xf32, #tpu.memory_space<vmem>>, vector<8x512xf32>
    %c0_30 = arith.constant 0 : index
    %c0_31 = arith.constant 0 : index
    %55 = vector.load %arg9[%c0_30, %c0_31] : memref<8x128xf32, #tpu.memory_space<vmem>>, vector<8x128xf32>
    %56 = arith.truncf %55 : vector<8x128xf32> to vector<8x128xbf16>
    %c0_32 = arith.constant 0 : index
    %c0_33 = arith.constant 0 : index
    %57 = vector.load %arg3[%c0_32, %c0_33] : memref<128x512xbf16, #tpu.memory_space<vmem>>, vector<128x512xbf16>
    %cst_34 = arith.constant dense<0.000000e+00> : vector<8x512xf32>
    %58 = tpu.matmul %56, %57, %cst_34 {dimension_numbers = #tpu.dot_dimension_numbers<[1], [0], [0], [1], [0, 0, 1, 1], [], []>} : vector<8x128xbf16>, vector<128x512xbf16>, vector<8x512xf32> -> vector<8x512xf32>
    %59 = arith.addf %54, %58 : vector<8x512xf32>
    %60 = vector.extract_strided_slice %59 {offsets = [0, 0], sizes = [8, 128], strides = [1, 1]} : vector<8x512xf32> to vector<8x128xf32>
    %61 = arith.negf %60 : vector<8x128xf32>
    %62 = math.exp %61 : vector<8x128xf32>
    %cst_35 = arith.constant 1.000000e+00 : f32
    %63 = vector.broadcast %cst_35 : f32 to vector<8x128xf32>
    %64 = arith.addf %63, %62 : vector<8x128xf32>
    %65 = arith.divf %63, %64 : vector<8x128xf32>
    %66 = vector.extract_strided_slice %59 {offsets = [0, 128], sizes = [8, 128], strides = [1, 1]} : vector<8x512xf32> to vector<8x128xf32>
    %67 = arith.negf %66 : vector<8x128xf32>
    %68 = math.exp %67 : vector<8x128xf32>
    %cst_36 = arith.constant 1.000000e+00 : f32
    %69 = vector.broadcast %cst_36 : f32 to vector<8x128xf32>
    %70 = arith.addf %69, %68 : vector<8x128xf32>
    %71 = arith.divf %69, %70 : vector<8x128xf32>
    %72 = vector.extract_strided_slice %59 {offsets = [0, 256], sizes = [8, 128], strides = [1, 1]} : vector<8x512xf32> to vector<8x128xf32>
    %73 = math.tanh %72 : vector<8x128xf32>
    %74 = vector.extract_strided_slice %59 {offsets = [0, 384], sizes = [8, 128], strides = [1, 1]} : vector<8x512xf32> to vector<8x128xf32>
    %75 = arith.negf %74 : vector<8x128xf32>
    %76 = math.exp %75 : vector<8x128xf32>
    %cst_37 = arith.constant 1.000000e+00 : f32
    %77 = vector.broadcast %cst_37 : f32 to vector<8x128xf32>
    %78 = arith.addf %77, %76 : vector<8x128xf32>
    %79 = arith.divf %77, %78 : vector<8x128xf32>
    %c0_38 = arith.constant 0 : index
    %c0_39 = arith.constant 0 : index
    %80 = vector.load %arg10[%c0_38, %c0_39] : memref<8x128xf32, #tpu.memory_space<vmem>>, vector<8x128xf32>
    %81 = arith.mulf %71, %80 : vector<8x128xf32>
    %82 = arith.mulf %65, %73 : vector<8x128xf32>
    %83 = arith.addf %81, %82 : vector<8x128xf32>
    %84 = math.tanh %83 : vector<8x128xf32>
    %85 = arith.mulf %79, %84 : vector<8x128xf32>
    %c0_40 = arith.constant 0 : index
    %c0_41 = arith.constant 0 : index
    %86 = vector.load %arg9[%c0_40, %c0_41] : memref<8x128xf32, #tpu.memory_space<vmem>>, vector<8x128xf32>
    tpu.vector_store %arg9[%c0_40, %c0_41], %85 {strides = array<i32>} : memref<8x128xf32, #tpu.memory_space<vmem>>, vector<8x128xf32>,
    %c0_42 = arith.constant 0 : index
    %c0_43 = arith.constant 0 : index
    %87 = vector.load %arg10[%c0_42, %c0_43] : memref<8x128xf32, #tpu.memory_space<vmem>>, vector<8x128xf32>
    tpu.vector_store %arg10[%c0_42, %c0_43], %83 {strides = array<i32>} : memref<8x128xf32, #tpu.memory_space<vmem>>, vector<8x128xf32>,
    %c2_i32 = arith.constant 2 : i32
    %c8_i32_44 = arith.constant 8 : i32
    %88 = arith.muli %c2_i32, %c8_i32_44 : i32
    %89 = tpu.assume_multiple %88, 8 : i32
    %90 = arith.index_cast %89 : i32 to index
    %c0_45 = arith.constant 0 : index
    %91 = vector.load %arg8[%90, %c0_45] : memref<64x512xf32, #tpu.memory_space<vmem>>, vector<8x512xf32>
    %c0_46 = arith.constant 0 : index
    %c0_47 = arith.constant 0 : index
    %92 = vector.load %arg9[%c0_46, %c0_47] : memref<8x128xf32, #tpu.memory_space<vmem>>, vector<8x128xf32>
    %93 = arith.truncf %92 : vector<8x128xf32> to vector<8x128xbf16>
    %c0_48 = arith.constant 0 : index
    %c0_49 = arith.constant 0 : index
    %94 = vector.load %arg3[%c0_48, %c0_49] : memref<128x512xbf16, #tpu.memory_space<vmem>>, vector<128x512xbf16>
    %cst_50 = arith.constant dense<0.000000e+00> : vector<8x512xf32>
    %95 = tpu.matmul %93, %94, %cst_50 {dimension_numbers = #tpu.dot_dimension_numbers<[1], [0], [0], [1], [0, 0, 1, 1], [], []>} : vector<8x128xbf16>, vector<128x512xbf16>, vector<8x512xf32> -> vector<8x512xf32>
    %96 = arith.addf %91, %95 : vector<8x512xf32>
    %97 = vector.extract_strided_slice %96 {offsets = [0, 0], sizes = [8, 128], strides = [1, 1]} : vector<8x512xf32> to vector<8x128xf32>
    %98 = arith.negf %97 : vector<8x128xf32>
    %99 = math.exp %98 : vector<8x128xf32>
    %cst_51 = arith.constant 1.000000e+00 : f32
    %100 = vector.broadcast %cst_51 : f32 to vector<8x128xf32>
    %101 = arith.addf %100, %99 : vector<8x128xf32>
    %102 = arith.divf %100, %101 : vector<8x128xf32>
    %103 = vector.extract_strided_slice %96 {offsets = [0, 128], sizes = [8, 128], strides = [1, 1]} : vector<8x512xf32> to vector<8x128xf32>
    %104 = arith.negf %103 : vector<8x128xf32>
    %105 = math.exp %104 : vector<8x128xf32>
    %cst_52 = arith.constant 1.000000e+00 : f32
    %106 = vector.broadcast %cst_52 : f32 to vector<8x128xf32>
    %107 = arith.addf %106, %105 : vector<8x128xf32>
    %108 = arith.divf %106, %107 : vector<8x128xf32>
    %109 = vector.extract_strided_slice %96 {offsets = [0, 256], sizes = [8, 128], strides = [1, 1]} : vector<8x512xf32> to vector<8x128xf32>
    %110 = math.tanh %109 : vector<8x128xf32>
    %111 = vector.extract_strided_slice %96 {offsets = [0, 384], sizes = [8, 128], strides = [1, 1]} : vector<8x512xf32> to vector<8x128xf32>
    %112 = arith.negf %111 : vector<8x128xf32>
    %113 = math.exp %112 : vector<8x128xf32>
    %cst_53 = arith.constant 1.000000e+00 : f32
    %114 = vector.broadcast %cst_53 : f32 to vector<8x128xf32>
    %115 = arith.addf %114, %113 : vector<8x128xf32>
    %116 = arith.divf %114, %115 : vector<8x128xf32>
    %c0_54 = arith.constant 0 : index
    %c0_55 = arith.constant 0 : index
    %117 = vector.load %arg10[%c0_54, %c0_55] : memref<8x128xf32, #tpu.memory_space<vmem>>, vector<8x128xf32>
    %118 = arith.mulf %108, %117 : vector<8x128xf32>
    %119 = arith.mulf %102, %110 : vector<8x128xf32>
    %120 = arith.addf %118, %119 : vector<8x128xf32>
    %121 = math.tanh %120 : vector<8x128xf32>
    %122 = arith.mulf %116, %121 : vector<8x128xf32>
    %c0_56 = arith.constant 0 : index
    %c0_57 = arith.constant 0 : index
    %123 = vector.load %arg9[%c0_56, %c0_57] : memref<8x128xf32, #tpu.memory_space<vmem>>, vector<8x128xf32>
    tpu.vector_store %arg9[%c0_56, %c0_57], %122 {strides = array<i32>} : memref<8x128xf32, #tpu.memory_space<vmem>>, vector<8x128xf32>,
    %c0_58 = arith.constant 0 : index
    %c0_59 = arith.constant 0 : index
    %124 = vector.load %arg10[%c0_58, %c0_59] : memref<8x128xf32, #tpu.memory_space<vmem>>, vector<8x128xf32>
    tpu.vector_store %arg10[%c0_58, %c0_59], %120 {strides = array<i32>} : memref<8x128xf32, #tpu.memory_space<vmem>>, vector<8x128xf32>,
    %c3_i32 = arith.constant 3 : i32
    %c8_i32_60 = arith.constant 8 : i32
    %125 = arith.muli %c3_i32, %c8_i32_60 : i32
    %126 = tpu.assume_multiple %125, 8 : i32
    %127 = arith.index_cast %126 : i32 to index
    %c0_61 = arith.constant 0 : index
    %128 = vector.load %arg8[%127, %c0_61] : memref<64x512xf32, #tpu.memory_space<vmem>>, vector<8x512xf32>
    %c0_62 = arith.constant 0 : index
    %c0_63 = arith.constant 0 : index
    %129 = vector.load %arg9[%c0_62, %c0_63] : memref<8x128xf32, #tpu.memory_space<vmem>>, vector<8x128xf32>
    %130 = arith.truncf %129 : vector<8x128xf32> to vector<8x128xbf16>
    %c0_64 = arith.constant 0 : index
    %c0_65 = arith.constant 0 : index
    %131 = vector.load %arg3[%c0_64, %c0_65] : memref<128x512xbf16, #tpu.memory_space<vmem>>, vector<128x512xbf16>
    %cst_66 = arith.constant dense<0.000000e+00> : vector<8x512xf32>
    %132 = tpu.matmul %130, %131, %cst_66 {dimension_numbers = #tpu.dot_dimension_numbers<[1], [0], [0], [1], [0, 0, 1, 1], [], []>} : vector<8x128xbf16>, vector<128x512xbf16>, vector<8x512xf32> -> vector<8x512xf32>
    %133 = arith.addf %128, %132 : vector<8x512xf32>
    %134 = vector.extract_strided_slice %133 {offsets = [0, 0], sizes = [8, 128], strides = [1, 1]} : vector<8x512xf32> to vector<8x128xf32>
    %135 = arith.negf %134 : vector<8x128xf32>
    %136 = math.exp %135 : vector<8x128xf32>
    %cst_67 = arith.constant 1.000000e+00 : f32
    %137 = vector.broadcast %cst_67 : f32 to vector<8x128xf32>
    %138 = arith.addf %137, %136 : vector<8x128xf32>
    %139 = arith.divf %137, %138 : vector<8x128xf32>
    %140 = vector.extract_strided_slice %133 {offsets = [0, 128], sizes = [8, 128], strides = [1, 1]} : vector<8x512xf32> to vector<8x128xf32>
    %141 = arith.negf %140 : vector<8x128xf32>
    %142 = math.exp %141 : vector<8x128xf32>
    %cst_68 = arith.constant 1.000000e+00 : f32
    %143 = vector.broadcast %cst_68 : f32 to vector<8x128xf32>
    %144 = arith.addf %143, %142 : vector<8x128xf32>
    %145 = arith.divf %143, %144 : vector<8x128xf32>
    %146 = vector.extract_strided_slice %133 {offsets = [0, 256], sizes = [8, 128], strides = [1, 1]} : vector<8x512xf32> to vector<8x128xf32>
    %147 = math.tanh %146 : vector<8x128xf32>
    %148 = vector.extract_strided_slice %133 {offsets = [0, 384], sizes = [8, 128], strides = [1, 1]} : vector<8x512xf32> to vector<8x128xf32>
    %149 = arith.negf %148 : vector<8x128xf32>
    %150 = math.exp %149 : vector<8x128xf32>
    %cst_69 = arith.constant 1.000000e+00 : f32
    %151 = vector.broadcast %cst_69 : f32 to vector<8x128xf32>
    %152 = arith.addf %151, %150 : vector<8x128xf32>
    %153 = arith.divf %151, %152 : vector<8x128xf32>
    %c0_70 = arith.constant 0 : index
    %c0_71 = arith.constant 0 : index
    %154 = vector.load %arg10[%c0_70, %c0_71] : memref<8x128xf32, #tpu.memory_space<vmem>>, vector<8x128xf32>
    %155 = arith.mulf %145, %154 : vector<8x128xf32>
    %156 = arith.mulf %139, %147 : vector<8x128xf32>
    %157 = arith.addf %155, %156 : vector<8x128xf32>
    %158 = math.tanh %157 : vector<8x128xf32>
    %159 = arith.mulf %153, %158 : vector<8x128xf32>
    %c0_72 = arith.constant 0 : index
    %c0_73 = arith.constant 0 : index
    %160 = vector.load %arg9[%c0_72, %c0_73] : memref<8x128xf32, #tpu.memory_space<vmem>>, vector<8x128xf32>
    tpu.vector_store %arg9[%c0_72, %c0_73], %159 {strides = array<i32>} : memref<8x128xf32, #tpu.memory_space<vmem>>, vector<8x128xf32>,
    %c0_74 = arith.constant 0 : index
    %c0_75 = arith.constant 0 : index
    %161 = vector.load %arg10[%c0_74, %c0_75] : memref<8x128xf32, #tpu.memory_space<vmem>>, vector<8x128xf32>
    tpu.vector_store %arg10[%c0_74, %c0_75], %157 {strides = array<i32>} : memref<8x128xf32, #tpu.memory_space<vmem>>, vector<8x128xf32>,
    %c4_i32 = arith.constant 4 : i32
    %c8_i32_76 = arith.constant 8 : i32
    %162 = arith.muli %c4_i32, %c8_i32_76 : i32
    %163 = tpu.assume_multiple %162, 8 : i32
    %164 = arith.index_cast %163 : i32 to index
    %c0_77 = arith.constant 0 : index
    %165 = vector.load %arg8[%164, %c0_77] : memref<64x512xf32, #tpu.memory_space<vmem>>, vector<8x512xf32>
    %c0_78 = arith.constant 0 : index
    %c0_79 = arith.constant 0 : index
    %166 = vector.load %arg9[%c0_78, %c0_79] : memref<8x128xf32, #tpu.memory_space<vmem>>, vector<8x128xf32>
    %167 = arith.truncf %166 : vector<8x128xf32> to vector<8x128xbf16>
    %c0_80 = arith.constant 0 : index
    %c0_81 = arith.constant 0 : index
    %168 = vector.load %arg3[%c0_80, %c0_81] : memref<128x512xbf16, #tpu.memory_space<vmem>>, vector<128x512xbf16>
    %cst_82 = arith.constant dense<0.000000e+00> : vector<8x512xf32>
    %169 = tpu.matmul %167, %168, %cst_82 {dimension_numbers = #tpu.dot_dimension_numbers<[1], [0], [0], [1], [0, 0, 1, 1], [], []>} : vector<8x128xbf16>, vector<128x512xbf16>, vector<8x512xf32> -> vector<8x512xf32>
    %170 = arith.addf %165, %169 : vector<8x512xf32>
    %171 = vector.extract_strided_slice %170 {offsets = [0, 0], sizes = [8, 128], strides = [1, 1]} : vector<8x512xf32> to vector<8x128xf32>
    %172 = arith.negf %171 : vector<8x128xf32>
    %173 = math.exp %172 : vector<8x128xf32>
    %cst_83 = arith.constant 1.000000e+00 : f32
    %174 = vector.broadcast %cst_83 : f32 to vector<8x128xf32>
    %175 = arith.addf %174, %173 : vector<8x128xf32>
    %176 = arith.divf %174, %175 : vector<8x128xf32>
    %177 = vector.extract_strided_slice %170 {offsets = [0, 128], sizes = [8, 128], strides = [1, 1]} : vector<8x512xf32> to vector<8x128xf32>
    %178 = arith.negf %177 : vector<8x128xf32>
    %179 = math.exp %178 : vector<8x128xf32>
    %cst_84 = arith.constant 1.000000e+00 : f32
    %180 = vector.broadcast %cst_84 : f32 to vector<8x128xf32>
    %181 = arith.addf %180, %179 : vector<8x128xf32>
    %182 = arith.divf %180, %181 : vector<8x128xf32>
    %183 = vector.extract_strided_slice %170 {offsets = [0, 256], sizes = [8, 128], strides = [1, 1]} : vector<8x512xf32> to vector<8x128xf32>
    %184 = math.tanh %183 : vector<8x128xf32>
    %185 = vector.extract_strided_slice %170 {offsets = [0, 384], sizes = [8, 128], strides = [1, 1]} : vector<8x512xf32> to vector<8x128xf32>
    %186 = arith.negf %185 : vector<8x128xf32>
    %187 = math.exp %186 : vector<8x128xf32>
    %cst_85 = arith.constant 1.000000e+00 : f32
    %188 = vector.broadcast %cst_85 : f32 to vector<8x128xf32>
    %189 = arith.addf %188, %187 : vector<8x128xf32>
    %190 = arith.divf %188, %189 : vector<8x128xf32>
    %c0_86 = arith.constant 0 : index
    %c0_87 = arith.constant 0 : index
    %191 = vector.load %arg10[%c0_86, %c0_87] : memref<8x128xf32, #tpu.memory_space<vmem>>, vector<8x128xf32>
    %192 = arith.mulf %182, %191 : vector<8x128xf32>
    %193 = arith.mulf %176, %184 : vector<8x128xf32>
    %194 = arith.addf %192, %193 : vector<8x128xf32>
    %195 = math.tanh %194 : vector<8x128xf32>
    %196 = arith.mulf %190, %195 : vector<8x128xf32>
    %c0_88 = arith.constant 0 : index
    %c0_89 = arith.constant 0 : index
    %197 = vector.load %arg9[%c0_88, %c0_89] : memref<8x128xf32, #tpu.memory_space<vmem>>, vector<8x128xf32>
    tpu.vector_store %arg9[%c0_88, %c0_89], %196 {strides = array<i32>} : memref<8x128xf32, #tpu.memory_space<vmem>>, vector<8x128xf32>,
    %c0_90 = arith.constant 0 : index
    %c0_91 = arith.constant 0 : index
    %198 = vector.load %arg10[%c0_90, %c0_91] : memref<8x128xf32, #tpu.memory_space<vmem>>, vector<8x128xf32>
    tpu.vector_store %arg10[%c0_90, %c0_91], %194 {strides = array<i32>} : memref<8x128xf32, #tpu.memory_space<vmem>>, vector<8x128xf32>,
    %c5_i32 = arith.constant 5 : i32
    %c8_i32_92 = arith.constant 8 : i32
    %199 = arith.muli %c5_i32, %c8_i32_92 : i32
    %200 = tpu.assume_multiple %199, 8 : i32
    %201 = arith.index_cast %200 : i32 to index
    %c0_93 = arith.constant 0 : index
    %202 = vector.load %arg8[%201, %c0_93] : memref<64x512xf32, #tpu.memory_space<vmem>>, vector<8x512xf32>
    %c0_94 = arith.constant 0 : index
    %c0_95 = arith.constant 0 : index
    %203 = vector.load %arg9[%c0_94, %c0_95] : memref<8x128xf32, #tpu.memory_space<vmem>>, vector<8x128xf32>
    %204 = arith.truncf %203 : vector<8x128xf32> to vector<8x128xbf16>
    %c0_96 = arith.constant 0 : index
    %c0_97 = arith.constant 0 : index
    %205 = vector.load %arg3[%c0_96, %c0_97] : memref<128x512xbf16, #tpu.memory_space<vmem>>, vector<128x512xbf16>
    %cst_98 = arith.constant dense<0.000000e+00> : vector<8x512xf32>
    %206 = tpu.matmul %204, %205, %cst_98 {dimension_numbers = #tpu.dot_dimension_numbers<[1], [0], [0], [1], [0, 0, 1, 1], [], []>} : vector<8x128xbf16>, vector<128x512xbf16>, vector<8x512xf32> -> vector<8x512xf32>
    %207 = arith.addf %202, %206 : vector<8x512xf32>
    %208 = vector.extract_strided_slice %207 {offsets = [0, 0], sizes = [8, 128], strides = [1, 1]} : vector<8x512xf32> to vector<8x128xf32>
    %209 = arith.negf %208 : vector<8x128xf32>
    %210 = math.exp %209 : vector<8x128xf32>
    %cst_99 = arith.constant 1.000000e+00 : f32
    %211 = vector.broadcast %cst_99 : f32 to vector<8x128xf32>
    %212 = arith.addf %211, %210 : vector<8x128xf32>
    %213 = arith.divf %211, %212 : vector<8x128xf32>
    %214 = vector.extract_strided_slice %207 {offsets = [0, 128], sizes = [8, 128], strides = [1, 1]} : vector<8x512xf32> to vector<8x128xf32>
    %215 = arith.negf %214 : vector<8x128xf32>
    %216 = math.exp %215 : vector<8x128xf32>
    %cst_100 = arith.constant 1.000000e+00 : f32
    %217 = vector.broadcast %cst_100 : f32 to vector<8x128xf32>
    %218 = arith.addf %217, %216 : vector<8x128xf32>
    %219 = arith.divf %217, %218 : vector<8x128xf32>
    %220 = vector.extract_strided_slice %207 {offsets = [0, 256], sizes = [8, 128], strides = [1, 1]} : vector<8x512xf32> to vector<8x128xf32>
    %221 = math.tanh %220 : vector<8x128xf32>
    %222 = vector.extract_strided_slice %207 {offsets = [0, 384], sizes = [8, 128], strides = [1, 1]} : vector<8x512xf32> to vector<8x128xf32>
    %223 = arith.negf %222 : vector<8x128xf32>
    %224 = math.exp %223 : vector<8x128xf32>
    %cst_101 = arith.constant 1.000000e+00 : f32
    %225 = vector.broadcast %cst_101 : f32 to vector<8x128xf32>
    %226 = arith.addf %225, %224 : vector<8x128xf32>
    %227 = arith.divf %225, %226 : vector<8x128xf32>
    %c0_102 = arith.constant 0 : index
    %c0_103 = arith.constant 0 : index
    %228 = vector.load %arg10[%c0_102, %c0_103] : memref<8x128xf32, #tpu.memory_space<vmem>>, vector<8x128xf32>
    %229 = arith.mulf %219, %228 : vector<8x128xf32>
    %230 = arith.mulf %213, %221 : vector<8x128xf32>
    %231 = arith.addf %229, %230 : vector<8x128xf32>
    %232 = math.tanh %231 : vector<8x128xf32>
    %233 = arith.mulf %227, %232 : vector<8x128xf32>
    %c0_104 = arith.constant 0 : index
    %c0_105 = arith.constant 0 : index
    %234 = vector.load %arg9[%c0_104, %c0_105] : memref<8x128xf32, #tpu.memory_space<vmem>>, vector<8x128xf32>
    tpu.vector_store %arg9[%c0_104, %c0_105], %233 {strides = array<i32>} : memref<8x128xf32, #tpu.memory_space<vmem>>, vector<8x128xf32>,
    %c0_106 = arith.constant 0 : index
    %c0_107 = arith.constant 0 : index
    %235 = vector.load %arg10[%c0_106, %c0_107] : memref<8x128xf32, #tpu.memory_space<vmem>>, vector<8x128xf32>
    tpu.vector_store %arg10[%c0_106, %c0_107], %231 {strides = array<i32>} : memref<8x128xf32, #tpu.memory_space<vmem>>, vector<8x128xf32>,
    %c6_i32 = arith.constant 6 : i32
    %c8_i32_108 = arith.constant 8 : i32
    %236 = arith.muli %c6_i32, %c8_i32_108 : i32
    %237 = tpu.assume_multiple %236, 8 : i32
    %238 = arith.index_cast %237 : i32 to index
    %c0_109 = arith.constant 0 : index
    %239 = vector.load %arg8[%238, %c0_109] : memref<64x512xf32, #tpu.memory_space<vmem>>, vector<8x512xf32>
    %c0_110 = arith.constant 0 : index
    %c0_111 = arith.constant 0 : index
    %240 = vector.load %arg9[%c0_110, %c0_111] : memref<8x128xf32, #tpu.memory_space<vmem>>, vector<8x128xf32>
    %241 = arith.truncf %240 : vector<8x128xf32> to vector<8x128xbf16>
    %c0_112 = arith.constant 0 : index
    %c0_113 = arith.constant 0 : index
    %242 = vector.load %arg3[%c0_112, %c0_113] : memref<128x512xbf16, #tpu.memory_space<vmem>>, vector<128x512xbf16>
    %cst_114 = arith.constant dense<0.000000e+00> : vector<8x512xf32>
    %243 = tpu.matmul %241, %242, %cst_114 {dimension_numbers = #tpu.dot_dimension_numbers<[1], [0], [0], [1], [0, 0, 1, 1], [], []>} : vector<8x128xbf16>, vector<128x512xbf16>, vector<8x512xf32> -> vector<8x512xf32>
    %244 = arith.addf %239, %243 : vector<8x512xf32>
    %245 = vector.extract_strided_slice %244 {offsets = [0, 0], sizes = [8, 128], strides = [1, 1]} : vector<8x512xf32> to vector<8x128xf32>
    %246 = arith.negf %245 : vector<8x128xf32>
    %247 = math.exp %246 : vector<8x128xf32>
    %cst_115 = arith.constant 1.000000e+00 : f32
    %248 = vector.broadcast %cst_115 : f32 to vector<8x128xf32>
    %249 = arith.addf %248, %247 : vector<8x128xf32>
    %250 = arith.divf %248, %249 : vector<8x128xf32>
    %251 = vector.extract_strided_slice %244 {offsets = [0, 128], sizes = [8, 128], strides = [1, 1]} : vector<8x512xf32> to vector<8x128xf32>
    %252 = arith.negf %251 : vector<8x128xf32>
    %253 = math.exp %252 : vector<8x128xf32>
    %cst_116 = arith.constant 1.000000e+00 : f32
    %254 = vector.broadcast %cst_116 : f32 to vector<8x128xf32>
    %255 = arith.addf %254, %253 : vector<8x128xf32>
    %256 = arith.divf %254, %255 : vector<8x128xf32>
    %257 = vector.extract_strided_slice %244 {offsets = [0, 256], sizes = [8, 128], strides = [1, 1]} : vector<8x512xf32> to vector<8x128xf32>
    %258 = math.tanh %257 : vector<8x128xf32>
    %259 = vector.extract_strided_slice %244 {offsets = [0, 384], sizes = [8, 128], strides = [1, 1]} : vector<8x512xf32> to vector<8x128xf32>
    %260 = arith.negf %259 : vector<8x128xf32>
    %261 = math.exp %260 : vector<8x128xf32>
    %cst_117 = arith.constant 1.000000e+00 : f32
    %262 = vector.broadcast %cst_117 : f32 to vector<8x128xf32>
    %263 = arith.addf %262, %261 : vector<8x128xf32>
    %264 = arith.divf %262, %263 : vector<8x128xf32>
    %c0_118 = arith.constant 0 : index
    %c0_119 = arith.constant 0 : index
    %265 = vector.load %arg10[%c0_118, %c0_119] : memref<8x128xf32, #tpu.memory_space<vmem>>, vector<8x128xf32>
    %266 = arith.mulf %256, %265 : vector<8x128xf32>
    %267 = arith.mulf %250, %258 : vector<8x128xf32>
    %268 = arith.addf %266, %267 : vector<8x128xf32>
    %269 = math.tanh %268 : vector<8x128xf32>
    %270 = arith.mulf %264, %269 : vector<8x128xf32>
    %c0_120 = arith.constant 0 : index
    %c0_121 = arith.constant 0 : index
    %271 = vector.load %arg9[%c0_120, %c0_121] : memref<8x128xf32, #tpu.memory_space<vmem>>, vector<8x128xf32>
    tpu.vector_store %arg9[%c0_120, %c0_121], %270 {strides = array<i32>} : memref<8x128xf32, #tpu.memory_space<vmem>>, vector<8x128xf32>,
    %c0_122 = arith.constant 0 : index
    %c0_123 = arith.constant 0 : index
    %272 = vector.load %arg10[%c0_122, %c0_123] : memref<8x128xf32, #tpu.memory_space<vmem>>, vector<8x128xf32>
    tpu.vector_store %arg10[%c0_122, %c0_123], %268 {strides = array<i32>} : memref<8x128xf32, #tpu.memory_space<vmem>>, vector<8x128xf32>,
    %c7_i32 = arith.constant 7 : i32
    %c8_i32_124 = arith.constant 8 : i32
    %273 = arith.muli %c7_i32, %c8_i32_124 : i32
    %274 = tpu.assume_multiple %273, 8 : i32
    %275 = arith.index_cast %274 : i32 to index
    %c0_125 = arith.constant 0 : index
    %276 = vector.load %arg8[%275, %c0_125] : memref<64x512xf32, #tpu.memory_space<vmem>>, vector<8x512xf32>
    %c0_126 = arith.constant 0 : index
    %c0_127 = arith.constant 0 : index
    %277 = vector.load %arg9[%c0_126, %c0_127] : memref<8x128xf32, #tpu.memory_space<vmem>>, vector<8x128xf32>
    %278 = arith.truncf %277 : vector<8x128xf32> to vector<8x128xbf16>
    %c0_128 = arith.constant 0 : index
    %c0_129 = arith.constant 0 : index
    %279 = vector.load %arg3[%c0_128, %c0_129] : memref<128x512xbf16, #tpu.memory_space<vmem>>, vector<128x512xbf16>
    %cst_130 = arith.constant dense<0.000000e+00> : vector<8x512xf32>
    %280 = tpu.matmul %278, %279, %cst_130 {dimension_numbers = #tpu.dot_dimension_numbers<[1], [0], [0], [1], [0, 0, 1, 1], [], []>} : vector<8x128xbf16>, vector<128x512xbf16>, vector<8x512xf32> -> vector<8x512xf32>
    %281 = arith.addf %276, %280 : vector<8x512xf32>
    %282 = vector.extract_strided_slice %281 {offsets = [0, 0], sizes = [8, 128], strides = [1, 1]} : vector<8x512xf32> to vector<8x128xf32>
    %283 = arith.negf %282 : vector<8x128xf32>
    %284 = math.exp %283 : vector<8x128xf32>
    %cst_131 = arith.constant 1.000000e+00 : f32
    %285 = vector.broadcast %cst_131 : f32 to vector<8x128xf32>
    %286 = arith.addf %285, %284 : vector<8x128xf32>
    %287 = arith.divf %285, %286 : vector<8x128xf32>
    %288 = vector.extract_strided_slice %281 {offsets = [0, 128], sizes = [8, 128], strides = [1, 1]} : vector<8x512xf32> to vector<8x128xf32>
    %289 = arith.negf %288 : vector<8x128xf32>
    %290 = math.exp %289 : vector<8x128xf32>
    %cst_132 = arith.constant 1.000000e+00 : f32
    %291 = vector.broadcast %cst_132 : f32 to vector<8x128xf32>
    %292 = arith.addf %291, %290 : vector<8x128xf32>
    %293 = arith.divf %291, %292 : vector<8x128xf32>
    %294 = vector.extract_strided_slice %281 {offsets = [0, 256], sizes = [8, 128], strides = [1, 1]} : vector<8x512xf32> to vector<8x128xf32>
    %295 = math.tanh %294 : vector<8x128xf32>
    %296 = vector.extract_strided_slice %281 {offsets = [0, 384], sizes = [8, 128], strides = [1, 1]} : vector<8x512xf32> to vector<8x128xf32>
    %297 = arith.negf %296 : vector<8x128xf32>
    %298 = math.exp %297 : vector<8x128xf32>
    %cst_133 = arith.constant 1.000000e+00 : f32
    %299 = vector.broadcast %cst_133 : f32 to vector<8x128xf32>
    %300 = arith.addf %299, %298 : vector<8x128xf32>
    %301 = arith.divf %299, %300 : vector<8x128xf32>
    %c0_134 = arith.constant 0 : index
    %c0_135 = arith.constant 0 : index
    %302 = vector.load %arg10[%c0_134, %c0_135] : memref<8x128xf32, #tpu.memory_space<vmem>>, vector<8x128xf32>
    %303 = arith.mulf %293, %302 : vector<8x128xf32>
    %304 = arith.mulf %287, %295 : vector<8x128xf32>
    %305 = arith.addf %303, %304 : vector<8x128xf32>
    %306 = math.tanh %305 : vector<8x128xf32>
    %307 = arith.mulf %301, %306 : vector<8x128xf32>
    %c0_136 = arith.constant 0 : index
    %c0_137 = arith.constant 0 : index
    %308 = vector.load %arg9[%c0_136, %c0_137] : memref<8x128xf32, #tpu.memory_space<vmem>>, vector<8x128xf32>
    tpu.vector_store %arg9[%c0_136, %c0_137], %307 {strides = array<i32>} : memref<8x128xf32, #tpu.memory_space<vmem>>, vector<8x128xf32>,
    %c0_138 = arith.constant 0 : index
    %c0_139 = arith.constant 0 : index
    %309 = vector.load %arg10[%c0_138, %c0_139] : memref<8x128xf32, #tpu.memory_space<vmem>>, vector<8x128xf32>
    tpu.vector_store %arg10[%c0_138, %c0_139], %305 {strides = array<i32>} : memref<8x128xf32, #tpu.memory_space<vmem>>, vector<8x128xf32>,
    %c8_i32_140 = arith.constant 8 : i32
    %c1_i32_141 = arith.constant 1 : i32
    %c0_142 = arith.constant 0 : index
    %c0_143 = arith.constant 0 : index
    %310 = vector.load %arg9[%c0_142, %c0_143] : memref<8x128xf32, #tpu.memory_space<vmem>>, vector<8x128xf32>
    %c0_144 = arith.constant 0 : index
    %c0_145 = arith.constant 0 : index
    %311 = vector.load %arg5[%c0_144, %c0_145] : memref<1x128xf32, #tpu.memory_space<vmem>>, vector<1x128xf32>
    %312 = vector.broadcast %311 : vector<1x128xf32> to vector<8x128xf32>
    %313 = arith.mulf %310, %312 : vector<8x128xf32>
    %cst_146 = arith.constant dense<0.000000e+00> : vector<8xf32>
    %314 = vector.multi_reduction <add>, %313, %cst_146 [1] : vector<8x128xf32> to vector<8xf32>
    %315 = vector.shape_cast %314 : vector<8xf32> to vector<8x1xf32>
    %c0_147 = arith.constant 0 : index
    %c0_148 = arith.constant 0 : index
    %316 = vector.load %arg6[%c0_147, %c0_148] : memref<1x1xf32, #tpu.memory_space<vmem>>, vector<1x1xf32>
    %317 = vector.broadcast %316 : vector<1x1xf32> to vector<8x1xf32>
    %318 = arith.addf %315, %317 : vector<8x1xf32>
    %c0_149 = arith.constant 0 : index
    %c0_150 = arith.constant 0 : index
    %319 = vector.load %arg7[%c0_149, %c0_150] : memref<8x1xf32, #tpu.memory_space<vmem>>, vector<8x1xf32>
    tpu.vector_store %arg7[%c0_149, %c0_150], %318 {strides = array<i32>} : memref<8x1xf32, #tpu.memory_space<vmem>>, vector<8x1xf32>,
    return
  }
  func.func @transform_0(%arg0: i32) -> (i32, i32) {
    %c0_i32 = arith.constant 0 : i32
    %c0_i32_0 = arith.constant 0 : i32
    return %arg0, %c0_i32 : i32, i32
  }
  func.func @transform_1(%arg0: i32) -> (i32, i32) {
    %c0_i32 = arith.constant 0 : i32
    %c0_i32_0 = arith.constant 0 : i32
    %c0_i32_1 = arith.constant 0 : i32
    return %c0_i32, %c0_i32_0 : i32, i32
  }
  func.func @transform_2(%arg0: i32) -> (i32, i32) {
    %c0_i32 = arith.constant 0 : i32
    %c0_i32_0 = arith.constant 0 : i32
    %c0_i32_1 = arith.constant 0 : i32
    return %c0_i32, %c0_i32_0 : i32, i32
  }
  func.func @transform_3(%arg0: i32) -> (i32, i32) {
    %c0_i32 = arith.constant 0 : i32
    %c0_i32_0 = arith.constant 0 : i32
    %c0_i32_1 = arith.constant 0 : i32
    return %c0_i32, %c0_i32_0 : i32, i32
  }
  func.func @transform_4(%arg0: i32) -> (i32, i32) {
    %c0_i32 = arith.constant 0 : i32
    %c0_i32_0 = arith.constant 0 : i32
    %c0_i32_1 = arith.constant 0 : i32
    return %c0_i32, %c0_i32_0 : i32, i32
  }
  func.func @transform_5(%arg0: i32) -> (i32, i32) {
    %c0_i32 = arith.constant 0 : i32
    %c0_i32_0 = arith.constant 0 : i32
    %c0_i32_1 = arith.constant 0 : i32
    return %c0_i32, %c0_i32_0 : i32, i32
  }
  func.func @transform_6(%arg0: i32) -> (i32, i32) {
    %c0_i32 = arith.constant 0 : i32
    %c0_i32_0 = arith.constant 0 : i32
    return %arg0, %c0_i32 : i32, i32
  }
}

</mosaic_0001>

<bundles_post_ra>
// kernel: tpu_custom_call.1
= control target key start
LH: loop header
LB: loop body
LE: loop exit
PB: predicated region body
PF: predicated region fallthrough
CT: control target
= control target key end

     0   :  { %s4046_s0 = inlined_call_operand.vmem [shape: bf16[64,16], index: 0, kind: input, shape index: {}]   ;;  %s4047_s1 = inlined_call_operand.vmem [shape: bf16[16,512], index: 1, kind: input, shape index: {}]   ;;  %s4048_s2 = inlined_call_operand.hbm [shape: bf16[128,512], index: 2, kind: input, shape index: {}]   ;;  %s4049_s3 = inlined_call_operand.vmem [shape: f32[1,512], index: 3, kind: input, shape index: {}]   ;;  %s4050_s4 = inlined_call_operand.vmem [shape: f32[1,128], index: 4, kind: input, shape index: {}]   ;;  %s4051_s5 = inlined_call_operand.<no memory space> [shape: f32[1,1], index: 5, kind: input, shape index: {}]   ;;  %s4052_s6 = inlined_call_operand.vmem [shape: f32[8,1], index: 6, kind: output, shape index: {}]  }
   0x1   :  { %v11_v0 = vstv %s4051_s5 }
   0x2   :  { %12 = vst [vmem:[#allocation5] sm:$0x1] %v11_v0 }
   0x3   :  { %13 = vsyncpa [#allocation7], 0  ;;  %s3411_s23 = smov [#allocation6]  }
   0x4   :  { %s23_s24 = sshll.u32 %s3411_s23, 4  ;;  %s24_s24 = int_to_ptr.vmem [resolvable:$true] %s23_s24 }
   0x5   :  { %s3397_s25 = scalar_lea.vmem %s24_s24, 4096  ;;  %p3402_p1 = scmp.lt.s32.totalorder %s24_s24, %s24_s24 }
   0x6   :  { %p3398_p0 = scmp.ne.s32.totalorder %s24_s24, %s3397_s25  ;;  %p3403_p2 = scmp.lt.s32.totalorder %s3397_s25, %s3397_s25 }
   0x8   :  { %p3404_p3 = por %p3403_p2, %p3402_p1 }
   0xa   :  { %p3405_p4 = pnand %p3404_p3, %p3398_p0 }
   0xc   :  { %3408 = shalt.err (!%p3405_p4)
}
   0xd   :  { %s3412_s26 = smov 256   ;;  %s3413_s27 = smov 16  }
   0xe   :  { %29 = dma.hbm_to_vmem [thread:$0]  %s4048_s2, 4096, %s24_s24, [#allocation7], %s3412_s26, %s3412_s26, %s3413_s27  }
   0xf   :  { %3409 = dma.done.wait [#allocation7], 4096  }
  0x10   :  { %3410 = vsyncadd [#allocation7], 4294963200  ;;  %v4053_v1 = vmov 0   ;;  %v3155_v2 = vld [vmem:[%s4047_s1 + $0x4] ss:$16 sps:$4 sm:$0xff]   ;;  %vm116_vm0 = vcmask 130048   ;;  %v56_v43 = vlaneseq }
  0x11   :  { %161 = vmatprep.mubr.bf16.mxu0 %v4053_v1  ;;  %234 = vmatprep.mubr.bf16.mxu1 %v4053_v1  ;;  %v3157_v3 = vld [vmem:[%s4047_s1 + $0xc] ss:$16 sps:$4 sm:$0xff]   ;;  %v3159_v4 = vld [vmem:[%s4047_s1] ss:$16 sps:$4 sm:$0xff]   ;;  %v3160_v5 = vld [vmem:[%s4047_s1 + $0x8] ss:$16 sps:$4 sm:$0xff]  }
  0x12   :  { %143 = vmatprep.subr.bf16.mxu0 %v3155_v2  ;;  %216 = vmatprep.subr.bf16.mxu1 %v3157_v3  ;;  %v3161_v6 = vld [vmem:[%s4046_s0] sm:$0xff]   ;;  %v3478_v9 = vld [vmem:[#allocation6 + $0xe8] ss:$16 sps:$4 sm:$0xff]   ;;  %v3187_v26 = vld [vmem:[%s4046_s0 + $0x10] sm:$0xff]   ;;  %v3415_v42 = vmov 0.0|0.0   ;;  %v57_v44 = vshrl.u32 %v56_v43, 7 }
  0x13   :  { %144 = vmatpush1.bf16.msra.mxu0 %v3159_v4  ;;  %217 = vmatpush1.bf16.msra.mxu1 %v3160_v5  ;;  %v3474_v7 = vld [vmem:[#allocation6 + $0xe0] ss:$16 sps:$4 sm:$0xff]   ;;  %v3476_v8 = vld [vmem:[#allocation6 + $0xe4] ss:$16 sps:$4 sm:$0xff]   ;;  %v3481_v10 = vld [vmem:[#allocation6 + $0xec] ss:$16 sps:$4 sm:$0xff]  }
  0x14   :  { %508 = vmatprep.subr.bf16.mxu0 %v3476_v8  ;;  %v3485_v11 = vld [vmem:[#allocation6 + $0xc4] ss:$16 sps:$4 sm:$0xff]   ;;  %549 = vmatprep.subr.bf16.mxu1 %v3481_v10  ;;  %v3489_v12 = vld [vmem:[#allocation6 + $0xc0] ss:$16 sps:$4 sm:$0xff]   ;;  %v3491_v13 = vld [vmem:[#allocation6 + $0xcc] ss:$16 sps:$4 sm:$0xff]  }
  0x15   :  { %v3495_v14 = vld [vmem:[#allocation6 + $0xc8] ss:$16 sps:$4 sm:$0xff]   ;;  %v3503_v16 = vld [vmem:[#allocation6 + $0xa4] ss:$16 sps:$4 sm:$0xff]   ;;  %v3506_v17 = vld [vmem:[#allocation6 + $0xa0] ss:$16 sps:$4 sm:$0xff]  }
  0x16   :  { %2860 = vmatmul.mubr.msk.bf16.vlgmr.msra.gmra.mxu0 %vm116_vm0, %v3161_v6  ;;  %2864 = vmatmul.mubr.msk.bf16.vlgmr.msra.gmra.mxu1 %vm116_vm0, %v3161_v6  ;;  %v3174_v15 = vld [vmem:[%s4046_s0 + $0x8] sm:$0xff]   ;;  %v3522_v22 = vld [vmem:[#allocation6 + $0x80] ss:$16 sps:$4 sm:$0xff]   ;;  %v3200_v33 = vld [vmem:[%s4046_s0 + $0x18] sm:$0xff]   ;;  %v66_v45 = vsub.s32 2, %v57_v44  ;;  %v58_v46 = vsub.s32 0, %v57_v44 }
  0x17   :  { %509 = vmatpush1.bf16.msra.mxu0 %v3474_v7  ;;  %550 = vmatpush1.bf16.msra.mxu1 %v3478_v9  ;;  %v3508_v18 = vld [vmem:[#allocation6 + $0xac] ss:$16 sps:$4 sm:$0xff]   ;;  %v3512_v19 = vld [vmem:[#allocation6 + $0xa8] ss:$16 sps:$4 sm:$0xff]   ;;  %v3514_v20 = vld [vmem:[#allocation6 + $0x84] ss:$16 sps:$4 sm:$0xff]  }
  0x18   :  { %510 = vmatprep.subr.bf16.mxu0 %v3485_v11  ;;  %551 = vmatprep.subr.bf16.mxu1 %v3491_v13  ;;  %v3519_v21 = vld [vmem:[#allocation6 + $0x8c] ss:$16 sps:$4 sm:$0xff]   ;;  %v3527_v23 = vld [vmem:[#allocation6 + $0x88] ss:$16 sps:$4 sm:$0xff]   ;;  %v3529_v24 = vld [vmem:[#allocation6 + $0x64] ss:$16 sps:$4 sm:$0xff]  }
  0x19   :  { %171 = vmatprep.mubr.bf16.mxu0 %v4053_v1  ;;  %244 = vmatprep.mubr.bf16.mxu1 %v4053_v1  ;;  %v3533_v25 = vld [vmem:[#allocation6 + $0x6c] ss:$16 sps:$4 sm:$0xff]   ;;  %v3539_v27 = vld [vmem:[#allocation6 + $0x60] ss:$16 sps:$4 sm:$0xff]   ;;  %v3543_v28 = vld [vmem:[#allocation6 + $0x68] ss:$16 sps:$4 sm:$0xff]  }
  0x1a   :  { %v3545_v29 = vld [vmem:[#allocation6 + $0x44] ss:$16 sps:$4 sm:$0xff]   ;;  %v3548_v30 = vld [vmem:[#allocation6 + $0x4c] ss:$16 sps:$4 sm:$0xff]   ;;  %v3552_v31 = vld [vmem:[#allocation6 + $0x40] ss:$16 sps:$4 sm:$0xff]  }
  0x1b   :  { %511 = vmatpush1.bf16.msra.mxu0 %v3489_v12  ;;  %552 = vmatpush1.bf16.msra.mxu1 %v3495_v14  ;;  %v3555_v32 = vld [vmem:[#allocation6 + $0x48] ss:$16 sps:$4 sm:$0xff]   ;;  %v3563_v34 = vld [vmem:[#allocation6 + $0x24] ss:$16 sps:$4 sm:$0xff]   ;;  %v3567_v35 = vld [vmem:[#allocation6 + $0x20] ss:$16 sps:$4 sm:$0xff]  }
  0x1c   :  { %512 = vmatprep.subr.bf16.mxu0 %v3503_v16  ;;  %553 = vmatprep.subr.bf16.mxu1 %v3508_v18  ;;  %v3569_v36 = vld [vmem:[#allocation6 + $0x2c] ss:$16 sps:$4 sm:$0xff]   ;;  %v3571_v37 = vld [vmem:[#allocation6 + $0x28] ss:$16 sps:$4 sm:$0xff]   ;;  %v3573_v38 = vld [vmem:[#allocation6 + $0x4] ss:$16 sps:$4 sm:$0xff]  }
  0x1d   :  { %v3576_v39 = vld [vmem:[#allocation6 + $0xc] ss:$16 sps:$4 sm:$0xff]   ;;  %v3581_v40 = vld [vmem:[#allocation6] ss:$16 sps:$4 sm:$0xff]   ;;  %v3585_v41 = vld [vmem:[#allocation6 + $0x8] ss:$16 sps:$4 sm:$0xff]  }
  0x1e   :  { %2861 = vmatmul.mubr.msk.bf16.gmra.mxu0 %vm116_vm0, %v3174_v15  ;;  %2865 = vmatmul.mubr.msk.bf16.gmra.mxu1 %vm116_vm0, %v3174_v15  ;;  %v70_v47 = vsub.s32 3, %v57_v44  ;;  %v54_v48 = vld [vmem:[%s4049_s3] sm:$0xf]  ;;  %v62_v52 = vsub.s32 1, %v57_v44  ;;  %vm2838_vm1 = vcmask 7168  }
  0x1f   :  { %513 = vmatpush1.bf16.msra.mxu0 %v3506_v17  ;;  %181 = vmatprep.mubr.bf16.mxu0 %v4053_v1  ;;  %v3638_v51 = vrot.slane %v54_v48, %v66_v45  ;;  %v59_v55 = vrot.slane %v54_v48, %v58_v46 }
  0x20   :  { %554 = vmatpush1.bf16.msra.mxu1 %v3512_v19  ;;  %514 = vmatprep.subr.bf16.mxu0 %v3514_v20  ;;  %v3644_v56 = vrot.slane %v54_v48, %v70_v47  ;;  %v63_v59 = vrot.slane %v54_v48, %v62_v52 }
  0x21   :  { %555 = vmatprep.subr.bf16.mxu1 %v3519_v21  ;;  %254 = vmatprep.mubr.bf16.mxu1 %v4053_v1 }
  0x23   :  { %515 = vmatpush1.bf16.msra.mxu0 %v3522_v22 }
  0x24   :  { %556 = vmatpush1.bf16.msra.mxu1 %v3527_v23  ;;  %516 = vmatprep.subr.bf16.mxu0 %v3529_v24 }
  0x25   :  { %557 = vmatprep.subr.bf16.mxu1 %v3533_v25 }
  0x26   :  { %2862 = vmatmul.mubr.msk.bf16.gmra.mxu0 %vm116_vm0, %v3187_v26  ;;  %2866 = vmatmul.mubr.msk.bf16.gmra.mxu1 %vm116_vm0, %v3187_v26 }
  0x27   :  { %517 = vmatpush1.bf16.msra.mxu0 %v3539_v27  ;;  %191 = vmatprep.mubr.bf16.mxu0 %v4053_v1 }
  0x28   :  { %558 = vmatpush1.bf16.msra.mxu1 %v3543_v28  ;;  %518 = vmatprep.subr.bf16.mxu0 %v3545_v29 }
  0x29   :  { %559 = vmatprep.subr.bf16.mxu1 %v3548_v30  ;;  %264 = vmatprep.mubr.bf16.mxu1 %v4053_v1 }
  0x2b   :  { %519 = vmatpush1.bf16.msra.mxu0 %v3552_v31 }
  0x2c   :  { %560 = vmatpush1.bf16.msra.mxu1 %v3555_v32  ;;  %520 = vmatprep.subr.bf16.mxu0 %v3563_v34 }
  0x2d   :  { %561 = vmatprep.subr.bf16.mxu1 %v3569_v36 }
  0x2e   :  { %2863 = vmatmul.mubr.msk.bf16.gmra.mxu0 %vm116_vm0, %v3200_v33  ;;  %2867 = vmatmul.mubr.msk.bf16.gmra.mxu1 %vm116_vm0, %v3200_v33 }
  0x2f   :  { %521 = vmatpush1.bf16.msra.mxu0 %v3567_v35  ;;  %540 = vmatprep.mubr.bf16.mxu0 %v4053_v1 }
  0x30   :  { %562 = vmatpush1.bf16.msra.mxu1 %v3571_v37  ;;  %522 = vmatprep.subr.bf16.mxu0 %v3573_v38 }
  0x31   :  { %563 = vmatprep.subr.bf16.mxu1 %v3576_v39  ;;  %581 = vmatprep.mubr.bf16.mxu1 %v4053_v1 }
  0x33   :  { %523 = vmatpush1.bf16.msra.mxu0 %v3581_v40 }
  0x34   :  { %564 = vmatpush1.bf16.msra.mxu1 %v3585_v41  ;;  %822 = vmatprep.subr.bf16.mxu0 %v3476_v8 }
  0x35   :  { %863 = vmatprep.subr.bf16.mxu1 %v3481_v10 }
  0x36   :  { %541 = vmatmul.mubr.bf16.vlgmr.msra.gmra.mxu0 %v3415_v42 }
  0x37   :  { %582 = vmatmul.mubr.bf16.vlgmr.msra.gmra.mxu1 %v3415_v42  ;;  %823 = vmatpush1.bf16.msra.mxu0 %v3474_v7 }
  0x38   :  { %864 = vmatpush1.bf16.msra.mxu1 %v3478_v9  ;;  %824 = vmatprep.subr.bf16.mxu0 %v3485_v11 }
  0x39   :  { %865 = vmatprep.subr.bf16.mxu1 %v3491_v13  ;;  %854 = vmatprep.mubr.bf16.mxu0 %v4053_v1 }
  0x3a   :  { %895 = vmatprep.mubr.bf16.mxu1 %v4053_v1 }
  0x3b   :  { %825 = vmatpush1.bf16.msra.mxu0 %v3489_v12 }
  0x3c   :  { %866 = vmatpush1.bf16.msra.mxu1 %v3495_v14  ;;  %826 = vmatprep.subr.bf16.mxu0 %v3503_v16 }
  0x3d   :  { %867 = vmatprep.subr.bf16.mxu1 %v3508_v18 }
  0x3f   :  { %827 = vmatpush1.bf16.msra.mxu0 %v3506_v17 }
  0x40   :  { %868 = vmatpush1.bf16.msra.mxu1 %v3512_v19  ;;  %828 = vmatprep.subr.bf16.mxu0 %v3514_v20 }
  0x41   :  { %869 = vmatprep.subr.bf16.mxu1 %v3519_v21 }
  0x43   :  { %829 = vmatpush1.bf16.msra.mxu0 %v3522_v22 }
  0x44   :  { %870 = vmatpush1.bf16.msra.mxu1 %v3527_v23  ;;  %830 = vmatprep.subr.bf16.mxu0 %v3529_v24 }
  0x45   :  { %871 = vmatprep.subr.bf16.mxu1 %v3533_v25 }
  0x47   :  { %831 = vmatpush1.bf16.msra.mxu0 %v3539_v27 }
  0x48   :  { %872 = vmatpush1.bf16.msra.mxu1 %v3543_v28  ;;  %832 = vmatprep.subr.bf16.mxu0 %v3545_v29 }
  0x49   :  { %873 = vmatprep.subr.bf16.mxu1 %v3548_v30 }
  0x4b   :  { %833 = vmatpush1.bf16.msra.mxu0 %v3552_v31 }
  0x4c   :  { %874 = vmatpush1.bf16.msra.mxu1 %v3555_v32  ;;  %834 = vmatprep.subr.bf16.mxu0 %v3563_v34 }
  0x4d   :  { %875 = vmatprep.subr.bf16.mxu1 %v3569_v36 }
  0x4f   :  { %835 = vmatpush1.bf16.msra.mxu0 %v3567_v35 }
  0x50   :  { %876 = vmatpush1.bf16.msra.mxu1 %v3571_v37  ;;  %836 = vmatprep.subr.bf16.mxu0 %v3573_v38 }
  0x51   :  { %877 = vmatprep.subr.bf16.mxu1 %v3576_v39 }
  0x53   :  { %837 = vmatpush1.bf16.msra.mxu0 %v3581_v40 }
  0x54   :  { %878 = vmatpush1.bf16.msra.mxu1 %v3585_v41  ;;  %1136 = vmatprep.subr.bf16.mxu0 %v3476_v8 }
  0x55   :  { %1177 = vmatprep.subr.bf16.mxu1 %v3481_v10 }
  0xd6   :  { %v3634_v49 = vpop.f32.mrf.mxu0  ;;  %v3636_v50 = vpop.f32.mrf.mxu1 }
  0xd8   :  { %v3640_v53 = vpop.f32.mrf.mxu0  ;;  %v3642_v54 = vpop.f32.mrf.mxu1 }
  0xda   :  { %v167_v57 = vpop.f32.mrf.mxu0  ;;  %v240_v58 = vpop.f32.mrf.mxu1 }
  0xdb   :  { %v3646_v60 = vadd.f32 %v167_v57, %v59_v55  ;;  %v3649_v61 = vadd.f32 %v240_v58, %v3638_v51 }
  0xdc   :  { %v169_v62 = vpop.f32.mrf.mxu0  ;;  %v242_v63 = vpop.f32.mrf.mxu1 }
  0xdd   :  { %v3651_v0 = vadd.f32 %v169_v62, %v63_v59  ;;  %v3654_v2 = vadd.f32 %v242_v63, %v3644_v56 }
  0xde   :  { %v173_v3 = vpop.f32.mrf.mxu0  ;;  %v246_v4 = vpop.f32.mrf.mxu1 }
  0xdf   :  { %v3656_v5 = vadd.f32 %v173_v3, %v59_v55  ;;  %v3659_v6 = vadd.f32 %v246_v4, %v3638_v51 }
  0xe0   :  { %v175_v15 = vpop.f32.mrf.mxu0  ;;  %v248_v26 = vpop.f32.mrf.mxu1 }
  0xe1   :  { %4055 = vst [vmem:[#allocation9_spill] sm:$0xff] %v3659_v6  ;;  %v3661_v33 = vadd.f32 %v175_v15, %v63_v59  ;;  %v3664_v42 = vadd.f32 %v248_v26, %v3644_v56 }
  0xe2   :  { %v177_v43 = vpop.f32.mrf.mxu0  ;;  %v250_v44 = vpop.f32.mrf.mxu1 }
  0xe3   :  { %v3666_v45 = vadd.f32 %v177_v43, %v59_v55  ;;  %v3669_v46 = vadd.f32 %v250_v44, %v3638_v51 }
  0xe4   :  { %v179_v47 = vpop.f32.mrf.mxu0  ;;  %v252_v48 = vpop.f32.mrf.mxu1 }
  0xe5   :  { %4056 = vst [vmem:[#allocation10_spill] sm:$0xff] %v3666_v45  ;;  %4057 = vst [vmem:[#allocation11_spill] sm:$0xff] %v3669_v46  ;;  %v3671_v52 = vadd.f32 %v179_v47, %v63_v59  ;;  %v3674_v57 = vadd.f32 %v252_v48, %v3644_v56 }
  0xe6   :  { %v183_v58 = vpop.f32.mrf.mxu0  ;;  %v256_v62 = vpop.f32.mrf.mxu1 }
  0xe7   :  { %4058 = vst [vmem:[#allocation12_spill] sm:$0xff] %v3671_v52  ;;  %4059 = vst [vmem:[#allocation13_spill] sm:$0xff] %v3674_v57  ;;  %v3676_v63 = vadd.f32 %v183_v58, %v59_v55  ;;  %v3679_v3 = vadd.f32 %v256_v62, %v3638_v51 }
  0xe8   :  { %v185_v4 = vpop.f32.mrf.mxu0  ;;  %v258_v15 = vpop.f32.mrf.mxu1 }
  0xe9   :  { %4060 = vst [vmem:[#allocation14_spill] sm:$0xff] %v3676_v63  ;;  %4061 = vst [vmem:[#allocation15_spill] sm:$0xff] %v3679_v3  ;;  %v3681_v26 = vadd.f32 %v185_v4, %v63_v59  ;;  %v3684_v43 = vadd.f32 %v258_v15, %v3644_v56 }
  0xea   :  { %v187_v44 = vpop.f32.mrf.mxu0  ;;  %v260_v47 = vpop.f32.mrf.mxu1 }
  0xeb   :  { %4062 = vst [vmem:[#allocation16_spill] sm:$0xff] %v3681_v26  ;;  %4063 = vst [vmem:[#allocation17_spill] sm:$0xff] %v3684_v43  ;;  %v3686_v1 = vadd.f32 %v187_v44, %v59_v55  ;;  %v3689_v48 = vadd.f32 %v260_v47, %v3638_v51 }
  0xec   :  { %v189_v46 = vpop.f32.mrf.mxu0  ;;  %v262_v58 = vpop.f32.mrf.mxu1 }
  0xed   :  { %4064 = vst [vmem:[#allocation18_spill] sm:$0xff] %v3686_v1  ;;  %4065 = vst [vmem:[#allocation19_spill] sm:$0xff] %v3689_v48  ;;  %v3691_v63 = vadd.f32 %v189_v46, %v63_v59  ;;  %v3694_v62 = vadd.f32 %v262_v58, %v3644_v56 }
  0xee   :  { %v193_v3 = vpop.f32.mrf.mxu0  ;;  %v266_v4 = vpop.f32.mrf.mxu1 }
  0xef   :  { %4066 = vst [vmem:[#allocation20_spill] sm:$0xff] %v3691_v63  ;;  %4067 = vst [vmem:[#allocation21_spill] sm:$0xff] %v3694_v62  ;;  %v3696_v26 = vadd.f32 %v193_v3, %v59_v55  ;;  %v3699_v15 = vadd.f32 %v266_v4, %v3638_v51 }
  0xf0   :  { %v195_v43 = vpop.f32.mrf.mxu0  ;;  %v268_v44 = vpop.f32.mrf.mxu1 }
  0xf1   :  { %4068 = vst [vmem:[#allocation22_spill] sm:$0xff] %v3696_v26  ;;  %4069 = vst [vmem:[#allocation23_spill] sm:$0xff] %v3699_v15  ;;  %v3701_v1 = vadd.f32 %v195_v43, %v63_v59  ;;  %v3704_v47 = vadd.f32 %v268_v44, %v3644_v56  ;;  %v164_v26 = vadd.f32 %v3634_v49, %v59_v55 }
  0xf2   :  { %v197_v48 = vpop.f32.mrf.mxu0  ;;  %v270_v46 = vpop.f32.mrf.mxu1  ;;  %v166_v44 = vadd.f32 %v3640_v53, %v63_v59  ;;  %v237_v53 = vadd.f32 %v3636_v50, %v3638_v51 }
  0xf3   :  { %4070 = vst [vmem:[#allocation24_spill] sm:$0xff] %v3701_v1  ;;  %4071 = vst [vmem:[#allocation25_spill] sm:$0xff] %v3704_v47  ;;  %v3706_v63 = vadd.f32 %v197_v48, %v59_v55  ;;  %v3709_v58 = vadd.f32 %v270_v46, %v3638_v51  ;;  %v239_v55 = vadd.f32 %v3642_v54, %v3644_v56 }
  0xf4   :  { %v199_v62 = vpop.f32.mrf.mxu0  ;;  %v272_v3 = vpop.f32.mrf.mxu1 }
  0xf5   :  { %4072 = vst [vmem:[#allocation26_spill] sm:$0xff] %v3706_v63  ;;  %4073 = vst [vmem:[#allocation27_spill] sm:$0xff] %v3709_v58  ;;  %v3712_v4 = vadd.f32 %v199_v62, %v63_v59  ;;  %v3715_v15 = vadd.f32 %v272_v3, %v3644_v56 }
  0xf6   :  { %v542_v43 = vpop.f32.mrf.mxu0 }
  0xf7   :  { %v590_v47 = vadd.f32 %v542_v43, %v164_v26  ;;  %v583_v1 = vpop.f32.mrf.mxu1 }
  0xf8   :  { %v544_v57 = vpop.f32.mrf.mxu0  ;;  %v592_v3 = vadd.f32 %v583_v1, %v237_v53 }
  0xf9   :  { %v2900_v48 = vmul.f32 -1.442695, %v590_v47  ;;  %v591_v63 = vadd.f32 %v544_v57, %v166_v44  ;;  %v585_v52 = vpop.f32.mrf.mxu1 }
  0xfa   :  { %v546_v46 = vpop.f32.mrf.mxu0  ;;  %v593_v62 = vadd.f32 %v585_v52, %v239_v55 }
  0xfb   :  { %3261 = vpow2.f32 %v2900_v48  ;;  %v2901_v58 = vmul.f32 -1.442695, %v591_v63  ;;  %v587_v45 = vpop.f32.mrf.mxu1  ;;  %v4074_v46 = vmov 0  }
  0xfc   :  { %v547_v6 = vpop.f32.mrf.mxu0  ;;  %v2902_v59 = vmul.f32 -1.442695, %v593_v62 }
  0xfd   :  { %3263 = vpow2.f32 %v2901_v58  ;;  %v588_v49 = vpop.f32.mrf.mxu1 }
  0xfe   :  { %3265 = vpow2.f32 %v2902_v59 }
 0x108   :  { %v3262_v26 = vpop.eup %3261 }
 0x109   :  { %v597_v47 = vadd.f32 1.0, %v3262_v26 }
 0x10a   :  { %v3264_v57 = vpop.eup %3263 }
 0x10b   :  { %3267 = vrcp.f32 %v597_v47  ;;  %v603_v43 = vadd.f32 1.0, %v3264_v57  ;;  %v3266_v6 = vpop.eup %3265 }
 0x10c   :  { %3269 = vtanh.f32 %v592_v3  ;;  %v610_v44 = vadd.f32 1.0, %v3266_v6 }
 0x10d   :  { %3271 = vrcp.f32 %v603_v43 }
 0x10e   :  { %3273 = vrcp.f32 %v610_v44 }
 0x118   :  { %v3268_v45 = vpop.eup %3267 }
 0x119   :  { %v3270_v63 = vpop.eup %3269 }
 0x11a   :  { %v3272_v58 = vpop.eup %3271  ;;  %v615_v56 = vmul.f32 %v3270_v63, %v3268_v45 }
 0x11b   :  { %v614_v54 = vmul.f32 0.0, %v3272_v58  ;;  %v3274_v1 = vpop.eup %3273 }
 0x11d   :  { %v3722_v52 = vadd.f32 %v615_v56, %v614_v54 }
 0x11f   :  { %3275 = vtanh.f32 %v3722_v52 }
 0x12c   :  { %v3276_v50 = vpop.eup %3275 }
 0x12d   :  { %v618_v51 = vmul.f32 %v3276_v50, %v3274_v1 }
 0x12f   :  { %v629_v48 = vpack.c.bf16 %v618_v51, %v618_v51 }
 0x131   :  { %855 = vmatmul.mubr.bf16.vlgmr.msra.gmra.mxu0 %v629_v48  ;;  %896 = vmatmul.mubr.bf16.vlgmr.msra.gmra.mxu1 %v629_v48 }
 0x132   :  { %1137 = vmatpush1.bf16.msra.mxu0 %v3474_v7  ;;  %1178 = vmatpush1.bf16.msra.mxu1 %v3478_v9 }
 0x133   :  { %1138 = vmatprep.subr.bf16.mxu0 %v3485_v11  ;;  %1179 = vmatprep.subr.bf16.mxu1 %v3491_v13 }
 0x134   :  { %1168 = vmatprep.mubr.bf16.mxu0 %v4074_v46  ;;  %1209 = vmatprep.mubr.bf16.mxu1 %v4074_v46 }
 0x136   :  { %1139 = vmatpush1.bf16.msra.mxu0 %v3489_v12  ;;  %1180 = vmatpush1.bf16.msra.mxu1 %v3495_v14 }
 0x137   :  { %1140 = vmatprep.subr.bf16.mxu0 %v3503_v16  ;;  %1181 = vmatprep.subr.bf16.mxu1 %v3508_v18 }
 0x13a   :  { %1141 = vmatpush1.bf16.msra.mxu0 %v3506_v17  ;;  %1182 = vmatpush1.bf16.msra.mxu1 %v3512_v19 }
 0x13b   :  { %1142 = vmatprep.subr.bf16.mxu0 %v3514_v20  ;;  %1183 = vmatprep.subr.bf16.mxu1 %v3519_v21 }
 0x13e   :  { %1143 = vmatpush1.bf16.msra.mxu0 %v3522_v22  ;;  %1184 = vmatpush1.bf16.msra.mxu1 %v3527_v23 }
 0x13f   :  { %1144 = vmatprep.subr.bf16.mxu0 %v3529_v24  ;;  %1185 = vmatprep.subr.bf16.mxu1 %v3533_v25 }
 0x142   :  { %1145 = vmatpush1.bf16.msra.mxu0 %v3539_v27  ;;  %1186 = vmatpush1.bf16.msra.mxu1 %v3543_v28 }
 0x143   :  { %1146 = vmatprep.subr.bf16.mxu0 %v3545_v29  ;;  %1187 = vmatprep.subr.bf16.mxu1 %v3548_v30 }
 0x146   :  { %1147 = vmatpush1.bf16.msra.mxu0 %v3552_v31  ;;  %1188 = vmatpush1.bf16.msra.mxu1 %v3555_v32 }
 0x147   :  { %1148 = vmatprep.subr.bf16.mxu0 %v3563_v34  ;;  %1189 = vmatprep.subr.bf16.mxu1 %v3569_v36 }
 0x14a   :  { %1149 = vmatpush1.bf16.msra.mxu0 %v3567_v35  ;;  %1190 = vmatpush1.bf16.msra.mxu1 %v3571_v37 }
 0x14b   :  { %1150 = vmatprep.subr.bf16.mxu0 %v3573_v38  ;;  %1191 = vmatprep.subr.bf16.mxu1 %v3576_v39 }
 0x14e   :  { %1151 = vmatpush1.bf16.msra.mxu0 %v3581_v40  ;;  %1192 = vmatpush1.bf16.msra.mxu1 %v3585_v41 }
 0x14f   :  { %1450 = vmatprep.subr.bf16.mxu0 %v3476_v8  ;;  %1491 = vmatprep.subr.bf16.mxu1 %v3481_v10 }
 0x1f1   :  { %v856_v49 = vpop.f32.mrf.mxu0  ;;  %v897_v55 = vpop.f32.mrf.mxu1 }
 0x1f2   :  { %v904_v62 = vadd.f32 %v856_v49, %v3646_v60  ;;  %v906_v10 = vadd.f32 %v897_v55, %v3649_v61 }
 0x1f3   :  { %v858_v53 = vpop.f32.mrf.mxu0  ;;  %v899_v59 = vpop.f32.mrf.mxu1 }
 0x1f4   :  { %v2935_v26 = vmul.f32 -1.442695, %v904_v62  ;;  %v905_v3 = vadd.f32 %v858_v53, %v3651_v0  ;;  %v907_v8 = vadd.f32 %v899_v59, %v3654_v2  ;;  %v3813_v59 = vld [vmem:[#allocation6 + $0xe0] ss:$16 sps:$4 sm:$0xff]  }
 0x1f5   :  { %v860_v47 = vpop.f32.mrf.mxu0  ;;  %v901_v57 = vpop.f32.mrf.mxu1 }
 0x1f6   :  { %3277 = vpow2.f32 %v2935_v26  ;;  %v2936_v43 = vmul.f32 -1.442695, %v905_v3  ;;  %v2937_v63 = vmul.f32 -1.442695, %v907_v8  ;;  %v3815_v26 = vld [vmem:[#allocation6 + $0xe8] ss:$16 sps:$4 sm:$0xff]  }
 0x1f7   :  { %v861_v6 = vpop.f32.mrf.mxu0  ;;  %v902_v45 = vpop.f32.mrf.mxu1  ;;  %v3821_v3 = vld [vmem:[#allocation6 + $0xc4] ss:$16 sps:$4 sm:$0xff]   ;;  %v3823_v47 = vld [vmem:[#allocation6 + $0xcc] ss:$16 sps:$4 sm:$0xff]   ;;  %v3825_v57 = vld [vmem:[#allocation6 + $0xc0] ss:$16 sps:$4 sm:$0xff]  }
 0x1f8   :  { %3279 = vpow2.f32 %v2936_v43  ;;  %v3827_v43 = vld [vmem:[#allocation6 + $0xc8] ss:$16 sps:$4 sm:$0xff]   ;;  %v3833_v6 = vld [vmem:[#allocation6 + $0xa4] ss:$16 sps:$4 sm:$0xff]   ;;  %v3835_v45 = vld [vmem:[#allocation6 + $0xac] ss:$16 sps:$4 sm:$0xff]  }
 0x1f9   :  { %3281 = vtanh.f32 %v906_v10  ;;  %v3837_v8 = vld [vmem:[#allocation6 + $0xa0] ss:$16 sps:$4 sm:$0xff]   ;;  %v3839_v10 = vld [vmem:[#allocation6 + $0xa8] ss:$16 sps:$4 sm:$0xff]  }
 0x1fa   :  { %3283 = vpow2.f32 %v2937_v63  ;;  %v3845_v63 = vld [vmem:[#allocation6 + $0x84] ss:$16 sps:$4 sm:$0xff]  }
 0x203   :  { %v3278_v58 = vpop.eup %3277 }
 0x204   :  { %v911_v44 = vadd.f32 1.0, %v3278_v58  ;;  %v3847_v58 = vld [vmem:[#allocation6 + $0x8c] ss:$16 sps:$4 sm:$0xff]  }
 0x205   :  { %v3280_v60 = vpop.eup %3279 }
 0x206   :  { %3285 = vrcp.f32 %v911_v44  ;;  %v917_v54 = vadd.f32 1.0, %v3280_v60  ;;  %v3282_v0 = vpop.eup %3281  ;;  %v3849_v44 = vld [vmem:[#allocation6 + $0x80] ss:$16 sps:$4 sm:$0xff]   ;;  %v3851_v60 = vld [vmem:[#allocation6 + $0x88] ss:$16 sps:$4 sm:$0xff]  }
 0x207   :  { %v3284_v56 = vpop.eup %3283 }
 0x208   :  { %3287 = vrcp.f32 %v917_v54  ;;  %v924_v48 = vadd.f32 1.0, %v3284_v56  ;;  %v3855_v54 = vld [vmem:[#allocation6 + $0x64] ss:$16 sps:$4 sm:$0xff]   ;;  %v3861_v56 = vld [vmem:[#allocation6 + $0x60] ss:$16 sps:$4 sm:$0xff]  }
 0x20a   :  { %3289 = vrcp.f32 %v924_v48  ;;  %v3873_v48 = vld [vmem:[#allocation6 + $0x40] ss:$16 sps:$4 sm:$0xff]  }
 0x213   :  { %v3286_v1 = vpop.eup %3285 }
 0x214   :  { %v929_v50 = vmul.f32 %v3286_v1, %v3282_v0  ;;  %v3857_v0 = vld [vmem:[#allocation6 + $0x6c] ss:$16 sps:$4 sm:$0xff]   ;;  %v3863_v1 = vld [vmem:[#allocation6 + $0x68] ss:$16 sps:$4 sm:$0xff]  }
 0x215   :  { %v3288_v51 = vpop.eup %3287 }
 0x216   :  { %v928_v49 = vmul.f32 %v3288_v51, %v3722_v52  ;;  %v3811_v52 = vld [vmem:[#allocation6 + $0xec] ss:$16 sps:$4 sm:$0xff]  }
 0x217   :  { %v3290_v61 = vpop.eup %3289  ;;  %v3869_v51 = vld [vmem:[#allocation6 + $0x4c] ss:$16 sps:$4 sm:$0xff]  }
 0x218   :  { %v3764_v2 = vadd.f32 %v929_v50, %v928_v49  ;;  %v3867_v50 = vld [vmem:[#allocation6 + $0x44] ss:$16 sps:$4 sm:$0xff]   ;;  %v3875_v49 = vld [vmem:[#allocation6 + $0x48] ss:$16 sps:$4 sm:$0xff]  }
 0x21a   :  { %3291 = vtanh.f32 %v3764_v2 }
 0x227   :  { %v3292_v55 = vpop.eup %3291 }
 0x228   :  { %v932_v62 = vmul.f32 %v3292_v55, %v3290_v61  ;;  %v3881_v61 = vld [vmem:[#allocation6 + $0x2c] ss:$16 sps:$4 sm:$0xff]   ;;  %v3885_v55 = vld [vmem:[#allocation6 + $0x20] ss:$16 sps:$4 sm:$0xff]  }
 0x22a   :  { %v943_v53 = vpack.c.bf16 %v932_v62, %v932_v62  ;;  %v3887_v62 = vld [vmem:[#allocation6 + $0x28] ss:$16 sps:$4 sm:$0xff]  }
 0x22c   :  { %1169 = vmatmul.mubr.bf16.vlgmr.msra.gmra.mxu0 %v943_v53  ;;  %1210 = vmatmul.mubr.bf16.vlgmr.msra.gmra.mxu1 %v943_v53  ;;  %v3891_v53 = vld [vmem:[#allocation6 + $0x4] ss:$16 sps:$4 sm:$0xff]  }
 0x22d   :  { %1451 = vmatpush1.bf16.msra.mxu0 %v3474_v7  ;;  %1492 = vmatpush1.bf16.msra.mxu1 %v3478_v9 }
 0x22e   :  { %1452 = vmatprep.subr.bf16.mxu0 %v3485_v11  ;;  %1493 = vmatprep.subr.bf16.mxu1 %v3491_v13 }
 0x22f   :  { %1482 = vmatprep.mubr.bf16.mxu0 %v4074_v46  ;;  %1523 = vmatprep.mubr.bf16.mxu1 %v4074_v46 }
 0x231   :  { %1453 = vmatpush1.bf16.msra.mxu0 %v3489_v12  ;;  %1494 = vmatpush1.bf16.msra.mxu1 %v3495_v14 }
 0x232   :  { %1454 = vmatprep.subr.bf16.mxu0 %v3503_v16  ;;  %1495 = vmatprep.subr.bf16.mxu1 %v3508_v18 }
 0x235   :  { %1455 = vmatpush1.bf16.msra.mxu0 %v3506_v17  ;;  %1496 = vmatpush1.bf16.msra.mxu1 %v3512_v19 }
 0x236   :  { %1456 = vmatprep.subr.bf16.mxu0 %v3514_v20  ;;  %1497 = vmatprep.subr.bf16.mxu1 %v3519_v21 }
 0x239   :  { %1457 = vmatpush1.bf16.msra.mxu0 %v3522_v22  ;;  %1498 = vmatpush1.bf16.msra.mxu1 %v3527_v23  ;;  %v4075_v23 = vld [vmem:[#allocation9_spill] sm:$0xff] }
 0x23a   :  { %1458 = vmatprep.subr.bf16.mxu0 %v3529_v24  ;;  %1499 = vmatprep.subr.bf16.mxu1 %v3533_v25 }
 0x23d   :  { %1459 = vmatpush1.bf16.msra.mxu0 %v3539_v27  ;;  %1500 = vmatpush1.bf16.msra.mxu1 %v3543_v28 }
 0x23e   :  { %1460 = vmatprep.subr.bf16.mxu0 %v3545_v29  ;;  %1501 = vmatprep.subr.bf16.mxu1 %v3548_v30 }
 0x241   :  { %1461 = vmatpush1.bf16.msra.mxu0 %v3552_v31  ;;  %1502 = vmatpush1.bf16.msra.mxu1 %v3555_v32 }
 0x242   :  { %1462 = vmatprep.subr.bf16.mxu0 %v3563_v34  ;;  %1503 = vmatprep.subr.bf16.mxu1 %v3569_v36 }
 0x245   :  { %1463 = vmatpush1.bf16.msra.mxu0 %v3567_v35  ;;  %1504 = vmatpush1.bf16.msra.mxu1 %v3571_v37 }
 0x246   :  { %1464 = vmatprep.subr.bf16.mxu0 %v3573_v38  ;;  %1505 = vmatprep.subr.bf16.mxu1 %v3576_v39 }
 0x249   :  { %1465 = vmatpush1.bf16.msra.mxu0 %v3581_v40  ;;  %1506 = vmatpush1.bf16.msra.mxu1 %v3585_v41 }
 0x24a   :  { %1805 = vmatprep.subr.bf16.mxu1 %v3811_v52 }
 0x2ec   :  { %v1170_v7 = vpop.f32.mrf.mxu0  ;;  %v1211_v9 = vpop.f32.mrf.mxu1 }
 0x2ed   :  { %v1218_v11 = vadd.f32 %v1170_v7, %v3656_v5  ;;  %v1220_v24 = vadd.f32 %v1211_v9, %v4075_v23  ;;  %v3893_v7 = vld [vmem:[#allocation6 + $0xc] ss:$16 sps:$4 sm:$0xff]   ;;  %v3897_v9 = vld [vmem:[#allocation6] ss:$16 sps:$4 sm:$0xff]  }
 0x2ee   :  { %v1172_v12 = vpop.f32.mrf.mxu0  ;;  %v1213_v13 = vpop.f32.mrf.mxu1 }
 0x2ef   :  { %v2970_v14 = vmul.f32 -1.442695, %v1218_v11  ;;  %v1219_v16 = vadd.f32 %v1172_v12, %v3661_v33  ;;  %v1221_v22 = vadd.f32 %v1213_v13, %v3664_v42  ;;  %v3809_v42 = vld [vmem:[#allocation6 + $0xe4] ss:$16 sps:$4 sm:$0xff]   ;;  %v3899_v11 = vld [vmem:[#allocation6 + $0x8] ss:$16 sps:$4 sm:$0xff]  }
 0x2f0   :  { %v1174_v17 = vpop.f32.mrf.mxu0  ;;  %v1215_v18 = vpop.f32.mrf.mxu1  ;;  %1764 = vmatprep.subr.bf16.mxu0 %v3809_v42 }
 0x2f1   :  { %3293 = vpow2.f32 %v2970_v14  ;;  %v2971_v19 = vmul.f32 -1.442695, %v1219_v16  ;;  %v2972_v25 = vmul.f32 -1.442695, %v1221_v22  ;;  %v4076_v14 = vld [vmem:[#allocation10_spill] sm:$0xff] }
 0x2f2   :  { %v1175_v20 = vpop.f32.mrf.mxu0  ;;  %v1216_v21 = vpop.f32.mrf.mxu1 }
 0x2f3   :  { %3295 = vpow2.f32 %v2971_v19  ;;  %v4077_v20 = vld [vmem:[#allocation12_spill] sm:$0xff] }
 0x2f4   :  { %3297 = vtanh.f32 %v1220_v24 }
 0x2f5   :  { %3299 = vpow2.f32 %v2972_v25 }
 0x2fe   :  { %v3294_v27 = vpop.eup %3293 }
 0x2ff   :  { %v1225_v28 = vadd.f32 1.0, %v3294_v27 }
 0x300   :  { %v3296_v29 = vpop.eup %3295 }
 0x301   :  { %3301 = vrcp.f32 %v1225_v28  ;;  %v1231_v30 = vadd.f32 1.0, %v3296_v29  ;;  %v3298_v31 = vpop.eup %3297  ;;  %v4078_v28 = vld [vmem:[#allocation13_spill] sm:$0xff] }
 0x302   :  { %v3300_v32 = vpop.eup %3299 }
 0x303   :  { %3303 = vrcp.f32 %v1231_v30  ;;  %v1238_v37 = vadd.f32 1.0, %v3300_v32  ;;  %v4079_v30 = vld [vmem:[#allocation11_spill] sm:$0xff] }
 0x305   :  { %3305 = vrcp.f32 %v1238_v37 }
 0x30e   :  { %v3302_v34 = vpop.eup %3301 }
 0x30f   :  { %v1243_v35 = vmul.f32 %v3302_v34, %v3298_v31 }
 0x310   :  { %v3304_v36 = vpop.eup %3303 }
 0x311   :  { %v1242_v38 = vmul.f32 %v3304_v36, %v3764_v2  ;;  %v3879_v2 = vld [vmem:[#allocation6 + $0x24] ss:$16 sps:$4 sm:$0xff]  }
 0x312   :  { %v3306_v40 = vpop.eup %3305 }
 0x313   :  { %v3804_v39 = vadd.f32 %v1243_v35, %v1242_v38 }
 0x315   :  { %3307 = vtanh.f32 %v3804_v39 }
 0x322   :  { %v3308_v41 = vpop.eup %3307 }
 0x323   :  { %v1246_v5 = vmul.f32 %v3308_v41, %v3306_v40 }
 0x325   :  { %v1257_v33 = vpack.c.bf16 %v1246_v5, %v1246_v5 }
 0x327   :  { %1483 = vmatmul.mubr.bf16.vlgmr.msra.gmra.mxu0 %v1257_v33  ;;  %1524 = vmatmul.mubr.bf16.vlgmr.msra.gmra.mxu1 %v1257_v33 }
 0x328   :  { %1796 = vmatprep.mubr.bf16.mxu0 %v4074_v46  ;;  %1837 = vmatprep.mubr.bf16.mxu1 %v4074_v46 }
 0x329   :  { %1765 = vmatpush1.bf16.msra.mxu0 %v3813_v59  ;;  %1806 = vmatpush1.bf16.msra.mxu1 %v3815_v26 }
 0x32a   :  { %1766 = vmatprep.subr.bf16.mxu0 %v3821_v3  ;;  %1807 = vmatprep.subr.bf16.mxu1 %v3823_v47 }
 0x32d   :  { %1767 = vmatpush1.bf16.msra.mxu0 %v3825_v57  ;;  %1808 = vmatpush1.bf16.msra.mxu1 %v3827_v43 }
 0x32e   :  { %1768 = vmatprep.subr.bf16.mxu0 %v3833_v6  ;;  %1809 = vmatprep.subr.bf16.mxu1 %v3835_v45 }
 0x331   :  { %1769 = vmatpush1.bf16.msra.mxu0 %v3837_v8  ;;  %1810 = vmatpush1.bf16.msra.mxu1 %v3839_v10 }
 0x332   :  { %1770 = vmatprep.subr.bf16.mxu0 %v3845_v63  ;;  %1811 = vmatprep.subr.bf16.mxu1 %v3847_v58 }
 0x335   :  { %1771 = vmatpush1.bf16.msra.mxu0 %v3849_v44  ;;  %1812 = vmatpush1.bf16.msra.mxu1 %v3851_v60 }
 0x336   :  { %1772 = vmatprep.subr.bf16.mxu0 %v3855_v54  ;;  %1813 = vmatprep.subr.bf16.mxu1 %v3857_v0 }
 0x339   :  { %1773 = vmatpush1.bf16.msra.mxu0 %v3861_v56  ;;  %1814 = vmatpush1.bf16.msra.mxu1 %v3863_v1 }
 0x33a   :  { %1774 = vmatprep.subr.bf16.mxu0 %v3867_v50  ;;  %1815 = vmatprep.subr.bf16.mxu1 %v3869_v51 }
 0x33d   :  { %1775 = vmatpush1.bf16.msra.mxu0 %v3873_v48  ;;  %1816 = vmatpush1.bf16.msra.mxu1 %v3875_v49 }
 0x33e   :  { %1776 = vmatprep.subr.bf16.mxu0 %v3879_v2  ;;  %1817 = vmatprep.subr.bf16.mxu1 %v3881_v61 }
 0x341   :  { %1777 = vmatpush1.bf16.msra.mxu0 %v3885_v55  ;;  %1818 = vmatpush1.bf16.msra.mxu1 %v3887_v62 }
 0x342   :  { %1778 = vmatprep.subr.bf16.mxu0 %v3891_v53  ;;  %1819 = vmatprep.subr.bf16.mxu1 %v3893_v7 }
 0x345   :  { %1779 = vmatpush1.bf16.msra.mxu0 %v3897_v9  ;;  %1820 = vmatpush1.bf16.msra.mxu1 %v3899_v11 }
 0x346   :  { %2078 = vmatprep.subr.bf16.mxu0 %v3809_v42  ;;  %2119 = vmatprep.subr.bf16.mxu1 %v3811_v52 }
 0x3e7   :  { %v1484_v12 = vpop.f32.mrf.mxu0  ;;  %v1525_v13 = vpop.f32.mrf.mxu1 }
 0x3e8   :  { %v1532_v16 = vadd.f32 %v1484_v12, %v4076_v14  ;;  %v1534_v31 = vadd.f32 %v1525_v13, %v4079_v30 }
 0x3e9   :  { %v1486_v17 = vpop.f32.mrf.mxu0  ;;  %v1527_v18 = vpop.f32.mrf.mxu1 }
 0x3ea   :  { %v3005_v19 = vmul.f32 -1.442695, %v1532_v16  ;;  %v1533_v21 = vadd.f32 %v1486_v17, %v4077_v20  ;;  %v1535_v29 = vadd.f32 %v1527_v18, %v4078_v28 }
 0x3eb   :  { %v1488_v22 = vpop.f32.mrf.mxu0  ;;  %v1529_v23 = vpop.f32.mrf.mxu1 }
 0x3ec   :  { %3309 = vpow2.f32 %v3005_v19  ;;  %v3006_v24 = vmul.f32 -1.442695, %v1533_v21  ;;  %v3007_v32 = vmul.f32 -1.442695, %v1535_v29  ;;  %v4080_v21 = vld [vmem:[#allocation14_spill] sm:$0xff] }
 0x3ed   :  { %v1489_v25 = vpop.f32.mrf.mxu0  ;;  %v1530_v27 = vpop.f32.mrf.mxu1 }
 0x3ee   :  { %3311 = vpow2.f32 %v3006_v24  ;;  %v4081_v27 = vld [vmem:[#allocation16_spill] sm:$0xff] }
 0x3ef   :  { %3313 = vtanh.f32 %v1534_v31 }
 0x3f0   :  { %3315 = vpow2.f32 %v3007_v32 }
 0x3f9   :  { %v3310_v34 = vpop.eup %3309 }
 0x3fa   :  { %v1539_v35 = vadd.f32 1.0, %v3310_v34 }
 0x3fb   :  { %v3312_v36 = vpop.eup %3311 }
 0x3fc   :  { %3317 = vrcp.f32 %v1539_v35  ;;  %v1545_v37 = vadd.f32 1.0, %v3312_v36  ;;  %v3314_v38 = vpop.eup %3313  ;;  %v4082_v35 = vld [vmem:[#allocation17_spill] sm:$0xff] }
 0x3fd   :  { %v3316_v40 = vpop.eup %3315 }
 0x3fe   :  { %3319 = vrcp.f32 %v1545_v37  ;;  %v1552_v12 = vadd.f32 1.0, %v3316_v40  ;;  %v4083_v37 = vld [vmem:[#allocation15_spill] sm:$0xff] }
 0x400   :  { %3321 = vrcp.f32 %v1552_v12 }
 0x409   :  { %v3318_v41 = vpop.eup %3317 }
 0x40a   :  { %v1557_v5 = vmul.f32 %v3318_v41, %v3314_v38 }
 0x40b   :  { %v3320_v33 = vpop.eup %3319 }
 0x40c   :  { %v1556_v14 = vmul.f32 %v3320_v33, %v3804_v39 }
 0x40d   :  { %v3322_v13 = vpop.eup %3321 }
 0x40e   :  { %v3912_v16 = vadd.f32 %v1557_v5, %v1556_v14 }
 0x410   :  { %3323 = vtanh.f32 %v3912_v16 }
 0x41d   :  { %v3324_v17 = vpop.eup %3323 }
 0x41e   :  { %v1560_v18 = vmul.f32 %v3324_v17, %v3322_v13 }
 0x420   :  { %v1571_v19 = vpack.c.bf16 %v1560_v18, %v1560_v18 }
 0x422   :  { %1797 = vmatmul.mubr.bf16.vlgmr.msra.gmra.mxu0 %v1571_v19  ;;  %1838 = vmatmul.mubr.bf16.vlgmr.msra.gmra.mxu1 %v1571_v19 }
 0x423   :  { %2079 = vmatpush1.bf16.msra.mxu0 %v3813_v59  ;;  %2120 = vmatpush1.bf16.msra.mxu1 %v3815_v26 }
 0x424   :  { %2080 = vmatprep.subr.bf16.mxu0 %v3821_v3  ;;  %2121 = vmatprep.subr.bf16.mxu1 %v3823_v47 }
 0x425   :  { %2110 = vmatprep.mubr.bf16.mxu0 %v4074_v46  ;;  %2151 = vmatprep.mubr.bf16.mxu1 %v4074_v46 }
 0x427   :  { %2081 = vmatpush1.bf16.msra.mxu0 %v3825_v57  ;;  %2122 = vmatpush1.bf16.msra.mxu1 %v3827_v43 }
 0x428   :  { %2082 = vmatprep.subr.bf16.mxu0 %v3833_v6  ;;  %2123 = vmatprep.subr.bf16.mxu1 %v3835_v45 }
 0x42b   :  { %2083 = vmatpush1.bf16.msra.mxu0 %v3837_v8  ;;  %2124 = vmatpush1.bf16.msra.mxu1 %v3839_v10 }
 0x42c   :  { %2084 = vmatprep.subr.bf16.mxu0 %v3845_v63  ;;  %2125 = vmatprep.subr.bf16.mxu1 %v3847_v58 }
 0x42f   :  { %2085 = vmatpush1.bf16.msra.mxu0 %v3849_v44  ;;  %2126 = vmatpush1.bf16.msra.mxu1 %v3851_v60 }
 0x430   :  { %2086 = vmatprep.subr.bf16.mxu0 %v3855_v54  ;;  %2127 = vmatprep.subr.bf16.mxu1 %v3857_v0 }
 0x433   :  { %2087 = vmatpush1.bf16.msra.mxu0 %v3861_v56  ;;  %2128 = vmatpush1.bf16.msra.mxu1 %v3863_v1 }
 0x434   :  { %2088 = vmatprep.subr.bf16.mxu0 %v3867_v50  ;;  %2129 = vmatprep.subr.bf16.mxu1 %v3869_v51 }
 0x437   :  { %2089 = vmatpush1.bf16.msra.mxu0 %v3873_v48  ;;  %2130 = vmatpush1.bf16.msra.mxu1 %v3875_v49 }
 0x438   :  { %2090 = vmatprep.subr.bf16.mxu0 %v3879_v2  ;;  %2131 = vmatprep.subr.bf16.mxu1 %v3881_v61 }
 0x43b   :  { %2091 = vmatpush1.bf16.msra.mxu0 %v3885_v55  ;;  %2132 = vmatpush1.bf16.msra.mxu1 %v3887_v62 }
 0x43c   :  { %2092 = vmatprep.subr.bf16.mxu0 %v3891_v53  ;;  %2133 = vmatprep.subr.bf16.mxu1 %v3893_v7 }
 0x43f   :  { %2093 = vmatpush1.bf16.msra.mxu0 %v3897_v9  ;;  %2134 = vmatpush1.bf16.msra.mxu1 %v3899_v11 }
 0x440   :  { %2392 = vmatprep.subr.bf16.mxu0 %v3809_v42  ;;  %2433 = vmatprep.subr.bf16.mxu1 %v3811_v52 }
 0x4e2   :  { %v1798_v39 = vpop.f32.mrf.mxu0  ;;  %v1839_v20 = vpop.f32.mrf.mxu1 }
 0x4e3   :  { %v1846_v22 = vadd.f32 %v1798_v39, %v4080_v21  ;;  %v1848_v38 = vadd.f32 %v1839_v20, %v4083_v37 }
 0x4e4   :  { %v1800_v23 = vpop.f32.mrf.mxu0  ;;  %v1841_v24 = vpop.f32.mrf.mxu1 }
 0x4e5   :  { %v3040_v25 = vmul.f32 -1.442695, %v1846_v22  ;;  %v1847_v28 = vadd.f32 %v1800_v23, %v4081_v27  ;;  %v1849_v36 = vadd.f32 %v1841_v24, %v4082_v35 }
 0x4e6   :  { %v1802_v29 = vpop.f32.mrf.mxu0  ;;  %v1843_v30 = vpop.f32.mrf.mxu1 }
 0x4e7   :  { %3325 = vpow2.f32 %v3040_v25  ;;  %v3041_v31 = vmul.f32 -1.442695, %v1847_v28  ;;  %v3042_v40 = vmul.f32 -1.442695, %v1849_v36  ;;  %v4084_v28 = vld [vmem:[#allocation18_spill] sm:$0xff] }
 0x4e8   :  { %v1803_v32 = vpop.f32.mrf.mxu0  ;;  %v1844_v34 = vpop.f32.mrf.mxu1 }
 0x4e9   :  { %3327 = vpow2.f32 %v3041_v31  ;;  %v4085_v34 = vld [vmem:[#allocation20_spill] sm:$0xff] }
 0x4ea   :  { %3329 = vtanh.f32 %v1848_v38 }
 0x4eb   :  { %3331 = vpow2.f32 %v3042_v40 }
 0x4f4   :  { %v3326_v41 = vpop.eup %3325 }
 0x4f5   :  { %v1853_v5 = vadd.f32 1.0, %v3326_v41 }
 0x4f6   :  { %v3328_v33 = vpop.eup %3327 }
 0x4f7   :  { %3333 = vrcp.f32 %v1853_v5  ;;  %v1859_v12 = vadd.f32 1.0, %v3328_v33  ;;  %v3330_v14 = vpop.eup %3329  ;;  %v4086_v5 = vld [vmem:[#allocation21_spill] sm:$0xff]  ;;  %v4087_v33 = vld [vmem:[#allocation19_spill] sm:$0xff] }
 0x4f8   :  { %v3332_v13 = vpop.eup %3331 }
 0x4f9   :  { %3335 = vrcp.f32 %v1859_v12  ;;  %v1866_v39 = vadd.f32 1.0, %v3332_v13 }
 0x4fb   :  { %3337 = vrcp.f32 %v1866_v39 }
 0x504   :  { %v3334_v17 = vpop.eup %3333 }
 0x505   :  { %v1871_v18 = vmul.f32 %v3334_v17, %v3330_v14 }
 0x506   :  { %v3336_v19 = vpop.eup %3335 }
 0x507   :  { %v1870_v21 = vmul.f32 %v3336_v19, %v3912_v16 }
 0x508   :  { %v3338_v20 = vpop.eup %3337 }
 0x509   :  { %v3954_v22 = vadd.f32 %v1871_v18, %v1870_v21 }
 0x50b   :  { %3339 = vtanh.f32 %v3954_v22 }
 0x518   :  { %v3340_v23 = vpop.eup %3339 }
 0x519   :  { %v1874_v24 = vmul.f32 %v3340_v23, %v3338_v20 }
 0x51b   :  { %v1885_v25 = vpack.c.bf16 %v1874_v24, %v1874_v24 }
 0x51d   :  { %2111 = vmatmul.mubr.bf16.vlgmr.msra.gmra.mxu0 %v1885_v25  ;;  %2152 = vmatmul.mubr.bf16.vlgmr.msra.gmra.mxu1 %v1885_v25 }
 0x51e   :  { %2393 = vmatpush1.bf16.msra.mxu0 %v3813_v59  ;;  %2434 = vmatpush1.bf16.msra.mxu1 %v3815_v26 }
 0x51f   :  { %2394 = vmatprep.subr.bf16.mxu0 %v3821_v3  ;;  %2435 = vmatprep.subr.bf16.mxu1 %v3823_v47 }
 0x520   :  { %2424 = vmatprep.mubr.bf16.mxu0 %v4074_v46  ;;  %2465 = vmatprep.mubr.bf16.mxu1 %v4074_v46 }
 0x522   :  { %2395 = vmatpush1.bf16.msra.mxu0 %v3825_v57  ;;  %2436 = vmatpush1.bf16.msra.mxu1 %v3827_v43 }
 0x523   :  { %2396 = vmatprep.subr.bf16.mxu0 %v3833_v6  ;;  %2437 = vmatprep.subr.bf16.mxu1 %v3835_v45 }
 0x526   :  { %2397 = vmatpush1.bf16.msra.mxu0 %v3837_v8  ;;  %2438 = vmatpush1.bf16.msra.mxu1 %v3839_v10 }
 0x527   :  { %2398 = vmatprep.subr.bf16.mxu0 %v3845_v63  ;;  %2439 = vmatprep.subr.bf16.mxu1 %v3847_v58 }
 0x52a   :  { %2399 = vmatpush1.bf16.msra.mxu0 %v3849_v44  ;;  %2440 = vmatpush1.bf16.msra.mxu1 %v3851_v60 }
 0x52b   :  { %2400 = vmatprep.subr.bf16.mxu0 %v3855_v54  ;;  %2441 = vmatprep.subr.bf16.mxu1 %v3857_v0 }
 0x52e   :  { %2401 = vmatpush1.bf16.msra.mxu0 %v3861_v56  ;;  %2442 = vmatpush1.bf16.msra.mxu1 %v3863_v1 }
 0x52f   :  { %2402 = vmatprep.subr.bf16.mxu0 %v3867_v50  ;;  %2443 = vmatprep.subr.bf16.mxu1 %v3869_v51 }
 0x532   :  { %2403 = vmatpush1.bf16.msra.mxu0 %v3873_v48  ;;  %2444 = vmatpush1.bf16.msra.mxu1 %v3875_v49 }
 0x533   :  { %2404 = vmatprep.subr.bf16.mxu0 %v3879_v2  ;;  %2445 = vmatprep.subr.bf16.mxu1 %v3881_v61 }
 0x536   :  { %2405 = vmatpush1.bf16.msra.mxu0 %v3885_v55  ;;  %2446 = vmatpush1.bf16.msra.mxu1 %v3887_v62 }
 0x537   :  { %2406 = vmatprep.subr.bf16.mxu0 %v3891_v53  ;;  %2447 = vmatprep.subr.bf16.mxu1 %v3893_v7 }
 0x53a   :  { %2407 = vmatpush1.bf16.msra.mxu0 %v3897_v9  ;;  %2448 = vmatpush1.bf16.msra.mxu1 %v3899_v11 }
 0x53b   :  { %2706 = vmatprep.subr.bf16.mxu0 %v3809_v42  ;;  %2747 = vmatprep.subr.bf16.mxu1 %v3811_v52 }
 0x5dd   :  { %v2112_v16 = vpop.f32.mrf.mxu0  ;;  %v2153_v27 = vpop.f32.mrf.mxu1 }
 0x5de   :  { %v2160_v29 = vadd.f32 %v2112_v16, %v4084_v28  ;;  %v2162_v52 = vadd.f32 %v2153_v27, %v4087_v33 }
 0x5df   :  { %v2114_v30 = vpop.f32.mrf.mxu0  ;;  %v2155_v31 = vpop.f32.mrf.mxu1 }
 0x5e0   :  { %v3075_v32 = vmul.f32 -1.442695, %v2160_v29  ;;  %v2161_v35 = vadd.f32 %v2114_v30, %v4085_v34  ;;  %v2163_v42 = vadd.f32 %v2155_v31, %v4086_v5 }
 0x5e1   :  { %v2116_v36 = vpop.f32.mrf.mxu0  ;;  %v2157_v37 = vpop.f32.mrf.mxu1 }
 0x5e2   :  { %3341 = vpow2.f32 %v3075_v32  ;;  %v3076_v38 = vmul.f32 -1.442695, %v2161_v35  ;;  %v3077_v12 = vmul.f32 -1.442695, %v2163_v42  ;;  %v4092_v37 = vld [vmem:[#allocation26_spill] sm:$0xff] }
 0x5e3   :  { %v2117_v40 = vpop.f32.mrf.mxu0  ;;  %v2158_v41 = vpop.f32.mrf.mxu1 }
 0x5e4   :  { %3343 = vpow2.f32 %v3076_v38 }
 0x5e5   :  { %3345 = vtanh.f32 %v2162_v52 }
 0x5e6   :  { %3347 = vpow2.f32 %v3077_v12 }
 0x5ef   :  { %v3342_v14 = vpop.eup %3341 }
 0x5f0   :  { %v2167_v13 = vadd.f32 1.0, %v3342_v14 }
 0x5f1   :  { %v3344_v17 = vpop.eup %3343 }
 0x5f2   :  { %3349 = vrcp.f32 %v2167_v13  ;;  %v2173_v18 = vadd.f32 1.0, %v3344_v17  ;;  %v3346_v19 = vpop.eup %3345 }
 0x5f3   :  { %v3348_v39 = vpop.eup %3347 }
 0x5f4   :  { %3351 = vrcp.f32 %v2173_v18  ;;  %v2180_v24 = vadd.f32 1.0, %v3348_v39  ;;  %v4093_v18 = vld [vmem:[#allocation27_spill] sm:$0xff] }
 0x5f6   :  { %3353 = vrcp.f32 %v2180_v24 }
 0x5ff   :  { %v3350_v21 = vpop.eup %3349 }
 0x600   :  { %v2185_v20 = vmul.f32 %v3350_v21, %v3346_v19 }
 0x601   :  { %v3352_v23 = vpop.eup %3351 }
 0x602   :  { %v2184_v25 = vmul.f32 %v3352_v23, %v3954_v22 }
 0x603   :  { %v3354_v27 = vpop.eup %3353 }
 0x604   :  { %v3996_v16 = vadd.f32 %v2185_v20, %v2184_v25 }
 0x606   :  { %3355 = vtanh.f32 %v3996_v16 }
 0x613   :  { %v3356_v28 = vpop.eup %3355 }
 0x614   :  { %v2188_v29 = vmul.f32 %v3356_v28, %v3354_v27 }
 0x616   :  { %v2199_v30 = vpack.c.bf16 %v2188_v29, %v2188_v29 }
 0x618   :  { %2425 = vmatmul.mubr.bf16.vlgmr.msra.gmra.mxu0 %v2199_v30  ;;  %2466 = vmatmul.mubr.bf16.vlgmr.msra.gmra.mxu1 %v2199_v30 }
 0x619   :  { %2707 = vmatpush1.bf16.msra.mxu0 %v3813_v59  ;;  %2748 = vmatpush1.bf16.msra.mxu1 %v3815_v26  ;;  %v4088_v26 = vld [vmem:[#allocation22_spill] sm:$0xff] }
 0x61a   :  { %2708 = vmatprep.subr.bf16.mxu0 %v3821_v3  ;;  %2749 = vmatprep.subr.bf16.mxu1 %v3823_v47 }
 0x61b   :  { %2738 = vmatprep.mubr.bf16.mxu0 %v4074_v46  ;;  %2779 = vmatprep.mubr.bf16.mxu1 %v4074_v46 }
 0x61d   :  { %2709 = vmatpush1.bf16.msra.mxu0 %v3825_v57  ;;  %2750 = vmatpush1.bf16.msra.mxu1 %v3827_v43 }
 0x61e   :  { %2710 = vmatprep.subr.bf16.mxu0 %v3833_v6  ;;  %2751 = vmatprep.subr.bf16.mxu1 %v3835_v45  ;;  %v4089_v6 = vld [vmem:[#allocation24_spill] sm:$0xff] }
 0x621   :  { %2711 = vmatpush1.bf16.msra.mxu0 %v3837_v8  ;;  %2752 = vmatpush1.bf16.msra.mxu1 %v3839_v10 }
 0x622   :  { %2712 = vmatprep.subr.bf16.mxu0 %v3845_v63  ;;  %2753 = vmatprep.subr.bf16.mxu1 %v3847_v58 }
 0x625   :  { %2713 = vmatpush1.bf16.msra.mxu0 %v3849_v44  ;;  %2754 = vmatpush1.bf16.msra.mxu1 %v3851_v60  ;;  %v4090_v60 = vld [vmem:[#allocation25_spill] sm:$0xff] }
 0x626   :  { %2714 = vmatprep.subr.bf16.mxu0 %v3855_v54  ;;  %2755 = vmatprep.subr.bf16.mxu1 %v3857_v0  ;;  %v4091_v0 = vld [vmem:[#allocation23_spill] sm:$0xff] }
 0x629   :  { %2715 = vmatpush1.bf16.msra.mxu0 %v3861_v56  ;;  %2756 = vmatpush1.bf16.msra.mxu1 %v3863_v1 }
 0x62a   :  { %2716 = vmatprep.subr.bf16.mxu0 %v3867_v50  ;;  %2757 = vmatprep.subr.bf16.mxu1 %v3869_v51 }
 0x62d   :  { %2717 = vmatpush1.bf16.msra.mxu0 %v3873_v48  ;;  %2758 = vmatpush1.bf16.msra.mxu1 %v3875_v49 }
 0x62e   :  { %2718 = vmatprep.subr.bf16.mxu0 %v3879_v2  ;;  %2759 = vmatprep.subr.bf16.mxu1 %v3881_v61 }
 0x631   :  { %2719 = vmatpush1.bf16.msra.mxu0 %v3885_v55  ;;  %2760 = vmatpush1.bf16.msra.mxu1 %v3887_v62 }
 0x632   :  { %2720 = vmatprep.subr.bf16.mxu0 %v3891_v53  ;;  %2761 = vmatprep.subr.bf16.mxu1 %v3893_v7 }
 0x635   :  { %2721 = vmatpush1.bf16.msra.mxu0 %v3897_v9  ;;  %2762 = vmatpush1.bf16.msra.mxu1 %v3899_v11 }
 0x6d8   :  { %v2426_v46 = vpop.f32.mrf.mxu0  ;;  %v2467_v59 = vpop.f32.mrf.mxu1 }
 0x6d9   :  { %v2474_v3 = vadd.f32 %v2426_v46, %v4088_v26  ;;  %v2476_v56 = vadd.f32 %v2467_v59, %v4091_v0  ;;  %v3148_v26 = vld [vmem:[%s4050_s4] ss:$0 sm:$0xff] }
 0x6da   :  { %v2428_v47 = vpop.f32.mrf.mxu0  ;;  %v2469_v57 = vpop.f32.mrf.mxu1 }
 0x6db   :  { %v3110_v43 = vmul.f32 -1.442695, %v2474_v3  ;;  %v2475_v45 = vadd.f32 %v2428_v47, %v4089_v6  ;;  %v2477_v54 = vadd.f32 %v2469_v57, %v4090_v60  ;;  %v3149_v57 = vld [vmem:[#allocation5] ss:$0 sm:$0xff] }
 0x6dc   :  { %v2430_v8 = vpop.f32.mrf.mxu0  ;;  %v2471_v10 = vpop.f32.mrf.mxu1 }
 0x6dd   :  { %3357 = vpow2.f32 %v3110_v43  ;;  %v3111_v63 = vmul.f32 -1.442695, %v2475_v45  ;;  %v3112_v1 = vmul.f32 -1.442695, %v2477_v54 }
 0x6de   :  { %v2431_v58 = vpop.f32.mrf.mxu0  ;;  %v2472_v44 = vpop.f32.mrf.mxu1 }
 0x6df   :  { %3359 = vpow2.f32 %v3111_v63 }
 0x6e0   :  { %3361 = vtanh.f32 %v2476_v56 }
 0x6e1   :  { %3363 = vpow2.f32 %v3112_v1 }
 0x6ea   :  { %v3358_v50 = vpop.eup %3357 }
 0x6eb   :  { %v2481_v51 = vadd.f32 1.0, %v3358_v50 }
 0x6ec   :  { %v3360_v48 = vpop.eup %3359 }
 0x6ed   :  { %3365 = vrcp.f32 %v2481_v51  ;;  %v2487_v49 = vadd.f32 1.0, %v3360_v48  ;;  %v3362_v2 = vpop.eup %3361 }
 0x6ee   :  { %v3364_v61 = vpop.eup %3363 }
 0x6ef   :  { %3367 = vrcp.f32 %v2487_v49  ;;  %v2494_v7 = vadd.f32 1.0, %v3364_v61 }
 0x6f1   :  { %3369 = vrcp.f32 %v2494_v7 }
 0x6fa   :  { %v3366_v55 = vpop.eup %3365 }
 0x6fb   :  { %v2499_v62 = vmul.f32 %v3366_v55, %v3362_v2 }
 0x6fc   :  { %v3368_v53 = vpop.eup %3367 }
 0x6fd   :  { %v2498_v9 = vmul.f32 %v3368_v53, %v3996_v16 }
 0x6fe   :  { %v3370_v22 = vpop.eup %3369 }
 0x6ff   :  { %v2500_v11 = vadd.f32 %v2499_v62, %v2498_v9 }
 0x701   :  { %3371 = vtanh.f32 %v2500_v11 }
 0x70e   :  { %v3372_v31 = vpop.eup %3371 }
 0x70f   :  { %v2502_v32 = vmul.f32 %v3372_v31, %v3370_v22 }
 0x711   :  { %v2513_v34 = vpack.c.bf16 %v2502_v32, %v2502_v32 }
 0x713   :  { %2739 = vmatmul.mubr.bf16.vlgmr.msra.gmra.mxu0 %v2513_v34  ;;  %2780 = vmatmul.mubr.bf16.vlgmr.msra.gmra.mxu1 %v2513_v34 }
 0x7d3   :  { %v2740_v35 = vpop.f32.mrf.mxu0  ;;  %v2781_v36 = vpop.f32.mrf.mxu1 }
 0x7d4   :  { %v2788_v38 = vadd.f32 %v2740_v35, %v4092_v37  ;;  %v2790_v19 = vadd.f32 %v2781_v36, %v4093_v18 }
 0x7d5   :  { %v2742_v40 = vpop.f32.mrf.mxu0  ;;  %v2783_v41 = vpop.f32.mrf.mxu1 }
 0x7d6   :  { %v3145_v5 = vmul.f32 -1.442695, %v2788_v38  ;;  %v2789_v42 = vadd.f32 %v2742_v40, %v3712_v4  ;;  %v2791_v17 = vadd.f32 %v2783_v41, %v3715_v15 }
 0x7d7   :  { %v2744_v33 = vpop.f32.mrf.mxu0  ;;  %v2785_v52 = vpop.f32.mrf.mxu1 }
 0x7d8   :  { %3373 = vpow2.f32 %v3145_v5  ;;  %v3146_v12 = vmul.f32 -1.442695, %v2789_v42  ;;  %v3147_v39 = vmul.f32 -1.442695, %v2791_v17 }
 0x7d9   :  { %v2745_v14 = vpop.f32.mrf.mxu0  ;;  %v2786_v13 = vpop.f32.mrf.mxu1 }
 0x7da   :  { %3375 = vpow2.f32 %v3146_v12 }
 0x7db   :  { %3377 = vtanh.f32 %v2790_v19 }
 0x7dc   :  { %3379 = vpow2.f32 %v3147_v39 }
 0x7e5   :  { %v3374_v21 = vpop.eup %3373 }
 0x7e6   :  { %v2795_v20 = vadd.f32 1.0, %v3374_v21 }
 0x7e7   :  { %v3376_v23 = vpop.eup %3375 }
 0x7e8   :  { %3381 = vrcp.f32 %v2795_v20  ;;  %v2801_v24 = vadd.f32 1.0, %v3376_v23  ;;  %v3378_v4 = vpop.eup %3377 }
 0x7e9   :  { %v3380_v25 = vpop.eup %3379 }
 0x7ea   :  { %3383 = vrcp.f32 %v2801_v24  ;;  %v2808_v29 = vadd.f32 1.0, %v3380_v25 }
 0x7ec   :  { %3385 = vrcp.f32 %v2808_v29 }
 0x7f5   :  { %v3382_v16 = vpop.eup %3381 }
 0x7f6   :  { %v2813_v27 = vmul.f32 %v3382_v16, %v3378_v4 }
 0x7f7   :  { %v3384_v28 = vpop.eup %3383 }
 0x7f8   :  { %v2812_v30 = vmul.f32 %v3384_v28, %v2500_v11 }
 0x7f9   :  { %v3386_v15 = vpop.eup %3385 }
 0x7fa   :  { %v2814_v46 = vadd.f32 %v2813_v27, %v2812_v30 }
 0x7fc   :  { %3387 = vtanh.f32 %v2814_v46 }
 0x809   :  { %v3388_v59 = vpop.eup %3387 }
 0x80a   :  { %v2816_v3 = vmul.f32 %v3388_v59, %v3386_v15 }
 0x80c   :  { %v2827_v47 = vmul.f32 %v3148_v26, %v2816_v3 }
 0x80e   :  { %2828 = vadd.xlane.f32.xlu0 %v2827_v47 }
 0x897   :  { %v2829_v43 = vpop.xlane.xlu0 %2828 }
 0x898   :  { %v2837_v6 = vadd.f32 %v3149_v57, %v2829_v43 }
 0x89a   :  { %2839 = vst.msk [vmem:[%s4052_s6] sm:$0xff] %vm2838_vm1, %v2837_v6 }
 0x89b   :  { %2844 = vsyncpa [#allocation7], 1 }

// kernel: tpu_custom_call.1
= control target key start
LH: loop header
LB: loop body
LE: loop exit
PB: predicated region body
PF: predicated region fallthrough
CT: control target
= control target key end

     0   :  { %s4046_s0 = inlined_call_operand.vmem [shape: bf16[64,16], index: 0, kind: input, shape index: {}]   ;;  %s4047_s1 = inlined_call_operand.vmem [shape: bf16[16,512], index: 1, kind: input, shape index: {}]   ;;  %s4048_s2 = inlined_call_operand.hbm [shape: bf16[128,512], index: 2, kind: input, shape index: {}]   ;;  %s4049_s3 = inlined_call_operand.vmem [shape: f32[1,512], index: 3, kind: input, shape index: {}]   ;;  %s4050_s4 = inlined_call_operand.vmem [shape: f32[1,128], index: 4, kind: input, shape index: {}]   ;;  %s4051_s5 = inlined_call_operand.<no memory space> [shape: f32[1,1], index: 5, kind: input, shape index: {}]   ;;  %s4052_s6 = inlined_call_operand.vmem [shape: f32[8,1], index: 6, kind: output, shape index: {}]  }
   0x1   :  { %v11_v0 = vstv %s4051_s5 }
   0x2   :  { %12 = vst [vmem:[#allocation5] sm:$0x1] %v11_v0 }
   0x3   :  { %13 = vsyncpa [#allocation7], 0  ;;  %s3411_s23 = smov [#allocation6]  }
   0x4   :  { %s23_s24 = sshll.u32 %s3411_s23, 4  ;;  %s24_s24 = int_to_ptr.vmem [resolvable:$true] %s23_s24 }
   0x5   :  { %s3397_s25 = scalar_lea.vmem %s24_s24, 4096  ;;  %p3402_p1 = scmp.lt.s32.totalorder %s24_s24, %s24_s24 }
   0x6   :  { %p3398_p0 = scmp.ne.s32.totalorder %s24_s24, %s3397_s25  ;;  %p3403_p2 = scmp.lt.s32.totalorder %s3397_s25, %s3397_s25 }
   0x8   :  { %p3404_p3 = por %p3403_p2, %p3402_p1 }
   0xa   :  { %p3405_p4 = pnand %p3404_p3, %p3398_p0 }
   0xc   :  { %3408 = shalt.err (!%p3405_p4)
}
   0xd   :  { %s3412_s26 = smov 256   ;;  %s3413_s27 = smov 16  }
   0xe   :  { %29 = dma.hbm_to_vmem [thread:$0]  %s4048_s2, 4096, %s24_s24, [#allocation7], %s3412_s26, %s3412_s26, %s3413_s27  }
   0xf   :  { %3409 = dma.done.wait [#allocation7], 4096  }
  0x10   :  { %3410 = vsyncadd [#allocation7], 4294963200  ;;  %v4053_v1 = vmov 0   ;;  %v3155_v2 = vld [vmem:[%s4047_s1 + $0x4] ss:$16 sps:$4 sm:$0xff]   ;;  %vm116_vm0 = vcmask 130048   ;;  %v56_v43 = vlaneseq }
  0x11   :  { %161 = vmatprep.mubr.bf16.mxu0 %v4053_v1  ;;  %234 = vmatprep.mubr.bf16.mxu1 %v4053_v1  ;;  %v3157_v3 = vld [vmem:[%s4047_s1 + $0xc] ss:$16 sps:$4 sm:$0xff]   ;;  %v3159_v4 = vld [vmem:[%s4047_s1] ss:$16 sps:$4 sm:$0xff]   ;;  %v3160_v5 = vld [vmem:[%s4047_s1 + $0x8] ss:$16 sps:$4 sm:$0xff]  }
  0x12   :  { %143 = vmatprep.subr.bf16.mxu0 %v3155_v2  ;;  %216 = vmatprep.subr.bf16.mxu1 %v3157_v3  ;;  %v3161_v6 = vld [vmem:[%s4046_s0] sm:$0xff]   ;;  %v3478_v9 = vld [vmem:[#allocation6 + $0xe8] ss:$16 sps:$4 sm:$0xff]   ;;  %v3187_v26 = vld [vmem:[%s4046_s0 + $0x10] sm:$0xff]   ;;  %v3415_v42 = vmov 0.0|0.0   ;;  %v57_v44 = vshrl.u32 %v56_v43, 7 }
  0x13   :  { %144 = vmatpush1.bf16.msra.mxu0 %v3159_v4  ;;  %217 = vmatpush1.bf16.msra.mxu1 %v3160_v5  ;;  %v3474_v7 = vld [vmem:[#allocation6 + $0xe0] ss:$16 sps:$4 sm:$0xff]   ;;  %v3476_v8 = vld [vmem:[#allocation6 + $0xe4] ss:$16 sps:$4 sm:$0xff]   ;;  %v3481_v10 = vld [vmem:[#allocation6 + $0xec] ss:$16 sps:$4 sm:$0xff]  }
  0x14   :  { %508 = vmatprep.subr.bf16.mxu0 %v3476_v8  ;;  %v3485_v11 = vld [vmem:[#allocation6 + $0xc4] ss:$16 sps:$4 sm:$0xff]   ;;  %549 = vmatprep.subr.bf16.mxu1 %v3481_v10  ;;  %v3489_v12 = vld [vmem:[#allocation6 + $0xc0] ss:$16 sps:$4 sm:$0xff]   ;;  %v3491_v13 = vld [vmem:[#allocation6 + $0xcc] ss:$16 sps:$4 sm:$0xff]  }
  0x15   :  { %v3495_v14 = vld [vmem:[#allocation6 + $0xc8] ss:$16 sps:$4 sm:$0xff]   ;;  %v3503_v16 = vld [vmem:[#allocation6 + $0xa4] ss:$16 sps:$4 sm:$0xff]   ;;  %v3506_v17 = vld [vmem:[#allocation6 + $0xa0] ss:$16 sps:$4 sm:$0xff]  }
  0x16   :  { %2860 = vmatmul.mubr.msk.bf16.vlgmr.msra.gmra.mxu0 %vm116_vm0, %v3161_v6  ;;  %2864 = vmatmul.mubr.msk.bf16.vlgmr.msra.gmra.mxu1 %vm116_vm0, %v3161_v6  ;;  %v3174_v15 = vld [vmem:[%s4046_s0 + $0x8] sm:$0xff]   ;;  %v3522_v22 = vld [vmem:[#allocation6 + $0x80] ss:$16 sps:$4 sm:$0xff]   ;;  %v3200_v33 = vld [vmem:[%s4046_s0 + $0x18] sm:$0xff]   ;;  %v66_v45 = vsub.s32 2, %v57_v44  ;;  %v58_v46 = vsub.s32 0, %v57_v44 }
  0x17   :  { %509 = vmatpush1.bf16.msra.mxu0 %v3474_v7  ;;  %550 = vmatpush1.bf16.msra.mxu1 %v3478_v9  ;;  %v3508_v18 = vld [vmem:[#allocation6 + $0xac] ss:$16 sps:$4 sm:$0xff]   ;;  %v3512_v19 = vld [vmem:[#allocation6 + $0xa8] ss:$16 sps:$4 sm:$0xff]   ;;  %v3514_v20 = vld [vmem:[#allocation6 + $0x84] ss:$16 sps:$4 sm:$0xff]  }
  0x18   :  { %510 = vmatprep.subr.bf16.mxu0 %v3485_v11  ;;  %551 = vmatprep.subr.bf16.mxu1 %v3491_v13  ;;  %v3519_v21 = vld [vmem:[#allocation6 + $0x8c] ss:$16 sps:$4 sm:$0xff]   ;;  %v3527_v23 = vld [vmem:[#allocation6 + $0x88] ss:$16 sps:$4 sm:$0xff]   ;;  %v3529_v24 = vld [vmem:[#allocation6 + $0x64] ss:$16 sps:$4 sm:$0xff]  }
  0x19   :  { %171 = vmatprep.mubr.bf16.mxu0 %v4053_v1  ;;  %244 = vmatprep.mubr.bf16.mxu1 %v4053_v1  ;;  %v3533_v25 = vld [vmem:[#allocation6 + $0x6c] ss:$16 sps:$4 sm:$0xff]   ;;  %v3539_v27 = vld [vmem:[#allocation6 + $0x60] ss:$16 sps:$4 sm:$0xff]   ;;  %v3543_v28 = vld [vmem:[#allocation6 + $0x68] ss:$16 sps:$4 sm:$0xff]  }
  0x1a   :  { %v3545_v29 = vld [vmem:[#allocation6 + $0x44] ss:$16 sps:$4 sm:$0xff]   ;;  %v3548_v30 = vld [vmem:[#allocation6 + $0x4c] ss:$16 sps:$4 sm:$0xff]   ;;  %v3552_v31 = vld [vmem:[#allocation6 + $0x40] ss:$16 sps:$4 sm:$0xff]  }
  0x1b   :  { %511 = vmatpush1.bf16.msra.mxu0 %v3489_v12  ;;  %552 = vmatpush1.bf16.msra.mxu1 %v3495_v14  ;;  %v3555_v32 = vld [vmem:[#allocation6 + $0x48] ss:$16 sps:$4 sm:$0xff]   ;;  %v3563_v34 = vld [vmem:[#allocation6 + $0x24] ss:$16 sps:$4 sm:$0xff]   ;;  %v3567_v35 = vld [vmem:[#allocation6 + $0x20] ss:$16 sps:$4 sm:$0xff]  }
  0x1c   :  { %512 = vmatprep.subr.bf16.mxu0 %v3503_v16  ;;  %553 = vmatprep.subr.bf16.mxu1 %v3508_v18  ;;  %v3569_v36 = vld [vmem:[#allocation6 + $0x2c] ss:$16 sps:$4 sm:$0xff]   ;;  %v3571_v37 = vld [vmem:[#allocation6 + $0x28] ss:$16 sps:$4 sm:$0xff]   ;;  %v3573_v38 = vld [vmem:[#allocation6 + $0x4] ss:$16 sps:$4 sm:$0xff]  }
  0x1d   :  { %v3576_v39 = vld [vmem:[#allocation6 + $0xc] ss:$16 sps:$4 sm:$0xff]   ;;  %v3581_v40 = vld [vmem:[#allocation6] ss:$16 sps:$4 sm:$0xff]   ;;  %v3585_v41 = vld [vmem:[#allocation6 + $0x8] ss:$16 sps:$4 sm:$0xff]  }
  0x1e   :  { %2861 = vmatmul.mubr.msk.bf16.gmra.mxu0 %vm116_vm0, %v3174_v15  ;;  %2865 = vmatmul.mubr.msk.bf16.gmra.mxu1 %vm116_vm0, %v3174_v15  ;;  %v70_v47 = vsub.s32 3, %v57_v44  ;;  %v54_v48 = vld [vmem:[%s4049_s3] sm:$0xf]  ;;  %v62_v52 = vsub.s32 1, %v57_v44  ;;  %vm2838_vm1 = vcmask 7168  }
  0x1f   :  { %513 = vmatpush1.bf16.msra.mxu0 %v3506_v17  ;;  %181 = vmatprep.mubr.bf16.mxu0 %v4053_v1  ;;  %v3638_v51 = vrot.slane %v54_v48, %v66_v45  ;;  %v59_v55 = vrot.slane %v54_v48, %v58_v46 }
  0x20   :  { %554 = vmatpush1.bf16.msra.mxu1 %v3512_v19  ;;  %514 = vmatprep.subr.bf16.mxu0 %v3514_v20  ;;  %v3644_v56 = vrot.slane %v54_v48, %v70_v47  ;;  %v63_v59 = vrot.slane %v54_v48, %v62_v52 }
  0x21   :  { %555 = vmatprep.subr.bf16.mxu1 %v3519_v21  ;;  %254 = vmatprep.mubr.bf16.mxu1 %v4053_v1 }
  0x23   :  { %515 = vmatpush1.bf16.msra.mxu0 %v3522_v22 }
  0x24   :  { %556 = vmatpush1.bf16.msra.mxu1 %v3527_v23  ;;  %516 = vmatprep.subr.bf16.mxu0 %v3529_v24 }
  0x25   :  { %557 = vmatprep.subr.bf16.mxu1 %v3533_v25 }
  0x26   :  { %2862 = vmatmul.mubr.msk.bf16.gmra.mxu0 %vm116_vm0, %v3187_v26  ;;  %2866 = vmatmul.mubr.msk.bf16.gmra.mxu1 %vm116_vm0, %v3187_v26 }
  0x27   :  { %517 = vmatpush1.bf16.msra.mxu0 %v3539_v27  ;;  %191 = vmatprep.mubr.bf16.mxu0 %v4053_v1 }
  0x28   :  { %558 = vmatpush1.bf16.msra.mxu1 %v3543_v28  ;;  %518 = vmatprep.subr.bf16.mxu0 %v3545_v29 }
  0x29   :  { %559 = vmatprep.subr.bf16.mxu1 %v3548_v30  ;;  %264 = vmatprep.mubr.bf16.mxu1 %v4053_v1 }
  0x2b   :  { %519 = vmatpush1.bf16.msra.mxu0 %v3552_v31 }
  0x2c   :  { %560 = vmatpush1.bf16.msra.mxu1 %v3555_v32  ;;  %520 = vmatprep.subr.bf16.mxu0 %v3563_v34 }
  0x2d   :  { %561 = vmatprep.subr.bf16.mxu1 %v3569_v36 }
  0x2e   :  { %2863 = vmatmul.mubr.msk.bf16.gmra.mxu0 %vm116_vm0, %v3200_v33  ;;  %2867 = vmatmul.mubr.msk.bf16.gmra.mxu1 %vm116_vm0, %v3200_v33 }
  0x2f   :  { %521 = vmatpush1.bf16.msra.mxu0 %v3567_v35  ;;  %540 = vmatprep.mubr.bf16.mxu0 %v4053_v1 }
  0x30   :  { %562 = vmatpush1.bf16.msra.mxu1 %v3571_v37  ;;  %522 = vmatprep.subr.bf16.mxu0 %v3573_v38 }
  0x31   :  { %563 = vmatprep.subr.bf16.mxu1 %v3576_v39  ;;  %581 = vmatprep.mubr.bf16.mxu1 %v4053_v1 }
  0x33   :  { %523 = vmatpush1.bf16.msra.mxu0 %v3581_v40 }
  0x34   :  { %564 = vmatpush1.bf16.msra.mxu1 %v3585_v41  ;;  %822 = vmatprep.subr.bf16.mxu0 %v3476_v8 }
  0x35   :  { %863 = vmatprep.subr.bf16.mxu1 %v3481_v10 }
  0x36   :  { %541 = vmatmul.mubr.bf16.vlgmr.msra.gmra.mxu0 %v3415_v42 }
  0x37   :  { %582 = vmatmul.mubr.bf16.vlgmr.msra.gmra.mxu1 %v3415_v42  ;;  %823 = vmatpush1.bf16.msra.mxu0 %v3474_v7 }
  0x38   :  { %864 = vmatpush1.bf16.msra.mxu1 %v3478_v9  ;;  %824 = vmatprep.subr.bf16.mxu0 %v3485_v11 }
  0x39   :  { %865 = vmatprep.subr.bf16.mxu1 %v3491_v13  ;;  %854 = vmatprep.mubr.bf16.mxu0 %v4053_v1 }
  0x3a   :  { %895 = vmatprep.mubr.bf16.mxu1 %v4053_v1 }
  0x3b   :  { %825 = vmatpush1.bf16.msra.mxu0 %v3489_v12 }
  0x3c   :  { %866 = vmatpush1.bf16.msra.mxu1 %v3495_v14  ;;  %826 = vmatprep.subr.bf16.mxu0 %v3503_v16 }
  0x3d   :  { %867 = vmatprep.subr.bf16.mxu1 %v3508_v18 }
  0x3f   :  { %827 = vmatpush1.bf16.msra.mxu0 %v3506_v17 }
  0x40   :  { %868 = vmatpush1.bf16.msra.mxu1 %v3512_v19  ;;  %828 = vmatprep.subr.bf16.mxu0 %v3514_v20 }
  0x41   :  { %869 = vmatprep.subr.bf16.mxu1 %v3519_v21 }
  0x43   :  { %829 = vmatpush1.bf16.msra.mxu0 %v3522_v22 }
  0x44   :  { %870 = vmatpush1.bf16.msra.mxu1 %v3527_v23  ;;  %830 = vmatprep.subr.bf16.mxu0 %v3529_v24 }
  0x45   :  { %871 = vmatprep.subr.bf16.mxu1 %v3533_v25 }
  0x47   :  { %831 = vmatpush1.bf16.msra.mxu0 %v3539_v27 }
  0x48   :  { %872 = vmatpush1.bf16.msra.mxu1 %v3543_v28  ;;  %832 = vmatprep.subr.bf16.mxu0 %v3545_v29 }
  0x49   :  { %873 = vmatprep.subr.bf16.mxu1 %v3548_v30 }
  0x4b   :  { %833 = vmatpush1.bf16.msra.mxu0 %v3552_v31 }
  0x4c   :  { %874 = vmatpush1.bf16.msra.mxu1 %v3555_v32  ;;  %834 = vmatprep.subr.bf16.mxu0 %v3563_v34 }
  0x4d   :  { %875 = vmatprep.subr.bf16.mxu1 %v3569_v36 }
  0x4f   :  { %835 = vmatpush1.bf16.msra.mxu0 %v3567_v35 }
  0x50   :  { %876 = vmatpush1.bf16.msra.mxu1 %v3571_v37  ;;  %836 = vmatprep.subr.bf16.mxu0 %v3573_v38 }
  0x51   :  { %877 = vmatprep.subr.bf16.mxu1 %v3576_v39 }
  0x53   :  { %837 = vmatpush1.bf16.msra.mxu0 %v3581_v40 }
  0x54   :  { %878 = vmatpush1.bf16.msra.mxu1 %v3585_v41  ;;  %1136 = vmatprep.subr.bf16.mxu0 %v3476_v8 }
  0x55   :  { %1177 = vmatprep.subr.bf16.mxu1 %v3481_v10 }
  0xd6   :  { %v3634_v49 = vpop.f32.mrf.mxu0  ;;  %v3636_v50 = vpop.f32.mrf.mxu1 }
  0xd8   :  { %v3640_v53 = vpop.f32.mrf.mxu0  ;;  %v3642_v54 = vpop.f32.mrf.mxu1 }
  0xda   :  { %v167_v57 = vpop.f32.mrf.mxu0  ;;  %v240_v58 = vpop.f32.mrf.mxu1 }
  0xdb   :  { %v3646_v60 = vadd.f32 %v167_v57, %v59_v55  ;;  %v3649_v61 = vadd.f32 %v240_v58, %v3638_v51 }
  0xdc   :  { %v169_v62 = vpop.f32.mrf.mxu0  ;;  %v242_v63 = vpop.f32.mrf.mxu1 }
  0xdd   :  { %v3651_v0 = vadd.f32 %v169_v62, %v63_v59  ;;  %v3654_v2 = vadd.f32 %v242_v63, %v3644_v56 }
  0xde   :  { %v173_v3 = vpop.f32.mrf.mxu0  ;;  %v246_v4 = vpop.f32.mrf.mxu1 }
  0xdf   :  { %v3656_v5 = vadd.f32 %v173_v3, %v59_v55  ;;  %v3659_v6 = vadd.f32 %v246_v4, %v3638_v51 }
  0xe0   :  { %v175_v15 = vpop.f32.mrf.mxu0  ;;  %v248_v26 = vpop.f32.mrf.mxu1 }
  0xe1   :  { %4055 = vst [vmem:[#allocation9_spill] sm:$0xff] %v3659_v6  ;;  %v3661_v33 = vadd.f32 %v175_v15, %v63_v59  ;;  %v3664_v42 = vadd.f32 %v248_v26, %v3644_v56 }
  0xe2   :  { %v177_v43 = vpop.f32.mrf.mxu0  ;;  %v250_v44 = vpop.f32.mrf.mxu1 }
  0xe3   :  { %v3666_v45 = vadd.f32 %v177_v43, %v59_v55  ;;  %v3669_v46 = vadd.f32 %v250_v44, %v3638_v51 }
  0xe4   :  { %v179_v47 = vpop.f32.mrf.mxu0  ;;  %v252_v48 = vpop.f32.mrf.mxu1 }
  0xe5   :  { %4056 = vst [vmem:[#allocation10_spill] sm:$0xff] %v3666_v45  ;;  %4057 = vst [vmem:[#allocation11_spill] sm:$0xff] %v3669_v46  ;;  %v3671_v52 = vadd.f32 %v179_v47, %v63_v59  ;;  %v3674_v57 = vadd.f32 %v252_v48, %v3644_v56 }
  0xe6   :  { %v183_v58 = vpop.f32.mrf.mxu0  ;;  %v256_v62 = vpop.f32.mrf.mxu1 }
  0xe7   :  { %4058 = vst [vmem:[#allocation12_spill] sm:$0xff] %v3671_v52  ;;  %4059 = vst [vmem:[#allocation13_spill] sm:$0xff] %v3674_v57  ;;  %v3676_v63 = vadd.f32 %v183_v58, %v59_v55  ;;  %v3679_v3 = vadd.f32 %v256_v62, %v3638_v51 }
  0xe8   :  { %v185_v4 = vpop.f32.mrf.mxu0  ;;  %v258_v15 = vpop.f32.mrf.mxu1 }
  0xe9   :  { %4060 = vst [vmem:[#allocation14_spill] sm:$0xff] %v3676_v63  ;;  %4061 = vst [vmem:[#allocation15_spill] sm:$0xff] %v3679_v3  ;;  %v3681_v26 = vadd.f32 %v185_v4, %v63_v59  ;;  %v3684_v43 = vadd.f32 %v258_v15, %v3644_v56 }
  0xea   :  { %v187_v44 = vpop.f32.mrf.mxu0  ;;  %v260_v47 = vpop.f32.mrf.mxu1 }
  0xeb   :  { %4062 = vst [vmem:[#allocation16_spill] sm:$0xff] %v3681_v26  ;;  %4063 = vst [vmem:[#allocation17_spill] sm:$0xff] %v3684_v43  ;;  %v3686_v1 = vadd.f32 %v187_v44, %v59_v55  ;;  %v3689_v48 = vadd.f32 %v260_v47, %v3638_v51 }
  0xec   :  { %v189_v46 = vpop.f32.mrf.mxu0  ;;  %v262_v58 = vpop.f32.mrf.mxu1 }
  0xed   :  { %4064 = vst [vmem:[#allocation18_spill] sm:$0xff] %v3686_v1  ;;  %4065 = vst [vmem:[#allocation19_spill] sm:$0xff] %v3689_v48  ;;  %v3691_v63 = vadd.f32 %v189_v46, %v63_v59  ;;  %v3694_v62 = vadd.f32 %v262_v58, %v3644_v56 }
  0xee   :  { %v193_v3 = vpop.f32.mrf.mxu0  ;;  %v266_v4 = vpop.f32.mrf.mxu1 }
  0xef   :  { %4066 = vst [vmem:[#allocation20_spill] sm:$0xff] %v3691_v63  ;;  %4067 = vst [vmem:[#allocation21_spill] sm:$0xff] %v3694_v62  ;;  %v3696_v26 = vadd.f32 %v193_v3, %v59_v55  ;;  %v3699_v15 = vadd.f32 %v266_v4, %v3638_v51 }
  0xf0   :  { %v195_v43 = vpop.f32.mrf.mxu0  ;;  %v268_v44 = vpop.f32.mrf.mxu1 }
  0xf1   :  { %4068 = vst [vmem:[#allocation22_spill] sm:$0xff] %v3696_v26  ;;  %4069 = vst [vmem:[#allocation23_spill] sm:$0xff] %v3699_v15  ;;  %v3701_v1 = vadd.f32 %v195_v43, %v63_v59  ;;  %v3704_v47 = vadd.f32 %v268_v44, %v3644_v56  ;;  %v164_v26 = vadd.f32 %v3634_v49, %v59_v55 }
  0xf2   :  { %v197_v48 = vpop.f32.mrf.mxu0  ;;  %v270_v46 = vpop.f32.mrf.mxu1  ;;  %v166_v44 = vadd.f32 %v3640_v53, %v63_v59  ;;  %v237_v53 = vadd.f32 %v3636_v50, %v3638_v51 }
  0xf3   :  { %4070 = vst [vmem:[#allocation24_spill] sm:$0xff] %v3701_v1  ;;  %4071 = vst [vmem:[#allocation25_spill] sm:$0xff] %v3704_v47  ;;  %v3706_v63 = vadd.f32 %v197_v48, %v59_v55  ;;  %v3709_v58 = vadd.f32 %v270_v46, %v3638_v51  ;;  %v239_v55 = vadd.f32 %v3642_v54, %v3644_v56 }
  0xf4   :  { %v199_v62 = vpop.f32.mrf.mxu0  ;;  %v272_v3 = vpop.f32.mrf.mxu1 }
  0xf5   :  { %4072 = vst [vmem:[#allocation26_spill] sm:$0xff] %v3706_v63  ;;  %4073 = vst [vmem:[#allocation27_spill] sm:$0xff] %v3709_v58  ;;  %v3712_v4 = vadd.f32 %v199_v62, %v63_v59  ;;  %v3715_v15 = vadd.f32 %v272_v3, %v3644_v56 }
  0xf6   :  { %v542_v43 = vpop.f32.mrf.mxu0 }
  0xf7   :  { %v590_v47 = vadd.f32 %v542_v43, %v164_v26  ;;  %v583_v1 = vpop.f32.mrf.mxu1 }
  0xf8   :  { %v544_v57 = vpop.f32.mrf.mxu0  ;;  %v592_v3 = vadd.f32 %v583_v1, %v237_v53 }
  0xf9   :  { %v2900_v48 = vmul.f32 -1.442695, %v590_v47  ;;  %v591_v63 = vadd.f32 %v544_v57, %v166_v44  ;;  %v585_v52 = vpop.f32.mrf.mxu1 }
  0xfa   :  { %v546_v46 = vpop.f32.mrf.mxu0  ;;  %v593_v62 = vadd.f32 %v585_v52, %v239_v55 }
  0xfb   :  { %3261 = vpow2.f32 %v2900_v48  ;;  %v2901_v58 = vmul.f32 -1.442695, %v591_v63  ;;  %v587_v45 = vpop.f32.mrf.mxu1  ;;  %v4074_v46 = vmov 0  }
  0xfc   :  { %v547_v6 = vpop.f32.mrf.mxu0  ;;  %v2902_v59 = vmul.f32 -1.442695, %v593_v62 }
  0xfd   :  { %3263 = vpow2.f32 %v2901_v58  ;;  %v588_v49 = vpop.f32.mrf.mxu1 }
  0xfe   :  { %3265 = vpow2.f32 %v2902_v59 }
 0x108   :  { %v3262_v26 = vpop.eup %3261 }
 0x109   :  { %v597_v47 = vadd.f32 1.0, %v3262_v26 }
 0x10a   :  { %v3264_v57 = vpop.eup %3263 }
 0x10b   :  { %3267 = vrcp.f32 %v597_v47  ;;  %v603_v43 = vadd.f32 1.0, %v3264_v57  ;;  %v3266_v6 = vpop.eup %3265 }
 0x10c   :  { %3269 = vtanh.f32 %v592_v3  ;;  %v610_v44 = vadd.f32 1.0, %v3266_v6 }
 0x10d   :  { %3271 = vrcp.f32 %v603_v43 }
 0x10e   :  { %3273 = vrcp.f32 %v610_v44 }
 0x118   :  { %v3268_v45 = vpop.eup %3267 }
 0x119   :  { %v3270_v63 = vpop.eup %3269 }
 0x11a   :  { %v3272_v58 = vpop.eup %3271  ;;  %v615_v56 = vmul.f32 %v3270_v63, %v3268_v45 }
 0x11b   :  { %v614_v54 = vmul.f32 0.0, %v3272_v58  ;;  %v3274_v1 = vpop.eup %3273 }
 0x11d   :  { %v3722_v52 = vadd.f32 %v615_v56, %v614_v54 }
 0x11f   :  { %3275 = vtanh.f32 %v3722_v52 }
 0x12c   :  { %v3276_v50 = vpop.eup %3275 }
 0x12d   :  { %v618_v51 = vmul.f32 %v3276_v50, %v3274_v1 }
 0x12f   :  { %v629_v48 = vpack.c.bf16 %v618_v51, %v618_v51 }
 0x131   :  { %855 = vmatmul.mubr.bf16.vlgmr.msra.gmra.mxu0 %v629_v48  ;;  %896 = vmatmul.mubr.bf16.vlgmr.msra.gmra.mxu1 %v629_v48 }
 0x132   :  { %1137 = vmatpush1.bf16.msra.mxu0 %v3474_v7  ;;  %1178 = vmatpush1.bf16.msra.mxu1 %v3478_v9 }
 0x133   :  { %1138 = vmatprep.subr.bf16.mxu0 %v3485_v11  ;;  %1179 = vmatprep.subr.bf16.mxu1 %v3491_v13 }
 0x134   :  { %1168 = vmatprep.mubr.bf16.mxu0 %v4074_v46  ;;  %1209 = vmatprep.mubr.bf16.mxu1 %v4074_v46 }
 0x136   :  { %1139 = vmatpush1.bf16.msra.mxu0 %v3489_v12  ;;  %1180 = vmatpush1.bf16.msra.mxu1 %v3495_v14 }
 0x137   :  { %1140 = vmatprep.subr.bf16.mxu0 %v3503_v16  ;;  %1181 = vmatprep.subr.bf16.mxu1 %v3508_v18 }
 0x13a   :  { %1141 = vmatpush1.bf16.msra.mxu0 %v3506_v17  ;;  %1182 = vmatpush1.bf16.msra.mxu1 %v3512_v19 }
 0x13b   :  { %1142 = vmatprep.subr.bf16.mxu0 %v3514_v20  ;;  %1183 = vmatprep.subr.bf16.mxu1 %v3519_v21 }
 0x13e   :  { %1143 = vmatpush1.bf16.msra.mxu0 %v3522_v22  ;;  %1184 = vmatpush1.bf16.msra.mxu1 %v3527_v23 }
 0x13f   :  { %1144 = vmatprep.subr.bf16.mxu0 %v3529_v24  ;;  %1185 = vmatprep.subr.bf16.mxu1 %v3533_v25 }
 0x142   :  { %1145 = vmatpush1.bf16.msra.mxu0 %v3539_v27  ;;  %1186 = vmatpush1.bf16.msra.mxu1 %v3543_v28 }
 0x143   :  { %1146 = vmatprep.subr.bf16.mxu0 %v3545_v29  ;;  %1187 = vmatprep.subr.bf16.mxu1 %v3548_v30 }
 0x146   :  { %1147 = vmatpush1.bf16.msra.mxu0 %v3552_v31  ;;  %1188 = vmatpush1.bf16.msra.mxu1 %v3555_v32 }
 0x147   :  { %1148 = vmatprep.subr.bf16.mxu0 %v3563_v34  ;;  %1189 = vmatprep.subr.bf16.mxu1 %v3569_v36 }
 0x14a   :  { %1149 = vmatpush1.bf16.msra.mxu0 %v3567_v35  ;;  %1190 = vmatpush1.bf16.msra.mxu1 %v3571_v37 }
 0x14b   :  { %1150 = vmatprep.subr.bf16.mxu0 %v3573_v38  ;;  %1191 = vmatprep.subr.bf16.mxu1 %v3576_v39 }
 0x14e   :  { %1151 = vmatpush1.bf16.msra.mxu0 %v3581_v40  ;;  %1192 = vmatpush1.bf16.msra.mxu1 %v3585_v41 }
 0x14f   :  { %1450 = vmatprep.subr.bf16.mxu0 %v3476_v8  ;;  %1491 = vmatprep.subr.bf16.mxu1 %v3481_v10 }
 0x1f1   :  { %v856_v49 = vpop.f32.mrf.mxu0  ;;  %v897_v55 = vpop.f32.mrf.mxu1 }
 0x1f2   :  { %v904_v62 = vadd.f32 %v856_v49, %v3646_v60  ;;  %v906_v10 = vadd.f32 %v897_v55, %v3649_v61 }
 0x1f3   :  { %v858_v53 = vpop.f32.mrf.mxu0  ;;  %v899_v59 = vpop.f32.mrf.mxu1 }
 0x1f4   :  { %v2935_v26 = vmul.f32 -1.442695, %v904_v62  ;;  %v905_v3 = vadd.f32 %v858_v53, %v3651_v0  ;;  %v907_v8 = vadd.f32 %v899_v59, %v3654_v2  ;;  %v3813_v59 = vld [vmem:[#allocation6 + $0xe0] ss:$16 sps:$4 sm:$0xff]  }
 0x1f5   :  { %v860_v47 = vpop.f32.mrf.mxu0  ;;  %v901_v57 = vpop.f32.mrf.mxu1 }
 0x1f6   :  { %3277 = vpow2.f32 %v2935_v26  ;;  %v2936_v43 = vmul.f32 -1.442695, %v905_v3  ;;  %v2937_v63 = vmul.f32 -1.442695, %v907_v8  ;;  %v3815_v26 = vld [vmem:[#allocation6 + $0xe8] ss:$16 sps:$4 sm:$0xff]  }
 0x1f7   :  { %v861_v6 = vpop.f32.mrf.mxu0  ;;  %v902_v45 = vpop.f32.mrf.mxu1  ;;  %v3821_v3 = vld [vmem:[#allocation6 + $0xc4] ss:$16 sps:$4 sm:$0xff]   ;;  %v3823_v47 = vld [vmem:[#allocation6 + $0xcc] ss:$16 sps:$4 sm:$0xff]   ;;  %v3825_v57 = vld [vmem:[#allocation6 + $0xc0] ss:$16 sps:$4 sm:$0xff]  }
 0x1f8   :  { %3279 = vpow2.f32 %v2936_v43  ;;  %v3827_v43 = vld [vmem:[#allocation6 + $0xc8] ss:$16 sps:$4 sm:$0xff]   ;;  %v3833_v6 = vld [vmem:[#allocation6 + $0xa4] ss:$16 sps:$4 sm:$0xff]   ;;  %v3835_v45 = vld [vmem:[#allocation6 + $0xac] ss:$16 sps:$4 sm:$0xff]  }
 0x1f9   :  { %3281 = vtanh.f32 %v906_v10  ;;  %v3837_v8 = vld [vmem:[#allocation6 + $0xa0] ss:$16 sps:$4 sm:$0xff]   ;;  %v3839_v10 = vld [vmem:[#allocation6 + $0xa8] ss:$16 sps:$4 sm:$0xff]  }
 0x1fa   :  { %3283 = vpow2.f32 %v2937_v63  ;;  %v3845_v63 = vld [vmem:[#allocation6 + $0x84] ss:$16 sps:$4 sm:$0xff]  }
 0x203   :  { %v3278_v58 = vpop.eup %3277 }
 0x204   :  { %v911_v44 = vadd.f32 1.0, %v3278_v58  ;;  %v3847_v58 = vld [vmem:[#allocation6 + $0x8c] ss:$16 sps:$4 sm:$0xff]  }
 0x205   :  { %v3280_v60 = vpop.eup %3279 }
 0x206   :  { %3285 = vrcp.f32 %v911_v44  ;;  %v917_v54 = vadd.f32 1.0, %v3280_v60  ;;  %v3282_v0 = vpop.eup %3281  ;;  %v3849_v44 = vld [vmem:[#allocation6 + $0x80] ss:$16 sps:$4 sm:$0xff]   ;;  %v3851_v60 = vld [vmem:[#allocation6 + $0x88] ss:$16 sps:$4 sm:$0xff]  }
 0x207   :  { %v3284_v56 = vpop.eup %3283 }
 0x208   :  { %3287 = vrcp.f32 %v917_v54  ;;  %v924_v48 = vadd.f32 1.0, %v3284_v56  ;;  %v3855_v54 = vld [vmem:[#allocation6 + $0x64] ss:$16 sps:$4 sm:$0xff]   ;;  %v3861_v56 = vld [vmem:[#allocation6 + $0x60] ss:$16 sps:$4 sm:$0xff]  }
 0x20a   :  { %3289 = vrcp.f32 %v924_v48  ;;  %v3873_v48 = vld [vmem:[#allocation6 + $0x40] ss:$16 sps:$4 sm:$0xff]  }
 0x213   :  { %v3286_v1 = vpop.eup %3285 }
 0x214   :  { %v929_v50 = vmul.f32 %v3286_v1, %v3282_v0  ;;  %v3857_v0 = vld [vmem:[#allocation6 + $0x6c] ss:$16 sps:$4 sm:$0xff]   ;;  %v3863_v1 = vld [vmem:[#allocation6 + $0x68] ss:$16 sps:$4 sm:$0xff]  }
 0x215   :  { %v3288_v51 = vpop.eup %3287 }
 0x216   :  { %v928_v49 = vmul.f32 %v3288_v51, %v3722_v52  ;;  %v3811_v52 = vld [vmem:[#allocation6 + $0xec] ss:$16 sps:$4 sm:$0xff]  }
 0x217   :  { %v3290_v61 = vpop.eup %3289  ;;  %v3869_v51 = vld [vmem:[#allocation6 + $0x4c] ss:$16 sps:$4 sm:$0xff]  }
 0x218   :  { %v3764_v2 = vadd.f32 %v929_v50, %v928_v49  ;;  %v3867_v50 = vld [vmem:[#allocation6 + $0x44] ss:$16 sps:$4 sm:$0xff]   ;;  %v3875_v49 = vld [vmem:[#allocation6 + $0x48] ss:$16 sps:$4 sm:$0xff]  }
 0x21a   :  { %3291 = vtanh.f32 %v3764_v2 }
 0x227   :  { %v3292_v55 = vpop.eup %3291 }
 0x228   :  { %v932_v62 = vmul.f32 %v3292_v55, %v3290_v61  ;;  %v3881_v61 = vld [vmem:[#allocation6 + $0x2c] ss:$16 sps:$4 sm:$0xff]   ;;  %v3885_v55 = vld [vmem:[#allocation6 + $0x20] ss:$16 sps:$4 sm:$0xff]  }
 0x22a   :  { %v943_v53 = vpack.c.bf16 %v932_v62, %v932_v62  ;;  %v3887_v62 = vld [vmem:[#allocation6 + $0x28] ss:$16 sps:$4 sm:$0xff]  }
 0x22c   :  { %1169 = vmatmul.mubr.bf16.vlgmr.msra.gmra.mxu0 %v943_v53  ;;  %1210 = vmatmul.mubr.bf16.vlgmr.msra.gmra.mxu1 %v943_v53  ;;  %v3891_v53 = vld [vmem:[#allocation6 + $0x4] ss:$16 sps:$4 sm:$0xff]  }
 0x22d   :  { %1451 = vmatpush1.bf16.msra.mxu0 %v3474_v7  ;;  %1492 = vmatpush1.bf16.msra.mxu1 %v3478_v9 }
 0x22e   :  { %1452 = vmatprep.subr.bf16.mxu0 %v3485_v11  ;;  %1493 = vmatprep.subr.bf16.mxu1 %v3491_v13 }
 0x22f   :  { %1482 = vmatprep.mubr.bf16.mxu0 %v4074_v46  ;;  %1523 = vmatprep.mubr.bf16.mxu1 %v4074_v46 }
 0x231   :  { %1453 = vmatpush1.bf16.msra.mxu0 %v3489_v12  ;;  %1494 = vmatpush1.bf16.msra.mxu1 %v3495_v14 }
 0x232   :  { %1454 = vmatprep.subr.bf16.mxu0 %v3503_v16  ;;  %1495 = vmatprep.subr.bf16.mxu1 %v3508_v18 }
 0x235   :  { %1455 = vmatpush1.bf16.msra.mxu0 %v3506_v17  ;;  %1496 = vmatpush1.bf16.msra.mxu1 %v3512_v19 }
 0x236   :  { %1456 = vmatprep.subr.bf16.mxu0 %v3514_v20  ;;  %1497 = vmatprep.subr.bf16.mxu1 %v3519_v21 }
 0x239   :  { %1457 = vmatpush1.bf16.msra.mxu0 %v3522_v22  ;;  %1498 = vmatpush1.bf16.msra.mxu1 %v3527_v23  ;;  %v4075_v23 = vld [vmem:[#allocation9_spill] sm:$0xff] }
 0x23a   :  { %1458 = vmatprep.subr.bf16.mxu0 %v3529_v24  ;;  %1499 = vmatprep.subr.bf16.mxu1 %v3533_v25 }
 0x23d   :  { %1459 = vmatpush1.bf16.msra.mxu0 %v3539_v27  ;;  %1500 = vmatpush1.bf16.msra.mxu1 %v3543_v28 }
 0x23e   :  { %1460 = vmatprep.subr.bf16.mxu0 %v3545_v29  ;;  %1501 = vmatprep.subr.bf16.mxu1 %v3548_v30 }
 0x241   :  { %1461 = vmatpush1.bf16.msra.mxu0 %v3552_v31  ;;  %1502 = vmatpush1.bf16.msra.mxu1 %v3555_v32 }
 0x242   :  { %1462 = vmatprep.subr.bf16.mxu0 %v3563_v34  ;;  %1503 = vmatprep.subr.bf16.mxu1 %v3569_v36 }
 0x245   :  { %1463 = vmatpush1.bf16.msra.mxu0 %v3567_v35  ;;  %1504 = vmatpush1.bf16.msra.mxu1 %v3571_v37 }
 0x246   :  { %1464 = vmatprep.subr.bf16.mxu0 %v3573_v38  ;;  %1505 = vmatprep.subr.bf16.mxu1 %v3576_v39 }
 0x249   :  { %1465 = vmatpush1.bf16.msra.mxu0 %v3581_v40  ;;  %1506 = vmatpush1.bf16.msra.mxu1 %v3585_v41 }
 0x24a   :  { %1805 = vmatprep.subr.bf16.mxu1 %v3811_v52 }
 0x2ec   :  { %v1170_v7 = vpop.f32.mrf.mxu0  ;;  %v1211_v9 = vpop.f32.mrf.mxu1 }
 0x2ed   :  { %v1218_v11 = vadd.f32 %v1170_v7, %v3656_v5  ;;  %v1220_v24 = vadd.f32 %v1211_v9, %v4075_v23  ;;  %v3893_v7 = vld [vmem:[#allocation6 + $0xc] ss:$16 sps:$4 sm:$0xff]   ;;  %v3897_v9 = vld [vmem:[#allocation6] ss:$16 sps:$4 sm:$0xff]  }
 0x2ee   :  { %v1172_v12 = vpop.f32.mrf.mxu0  ;;  %v1213_v13 = vpop.f32.mrf.mxu1 }
 0x2ef   :  { %v2970_v14 = vmul.f32 -1.442695, %v1218_v11  ;;  %v1219_v16 = vadd.f32 %v1172_v12, %v3661_v33  ;;  %v1221_v22 = vadd.f32 %v1213_v13, %v3664_v42  ;;  %v3809_v42 = vld [vmem:[#allocation6 + $0xe4] ss:$16 sps:$4 sm:$0xff]   ;;  %v3899_v11 = vld [vmem:[#allocation6 + $0x8] ss:$16 sps:$4 sm:$0xff]  }
 0x2f0   :  { %v1174_v17 = vpop.f32.mrf.mxu0  ;;  %v1215_v18 = vpop.f32.mrf.mxu1  ;;  %1764 = vmatprep.subr.bf16.mxu0 %v3809_v42 }
 0x2f1   :  { %3293 = vpow2.f32 %v2970_v14  ;;  %v2971_v19 = vmul.f32 -1.442695, %v1219_v16  ;;  %v2972_v25 = vmul.f32 -1.442695, %v1221_v22  ;;  %v4076_v14 = vld [vmem:[#allocation10_spill] sm:$0xff] }
 0x2f2   :  { %v1175_v20 = vpop.f32.mrf.mxu0  ;;  %v1216_v21 = vpop.f32.mrf.mxu1 }
 0x2f3   :  { %3295 = vpow2.f32 %v2971_v19  ;;  %v4077_v20 = vld [vmem:[#allocation12_spill] sm:$0xff] }
 0x2f4   :  { %3297 = vtanh.f32 %v1220_v24 }
 0x2f5   :  { %3299 = vpow2.f32 %v2972_v25 }
 0x2fe   :  { %v3294_v27 = vpop.eup %3293 }
 0x2ff   :  { %v1225_v28 = vadd.f32 1.0, %v3294_v27 }
 0x300   :  { %v3296_v29 = vpop.eup %3295 }
 0x301   :  { %3301 = vrcp.f32 %v1225_v28  ;;  %v1231_v30 = vadd.f32 1.0, %v3296_v29  ;;  %v3298_v31 = vpop.eup %3297  ;;  %v4078_v28 = vld [vmem:[#allocation13_spill] sm:$0xff] }
 0x302   :  { %v3300_v32 = vpop.eup %3299 }
 0x303   :  { %3303 = vrcp.f32 %v1231_v30  ;;  %v1238_v37 = vadd.f32 1.0, %v3300_v32  ;;  %v4079_v30 = vld [vmem:[#allocation11_spill] sm:$0xff] }
 0x305   :  { %3305 = vrcp.f32 %v1238_v37 }
 0x30e   :  { %v3302_v34 = vpop.eup %3301 }
 0x30f   :  { %v1243_v35 = vmul.f32 %v3302_v34, %v3298_v31 }
 0x310   :  { %v3304_v36 = vpop.eup %3303 }
 0x311   :  { %v1242_v38 = vmul.f32 %v3304_v36, %v3764_v2  ;;  %v3879_v2 = vld [vmem:[#allocation6 + $0x24] ss:$16 sps:$4 sm:$0xff]  }
 0x312   :  { %v3306_v40 = vpop.eup %3305 }
 0x313   :  { %v3804_v39 = vadd.f32 %v1243_v35, %v1242_v38 }
 0x315   :  { %3307 = vtanh.f32 %v3804_v39 }
 0x322   :  { %v3308_v41 = vpop.eup %3307 }
 0x323   :  { %v1246_v5 = vmul.f32 %v3308_v41, %v3306_v40 }
 0x325   :  { %v1257_v33 = vpack.c.bf16 %v1246_v5, %v1246_v5 }
 0x327   :  { %1483 = vmatmul.mubr.bf16.vlgmr.msra.gmra.mxu0 %v1257_v33  ;;  %1524 = vmatmul.mubr.bf16.vlgmr.msra.gmra.mxu1 %v1257_v33 }
 0x328   :  { %1796 = vmatprep.mubr.bf16.mxu0 %v4074_v46  ;;  %1837 = vmatprep.mubr.bf16.mxu1 %v4074_v46 }
 0x329   :  { %1765 = vmatpush1.bf16.msra.mxu0 %v3813_v59  ;;  %1806 = vmatpush1.bf16.msra.mxu1 %v3815_v26 }
 0x32a   :  { %1766 = vmatprep.subr.bf16.mxu0 %v3821_v3  ;;  %1807 = vmatprep.subr.bf16.mxu1 %v3823_v47 }
 0x32d   :  { %1767 = vmatpush1.bf16.msra.mxu0 %v3825_v57  ;;  %1808 = vmatpush1.bf16.msra.mxu1 %v3827_v43 }
 0x32e   :  { %1768 = vmatprep.subr.bf16.mxu0 %v3833_v6  ;;  %1809 = vmatprep.subr.bf16.mxu1 %v3835_v45 }
 0x331   :  { %1769 = vmatpush1.bf16.msra.mxu0 %v3837_v8  ;;  %1810 = vmatpush1.bf16.msra.mxu1 %v3839_v10 }
 0x332   :  { %1770 = vmatprep.subr.bf16.mxu0 %v3845_v63  ;;  %1811 = vmatprep.subr.bf16.mxu1 %v3847_v58 }
 0x335   :  { %1771 = vmatpush1.bf16.msra.mxu0 %v3849_v44  ;;  %1812 = vmatpush1.bf16.msra.mxu1 %v3851_v60 }
 0x336   :  { %1772 = vmatprep.subr.bf16.mxu0 %v3855_v54  ;;  %1813 = vmatprep.subr.bf16.mxu1 %v3857_v0 }
 0x339   :  { %1773 = vmatpush1.bf16.msra.mxu0 %v3861_v56  ;;  %1814 = vmatpush1.bf16.msra.mxu1 %v3863_v1 }
 0x33a   :  { %1774 = vmatprep.subr.bf16.mxu0 %v3867_v50  ;;  %1815 = vmatprep.subr.bf16.mxu1 %v3869_v51 }
 0x33d   :  { %1775 = vmatpush1.bf16.msra.mxu0 %v3873_v48  ;;  %1816 = vmatpush1.bf16.msra.mxu1 %v3875_v49 }
 0x33e   :  { %1776 = vmatprep.subr.bf16.mxu0 %v3879_v2  ;;  %1817 = vmatprep.subr.bf16.mxu1 %v3881_v61 }
 0x341   :  { %1777 = vmatpush1.bf16.msra.mxu0 %v3885_v55  ;;  %1818 = vmatpush1.bf16.msra.mxu1 %v3887_v62 }
 0x342   :  { %1778 = vmatprep.subr.bf16.mxu0 %v3891_v53  ;;  %1819 = vmatprep.subr.bf16.mxu1 %v3893_v7 }
 0x345   :  { %1779 = vmatpush1.bf16.msra.mxu0 %v3897_v9  ;;  %1820 = vmatpush1.bf16.msra.mxu1 %v3899_v11 }
 0x346   :  { %2078 = vmatprep.subr.bf16.mxu0 %v3809_v42  ;;  %2119 = vmatprep.subr.bf16.mxu1 %v3811_v52 }
 0x3e7   :  { %v1484_v12 = vpop.f32.mrf.mxu0  ;;  %v1525_v13 = vpop.f32.mrf.mxu1 }
 0x3e8   :  { %v1532_v16 = vadd.f32 %v1484_v12, %v4076_v14  ;;  %v1534_v31 = vadd.f32 %v1525_v13, %v4079_v30 }
 0x3e9   :  { %v1486_v17 = vpop.f32.mrf.mxu0  ;;  %v1527_v18 = vpop.f32.mrf.mxu1 }
 0x3ea   :  { %v3005_v19 = vmul.f32 -1.442695, %v1532_v16  ;;  %v1533_v21 = vadd.f32 %v1486_v17, %v4077_v20  ;;  %v1535_v29 = vadd.f32 %v1527_v18, %v4078_v28 }
 0x3eb   :  { %v1488_v22 = vpop.f32.mrf.mxu0  ;;  %v1529_v23 = vpop.f32.mrf.mxu1 }
 0x3ec   :  { %3309 = vpow2.f32 %v3005_v19  ;;  %v3006_v24 = vmul.f32 -1.442695, %v1533_v21  ;;  %v3007_v32 = vmul.f32 -1.442695, %v1535_v29  ;;  %v4080_v21 = vld [vmem:[#allocation14_spill] sm:$0xff] }
 0x3ed   :  { %v1489_v25 = vpop.f32.mrf.mxu0  ;;  %v1530_v27 = vpop.f32.mrf.mxu1 }
 0x3ee   :  { %3311 = vpow2.f32 %v3006_v24  ;;  %v4081_v27 = vld [vmem:[#allocation16_spill] sm:$0xff] }
 0x3ef   :  { %3313 = vtanh.f32 %v1534_v31 }
 0x3f0   :  { %3315 = vpow2.f32 %v3007_v32 }
 0x3f9   :  { %v3310_v34 = vpop.eup %3309 }
 0x3fa   :  { %v1539_v35 = vadd.f32 1.0, %v3310_v34 }
 0x3fb   :  { %v3312_v36 = vpop.eup %3311 }
 0x3fc   :  { %3317 = vrcp.f32 %v1539_v35  ;;  %v1545_v37 = vadd.f32 1.0, %v3312_v36  ;;  %v3314_v38 = vpop.eup %3313  ;;  %v4082_v35 = vld [vmem:[#allocation17_spill] sm:$0xff] }
 0x3fd   :  { %v3316_v40 = vpop.eup %3315 }
 0x3fe   :  { %3319 = vrcp.f32 %v1545_v37  ;;  %v1552_v12 = vadd.f32 1.0, %v3316_v40  ;;  %v4083_v37 = vld [vmem:[#allocation15_spill] sm:$0xff] }
 0x400   :  { %3321 = vrcp.f32 %v1552_v12 }
 0x409   :  { %v3318_v41 = vpop.eup %3317 }
 0x40a   :  { %v1557_v5 = vmul.f32 %v3318_v41, %v3314_v38 }
 0x40b   :  { %v3320_v33 = vpop.eup %3319 }
 0x40c   :  { %v1556_v14 = vmul.f32 %v3320_v33, %v3804_v39 }
 0x40d   :  { %v3322_v13 = vpop.eup %3321 }
 0x40e   :  { %v3912_v16 = vadd.f32 %v1557_v5, %v1556_v14 }
 0x410   :  { %3323 = vtanh.f32 %v3912_v16 }
 0x41d   :  { %v3324_v17 = vpop.eup %3323 }
 0x41e   :  { %v1560_v18 = vmul.f32 %v3324_v17, %v3322_v13 }
 0x420   :  { %v1571_v19 = vpack.c.bf16 %v1560_v18, %v1560_v18 }
 0x422   :  { %1797 = vmatmul.mubr.bf16.vlgmr.msra.gmra.mxu0 %v1571_v19  ;;  %1838 = vmatmul.mubr.bf16.vlgmr.msra.gmra.mxu1 %v1571_v19 }
 0x423   :  { %2079 = vmatpush1.bf16.msra.mxu0 %v3813_v59  ;;  %2120 = vmatpush1.bf16.msra.mxu1 %v3815_v26 }
 0x424   :  { %2080 = vmatprep.subr.bf16.mxu0 %v3821_v3  ;;  %2121 = vmatprep.subr.bf16.mxu1 %v3823_v47 }
 0x425   :  { %2110 = vmatprep.mubr.bf16.mxu0 %v4074_v46  ;;  %2151 = vmatprep.mubr.bf16.mxu1 %v4074_v46 }
 0x427   :  { %2081 = vmatpush1.bf16.msra.mxu0 %v3825_v57  ;;  %2122 = vmatpush1.bf16.msra.mxu1 %v3827_v43 }
 0x428   :  { %2082 = vmatprep.subr.bf16.mxu0 %v3833_v6  ;;  %2123 = vmatprep.subr.bf16.mxu1 %v3835_v45 }
 0x42b   :  { %2083 = vmatpush1.bf16.msra.mxu0 %v3837_v8  ;;  %2124 = vmatpush1.bf16.msra.mxu1 %v3839_v10 }
 0x42c   :  { %2084 = vmatprep.subr.bf16.mxu0 %v3845_v63  ;;  %2125 = vmatprep.subr.bf16.mxu1 %v3847_v58 }
 0x42f   :  { %2085 = vmatpush1.bf16.msra.mxu0 %v3849_v44  ;;  %2126 = vmatpush1.bf16.msra.mxu1 %v3851_v60 }
 0x430   :  { %2086 = vmatprep.subr.bf16.mxu0 %v3855_v54  ;;  %2127 = vmatprep.subr.bf16.mxu1 %v3857_v0 }
 0x433   :  { %2087 = vmatpush1.bf16.msra.mxu0 %v3861_v56  ;;  %2128 = vmatpush1.bf16.msra.mxu1 %v3863_v1 }
 0x434   :  { %2088 = vmatprep.subr.bf16.mxu0 %v3867_v50  ;;  %2129 = vmatprep.subr.bf16.mxu1 %v3869_v51 }
 0x437   :  { %2089 = vmatpush1.bf16.msra.mxu0 %v3873_v48  ;;  %2130 = vmatpush1.bf16.msra.mxu1 %v3875_v49 }
 0x438   :  { %2090 = vmatprep.subr.bf16.mxu0 %v3879_v2  ;;  %2131 = vmatprep.subr.bf16.mxu1 %v3881_v61 }
 0x43b   :  { %2091 = vmatpush1.bf16.msra.mxu0 %v3885_v55  ;;  %2132 = vmatpush1.bf16.msra.mxu1 %v3887_v62 }
 0x43c   :  { %2092 = vmatprep.subr.bf16.mxu0 %v3891_v53  ;;  %2133 = vmatprep.subr.bf16.mxu1 %v3893_v7 }
 0x43f   :  { %2093 = vmatpush1.bf16.msra.mxu0 %v3897_v9  ;;  %2134 = vmatpush1.bf16.msra.mxu1 %v3899_v11 }
 0x440   :  { %2392 = vmatprep.subr.bf16.mxu0 %v3809_v42  ;;  %2433 = vmatprep.subr.bf16.mxu1 %v3811_v52 }
 0x4e2   :  { %v1798_v39 = vpop.f32.mrf.mxu0  ;;  %v1839_v20 = vpop.f32.mrf.mxu1 }
 0x4e3   :  { %v1846_v22 = vadd.f32 %v1798_v39, %v4080_v21  ;;  %v1848_v38 = vadd.f32 %v1839_v20, %v4083_v37 }
 0x4e4   :  { %v1800_v23 = vpop.f32.mrf.mxu0  ;;  %v1841_v24 = vpop.f32.mrf.mxu1 }
 0x4e5   :  { %v3040_v25 = vmul.f32 -1.442695, %v1846_v22  ;;  %v1847_v28 = vadd.f32 %v1800_v23, %v4081_v27  ;;  %v1849_v36 = vadd.f32 %v1841_v24, %v4082_v35 }
 0x4e6   :  { %v1802_v29 = vpop.f32.mrf.mxu0  ;;  %v1843_v30 = vpop.f32.mrf.mxu1 }
 0x4e7   :  { %3325 = vpow2.f32 %v3040_v25  ;;  %v3041_v31 = vmul.f32 -1.442695, %v1847_v28  ;;  %v3042_v40 = vmul.f32 -1.442695, %v1849_v36  ;;  %v4084_v28 = vld [vmem:[#allocation18_spill] sm:$0xff] }
 0x4e8   :  { %v1803_v32 = vpop.f32.mrf.mxu0  ;;  %v1844_v34 = vpop.f32.mrf.mxu1 }
 0x4e9   :  { %3327 = vpow2.f32 %v3041_v31  ;;  %v4085_v34 = vld [vmem:[#allocation20_spill] sm:$0xff] }
 0x4ea   :  { %3329 = vtanh.f32 %v1848_v38 }
 0x4eb   :  { %3331 = vpow2.f32 %v3042_v40 }
 0x4f4   :  { %v3326_v41 = vpop.eup %3325 }
 0x4f5   :  { %v1853_v5 = vadd.f32 1.0, %v3326_v41 }
 0x4f6   :  { %v3328_v33 = vpop.eup %3327 }
 0x4f7   :  { %3333 = vrcp.f32 %v1853_v5  ;;  %v1859_v12 = vadd.f32 1.0, %v3328_v33  ;;  %v3330_v14 = vpop.eup %3329  ;;  %v4086_v5 = vld [vmem:[#allocation21_spill] sm:$0xff]  ;;  %v4087_v33 = vld [vmem:[#allocation19_spill] sm:$0xff] }
 0x4f8   :  { %v3332_v13 = vpop.eup %3331 }
 0x4f9   :  { %3335 = vrcp.f32 %v1859_v12  ;;  %v1866_v39 = vadd.f32 1.0, %v3332_v13 }
 0x4fb   :  { %3337 = vrcp.f32 %v1866_v39 }
 0x504   :  { %v3334_v17 = vpop.eup %3333 }
 0x505   :  { %v1871_v18 = vmul.f32 %v3334_v17, %v3330_v14 }
 0x506   :  { %v3336_v19 = vpop.eup %3335 }
 0x507   :  { %v1870_v21 = vmul.f32 %v3336_v19, %v3912_v16 }
 0x508   :  { %v3338_v20 = vpop.eup %3337 }
 0x509   :  { %v3954_v22 = vadd.f32 %v1871_v18, %v1870_v21 }
 0x50b   :  { %3339 = vtanh.f32 %v3954_v22 }
 0x518   :  { %v3340_v23 = vpop.eup %3339 }
 0x519   :  { %v1874_v24 = vmul.f32 %v3340_v23, %v3338_v20 }
 0x51b   :  { %v1885_v25 = vpack.c.bf16 %v1874_v24, %v1874_v24 }
 0x51d   :  { %2111 = vmatmul.mubr.bf16.vlgmr.msra.gmra.mxu0 %v1885_v25  ;;  %2152 = vmatmul.mubr.bf16.vlgmr.msra.gmra.mxu1 %v1885_v25 }
 0x51e   :  { %2393 = vmatpush1.bf16.msra.mxu0 %v3813_v59  ;;  %2434 = vmatpush1.bf16.msra.mxu1 %v3815_v26 }
 0x51f   :  { %2394 = vmatprep.subr.bf16.mxu0 %v3821_v3  ;;  %2435 = vmatprep.subr.bf16.mxu1 %v3823_v47 }
 0x520   :  { %2424 = vmatprep.mubr.bf16.mxu0 %v4074_v46  ;;  %2465 = vmatprep.mubr.bf16.mxu1 %v4074_v46 }
 0x522   :  { %2395 = vmatpush1.bf16.msra.mxu0 %v3825_v57  ;;  %2436 = vmatpush1.bf16.msra.mxu1 %v3827_v43 }
 0x523   :  { %2396 = vmatprep.subr.bf16.mxu0 %v3833_v6  ;;  %2437 = vmatprep.subr.bf16.mxu1 %v3835_v45 }
 0x526   :  { %2397 = vmatpush1.bf16.msra.mxu0 %v3837_v8  ;;  %2438 = vmatpush1.bf16.msra.mxu1 %v3839_v10 }
 0x527   :  { %2398 = vmatprep.subr.bf16.mxu0 %v3845_v63  ;;  %2439 = vmatprep.subr.bf16.mxu1 %v3847_v58 }
 0x52a   :  { %2399 = vmatpush1.bf16.msra.mxu0 %v3849_v44  ;;  %2440 = vmatpush1.bf16.msra.mxu1 %v3851_v60 }
 0x52b   :  { %2400 = vmatprep.subr.bf16.mxu0 %v3855_v54  ;;  %2441 = vmatprep.subr.bf16.mxu1 %v3857_v0 }
 0x52e   :  { %2401 = vmatpush1.bf16.msra.mxu0 %v3861_v56  ;;  %2442 = vmatpush1.bf16.msra.mxu1 %v3863_v1 }
 0x52f   :  { %2402 = vmatprep.subr.bf16.mxu0 %v3867_v50  ;;  %2443 = vmatprep.subr.bf16.mxu1 %v3869_v51 }
 0x532   :  { %2403 = vmatpush1.bf16.msra.mxu0 %v3873_v48  ;;  %2444 = vmatpush1.bf16.msra.mxu1 %v3875_v49 }
 0x533   :  { %2404 = vmatprep.subr.bf16.mxu0 %v3879_v2  ;;  %2445 = vmatprep.subr.bf16.mxu1 %v3881_v61 }
 0x536   :  { %2405 = vmatpush1.bf16.msra.mxu0 %v3885_v55  ;;  %2446 = vmatpush1.bf16.msra.mxu1 %v3887_v62 }
 0x537   :  { %2406 = vmatprep.subr.bf16.mxu0 %v3891_v53  ;;  %2447 = vmatprep.subr.bf16.mxu1 %v3893_v7 }
 0x53a   :  { %2407 = vmatpush1.bf16.msra.mxu0 %v3897_v9  ;;  %2448 = vmatpush1.bf16.msra.mxu1 %v3899_v11 }
 0x53b   :  { %2706 = vmatprep.subr.bf16.mxu0 %v3809_v42  ;;  %2747 = vmatprep.subr.bf16.mxu1 %v3811_v52 }
 0x5dd   :  { %v2112_v16 = vpop.f32.mrf.mxu0  ;;  %v2153_v27 = vpop.f32.mrf.mxu1 }
 0x5de   :  { %v2160_v29 = vadd.f32 %v2112_v16, %v4084_v28  ;;  %v2162_v52 = vadd.f32 %v2153_v27, %v4087_v33 }
 0x5df   :  { %v2114_v30 = vpop.f32.mrf.mxu0  ;;  %v2155_v31 = vpop.f32.mrf.mxu1 }
 0x5e0   :  { %v3075_v32 = vmul.f32 -1.442695, %v2160_v29  ;;  %v2161_v35 = vadd.f32 %v2114_v30, %v4085_v34  ;;  %v2163_v42 = vadd.f32 %v2155_v31, %v4086_v5 }
 0x5e1   :  { %v2116_v36 = vpop.f32.mrf.mxu0  ;;  %v2157_v37 = vpop.f32.mrf.mxu1 }
 0x5e2   :  { %3341 = vpow2.f32 %v3075_v32  ;;  %v3076_v38 = vmul.f32 -1.442695, %v2161_v35  ;;  %v3077_v12 = vmul.f32 -1.442695, %v2163_v42  ;;  %v4092_v37 = vld [vmem:[#allocation26_spill] sm:$0xff] }
 0x5e3   :  { %v2117_v40 = vpop.f32.mrf.mxu0  ;;  %v2158_v41 = vpop.f32.mrf.mxu1 }
 0x5e4   :  { %3343 = vpow2.f32 %v3076_v38 }
 0x5e5   :  { %3345 = vtanh.f32 %v2162_v52 }
 0x5e6   :  { %3347 = vpow2.f32 %v3077_v12 }
 0x5ef   :  { %v3342_v14 = vpop.eup %3341 }
 0x5f0   :  { %v2167_v13 = vadd.f32 1.0, %v3342_v14 }
 0x5f1   :  { %v3344_v17 = vpop.eup %3343 }
 0x5f2   :  { %3349 = vrcp.f32 %v2167_v13  ;;  %v2173_v18 = vadd.f32 1.0, %v3344_v17  ;;  %v3346_v19 = vpop.eup %3345 }
 0x5f3   :  { %v3348_v39 = vpop.eup %3347 }
 0x5f4   :  { %3351 = vrcp.f32 %v2173_v18  ;;  %v2180_v24 = vadd.f32 1.0, %v3348_v39  ;;  %v4093_v18 = vld [vmem:[#allocation27_spill] sm:$0xff] }
 0x5f6   :  { %3353 = vrcp.f32 %v2180_v24 }
 0x5ff   :  { %v3350_v21 = vpop.eup %3349 }
 0x600   :  { %v2185_v20 = vmul.f32 %v3350_v21, %v3346_v19 }
 0x601   :  { %v3352_v23 = vpop.eup %3351 }
 0x602   :  { %v2184_v25 = vmul.f32 %v3352_v23, %v3954_v22 }
 0x603   :  { %v3354_v27 = vpop.eup %3353 }
 0x604   :  { %v3996_v16 = vadd.f32 %v2185_v20, %v2184_v25 }
 0x606   :  { %3355 = vtanh.f32 %v3996_v16 }
 0x613   :  { %v3356_v28 = vpop.eup %3355 }
 0x614   :  { %v2188_v29 = vmul.f32 %v3356_v28, %v3354_v27 }
 0x616   :  { %v2199_v30 = vpack.c.bf16 %v2188_v29, %v2188_v29 }
 0x618   :  { %2425 = vmatmul.mubr.bf16.vlgmr.msra.gmra.mxu0 %v2199_v30  ;;  %2466 = vmatmul.mubr.bf16.vlgmr.msra.gmra.mxu1 %v2199_v30 }
 0x619   :  { %2707 = vmatpush1.bf16.msra.mxu0 %v3813_v59  ;;  %2748 = vmatpush1.bf16.msra.mxu1 %v3815_v26  ;;  %v4088_v26 = vld [vmem:[#allocation22_spill] sm:$0xff] }
 0x61a   :  { %2708 = vmatprep.subr.bf16.mxu0 %v3821_v3  ;;  %2749 = vmatprep.subr.bf16.mxu1 %v3823_v47 }
 0x61b   :  { %2738 = vmatprep.mubr.bf16.mxu0 %v4074_v46  ;;  %2779 = vmatprep.mubr.bf16.mxu1 %v4074_v46 }
 0x61d   :  { %2709 = vmatpush1.bf16.msra.mxu0 %v3825_v57  ;;  %2750 = vmatpush1.bf16.msra.mxu1 %v3827_v43 }
 0x61e   :  { %2710 = vmatprep.subr.bf16.mxu0 %v3833_v6  ;;  %2751 = vmatprep.subr.bf16.mxu1 %v3835_v45  ;;  %v4089_v6 = vld [vmem:[#allocation24_spill] sm:$0xff] }
 0x621   :  { %2711 = vmatpush1.bf16.msra.mxu0 %v3837_v8  ;;  %2752 = vmatpush1.bf16.msra.mxu1 %v3839_v10 }
 0x622   :  { %2712 = vmatprep.subr.bf16.mxu0 %v3845_v63  ;;  %2753 = vmatprep.subr.bf16.mxu1 %v3847_v58 }
 0x625   :  { %2713 = vmatpush1.bf16.msra.mxu0 %v3849_v44  ;;  %2754 = vmatpush1.bf16.msra.mxu1 %v3851_v60  ;;  %v4090_v60 = vld [vmem:[#allocation25_spill] sm:$0xff] }
 0x626   :  { %2714 = vmatprep.subr.bf16.mxu0 %v3855_v54  ;;  %2755 = vmatprep.subr.bf16.mxu1 %v3857_v0  ;;  %v4091_v0 = vld [vmem:[#allocation23_spill] sm:$0xff] }
 0x629   :  { %2715 = vmatpush1.bf16.msra.mxu0 %v3861_v56  ;;  %2756 = vmatpush1.bf16.msra.mxu1 %v3863_v1 }
 0x62a   :  { %2716 = vmatprep.subr.bf16.mxu0 %v3867_v50  ;;  %2757 = vmatprep.subr.bf16.mxu1 %v3869_v51 }
 0x62d   :  { %2717 = vmatpush1.bf16.msra.mxu0 %v3873_v48  ;;  %2758 = vmatpush1.bf16.msra.mxu1 %v3875_v49 }
 0x62e   :  { %2718 = vmatprep.subr.bf16.mxu0 %v3879_v2  ;;  %2759 = vmatprep.subr.bf16.mxu1 %v3881_v61 }
 0x631   :  { %2719 = vmatpush1.bf16.msra.mxu0 %v3885_v55  ;;  %2760 = vmatpush1.bf16.msra.mxu1 %v3887_v62 }
 0x632   :  { %2720 = vmatprep.subr.bf16.mxu0 %v3891_v53  ;;  %2761 = vmatprep.subr.bf16.mxu1 %v3893_v7 }
 0x635   :  { %2721 = vmatpush1.bf16.msra.mxu0 %v3897_v9  ;;  %2762 = vmatpush1.bf16.msra.mxu1 %v3899_v11 }
 0x6d8   :  { %v2426_v46 = vpop.f32.mrf.mxu0  ;;  %v2467_v59 = vpop.f32.mrf.mxu1 }
 0x6d9   :  { %v2474_v3 = vadd.f32 %v2426_v46, %v4088_v26  ;;  %v2476_v56 = vadd.f32 %v2467_v59, %v4091_v0  ;;  %v3148_v26 = vld [vmem:[%s4050_s4] ss:$0 sm:$0xff] }
 0x6da   :  { %v2428_v47 = vpop.f32.mrf.mxu0  ;;  %v2469_v57 = vpop.f32.mrf.mxu1 }
 0x6db   :  { %v3110_v43 = vmul.f32 -1.442695, %v2474_v3  ;;  %v2475_v45 = vadd.f32 %v2428_v47, %v4089_v6  ;;  %v2477_v54 = vadd.f32 %v2469_v57, %v4090_v60  ;;  %v3149_v57 = vld [vmem:[#allocation5] ss:$0 sm:$0xff] }
 0x6dc   :  { %v2430_v8 = vpop.f32.mrf.mxu0  ;;  %v2471_v10 = vpop.f32.mrf.mxu1 }
 0x6dd   :  { %3357 = vpow2.f32 %v3110_v43  ;;  %v3111_v63 = vmul.f32 -1.442695, %v2475_v45  ;;  %v3112_v1 = vmul.f32 -1.442695, %v2477_v54 }
 0x6de   :  { %v2431_v58 = vpop.f32.mrf.mxu0  ;;  %v2472_v44 = vpop.f32.mrf.mxu1 }
 0x6df   :  { %3359 = vpow2.f32 %v3111_v63 }
 0x6e0   :  { %3361 = vtanh.f32 %v2476_v56 }
 0x6e1   :  { %3363 = vpow2.f32 %v3112_v1 }
 0x6ea   :  { %v3358_v50 = vpop.eup %3357 }
 0x6eb   :  { %v2481_v51 = vadd.f32 1.0, %v3358_v50 }
 0x6ec   :  { %v3360_v48 = vpop.eup %3359 }
 0x6ed   :  { %3365 = vrcp.f32 %v2481_v51  ;;  %v2487_v49 = vadd.f32 1.0, %v3360_v48  ;;  %v3362_v2 = vpop.eup %3361 }
 0x6ee   :  { %v3364_v61 = vpop.eup %3363 }
 0x6ef   :  { %3367 = vrcp.f32 %v2487_v49  ;;  %v2494_v7 = vadd.f32 1.0, %v3364_v61 }
 0x6f1   :  { %3369 = vrcp.f32 %v2494_v7 }
 0x6fa   :  { %v3366_v55 = vpop.eup %3365 }
 0x6fb   :  { %v2499_v62 = vmul.f32 %v3366_v55, %v3362_v2 }
 0x6fc   :  { %v3368_v53 = vpop.eup %3367 }
 0x6fd   :  { %v2498_v9 = vmul.f32 %v3368_v53, %v3996_v16 }
 0x6fe   :  { %v3370_v22 = vpop.eup %3369 }
 0x6ff   :  { %v2500_v11 = vadd.f32 %v2499_v62, %v2498_v9 }
 0x701   :  { %3371 = vtanh.f32 %v2500_v11 }
 0x70e   :  { %v3372_v31 = vpop.eup %3371 }
 0x70f   :  { %v2502_v32 = vmul.f32 %v3372_v31, %v3370_v22 }
 0x711   :  { %v2513_v34 = vpack.c.bf16 %v2502_v32, %v2502_v32 }
 0x713   :  { %2739 = vmatmul.mubr.bf16.vlgmr.msra.gmra.mxu0 %v2513_v34  ;;  %2780 = vmatmul.mubr.bf16.vlgmr.msra.gmra.mxu1 %v2513_v34 }
 0x7d3   :  { %v2740_v35 = vpop.f32.mrf.mxu0  ;;  %v2781_v36 = vpop.f32.mrf.mxu1 }
 0x7d4   :  { %v2788_v38 = vadd.f32 %v2740_v35, %v4092_v37  ;;  %v2790_v19 = vadd.f32 %v2781_v36, %v4093_v18 }
 0x7d5   :  { %v2742_v40 = vpop.f32.mrf.mxu0  ;;  %v2783_v41 = vpop.f32.mrf.mxu1 }
 0x7d6   :  { %v3145_v5 = vmul.f32 -1.442695, %v2788_v38  ;;  %v2789_v42 = vadd.f32 %v2742_v40, %v3712_v4  ;;  %v2791_v17 = vadd.f32 %v2783_v41, %v3715_v15 }
 0x7d7   :  { %v2744_v33 = vpop.f32.mrf.mxu0  ;;  %v2785_v52 = vpop.f32.mrf.mxu1 }
 0x7d8   :  { %3373 = vpow2.f32 %v3145_v5  ;;  %v3146_v12 = vmul.f32 -1.442695, %v2789_v42  ;;  %v3147_v39 = vmul.f32 -1.442695, %v2791_v17 }
 0x7d9   :  { %v2745_v14 = vpop.f32.mrf.mxu0  ;;  %v2786_v13 = vpop.f32.mrf.mxu1 }
 0x7da   :  { %3375 = vpow2.f32 %v3146_v12 }
 0x7db   :  { %3377 = vtanh.f32 %v2790_v19 }
 0x7dc   :  { %3379 = vpow2.f32 %v3147_v39 }
 0x7e5   :  { %v3374_v21 = vpop.eup %3373 }
 0x7e6   :  { %v2795_v20 = vadd.f32 1.0, %v3374_v21 }
 0x7e7   :  { %v3376_v23 = vpop.eup %3375 }
 0x7e8   :  { %3381 = vrcp.f32 %v2795_v20  ;;  %v2801_v24 = vadd.f32 1.0, %v3376_v23  ;;  %v3378_v4 = vpop.eup %3377 }
 0x7e9   :  { %v3380_v25 = vpop.eup %3379 }
 0x7ea   :  { %3383 = vrcp.f32 %v2801_v24  ;;  %v2808_v29 = vadd.f32 1.0, %v3380_v25 }
 0x7ec   :  { %3385 = vrcp.f32 %v2808_v29 }
 0x7f5   :  { %v3382_v16 = vpop.eup %3381 }
 0x7f6   :  { %v2813_v27 = vmul.f32 %v3382_v16, %v3378_v4 }
 0x7f7   :  { %v3384_v28 = vpop.eup %3383 }
 0x7f8   :  { %v2812_v30 = vmul.f32 %v3384_v28, %v2500_v11 }
 0x7f9   :  { %v3386_v15 = vpop.eup %3385 }
 0x7fa   :  { %v2814_v46 = vadd.f32 %v2813_v27, %v2812_v30 }
 0x7fc   :  { %3387 = vtanh.f32 %v2814_v46 }
 0x809   :  { %v3388_v59 = vpop.eup %3387 }
 0x80a   :  { %v2816_v3 = vmul.f32 %v3388_v59, %v3386_v15 }
 0x80c   :  { %v2827_v47 = vmul.f32 %v3148_v26, %v2816_v3 }
 0x80e   :  { %2828 = vadd.xlane.f32.xlu0 %v2827_v47 }
 0x897   :  { %v2829_v43 = vpop.xlane.xlu0 %2828 }
 0x898   :  { %v2837_v6 = vadd.f32 %v3149_v57, %v2829_v43 }
 0x89a   :  { %2839 = vst.msk [vmem:[%s4052_s6] sm:$0xff] %vm2838_vm1, %v2837_v6 }
 0x89b   :  { %2844 = vsyncpa [#allocation7], 1 }

</bundles_post_ra>
